<compile_context>
chip_gen: v6e
topology: v6e:2x2x1
jax: 0.10.0
libtpu: 0.0.40
codegen_flags: <defaults>
</compile_context>

<pallas_src>
import jax
import jax.numpy as jnp
from jax.experimental import pallas as pl
from jax.experimental.pallas import tpu as pltpu


def lstmae_kernel(sl_ref, x_ref,
                  ewih_ref, ewhh_ref, eb_ref, fcew_ref, fceb_ref,
                  dwz_ref, dwdt_ref, dwhh_ref, db_ref, fcdw_ref, fcdb_ref,
                  pred_ref, z_ref):
    L, bn, nin = x_ref.shape
    nh = ewhh_ref.shape[0]

    xv = x_ref[...]                      # (L, bn, nin) time-major input
    ewhh = ewhh_ref[...]
    dwhh = dwhh_ref[...]

    def lstm_step(pre, h, c, whh):
        # `pre` already contains the input projection + bias; only h @ W_hh is
        # on the serial critical path.
        gates = pre + jnp.dot(h, whh, preferred_element_type=jnp.float32)
        # Single EUP pass: g-gate weight columns were pre-scaled by 2 in the
        # wrapper, so tanh(pre_g) == 2*sigmoid(2*pre_g) - 1 needs no tanh here.
        sig = jax.nn.sigmoid(gates)
        i = sig[:, 0 * nh:1 * nh]
        f = sig[:, 1 * nh:2 * nh]
        g = 2.0 * sig[:, 2 * nh:3 * nh] - 1.0
        o = sig[:, 3 * nh:4 * nh]
        c_new = f * c + i * g
        h_new = o * jnp.tanh(c_new)
        return h_new, c_new

    # ---------------- encoder ----------------
    ewih = ewih_ref[...]
    eb = eb_ref[...]
    if bn % 8 == 0:
        # One fused input projection for all L steps (single MXU call instead
        # of L tiny K=nin matmuls); per-step slices are static and tile-aligned.
        xproj_flat = jnp.dot(xv.reshape(L * bn, nin), ewih,
                             preferred_element_type=jnp.float32) + eb
        xproj = [xproj_flat[t * bn:(t + 1) * bn, :] for t in range(L)]
    else:
        # Tiny / sublane-unaligned batch tile: per-step projections, still
        # hoisted out of the recurrence.
        xproj = [jnp.dot(xv[t], ewih, preferred_element_type=jnp.float32) + eb
                 for t in range(L)]

    # Clamp guards out-of-range seq_len (PyTorch would index-error instead).
    slm1 = jnp.clip(sl_ref[...] - 1, 0, L - 1)           # (bn, 1) int32

    h = jnp.zeros((bn, nh), jnp.float32)
    c = jnp.zeros((bn, nh), jnp.float32)
    h_sel = jnp.zeros((bn, nh), jnp.float32)
    # Static unroll: L is small here. TODO(synk): switch to lax.fori_loop with a
    # carried (h, c) if L grows beyond ~16 (vreg pressure).
    for t in range(L):
        h, c = lstm_step(xproj[t], h, c, ewhh)
        h_sel = h_sel + h * (slm1 == t).astype(jnp.float32)

    # fce applied once to the selected hidden state (affine => identical to
    # applying fce per step and then selecting).
    z = jnp.dot(h_sel, fcew_ref[...], preferred_element_type=jnp.float32) + fceb_ref[...]
    z_ref[...] = z

    # ---------------- decoder ----------------
    # dropout(p=0) is identity.  x_lat is never built and the full per-step
    # pre-activation is hoisted off the serial path:
    #   pre_t = z @ W[:nl] + b  (time-invariant)  +  dt_t * W[nl]  (rank-1).
    zproj = jnp.dot(z, dwz_ref[...], preferred_element_type=jnp.float32) + db_ref[...]
    dec_pre = xv[:, :, 0:1] * dwdt_ref[...] + zproj      # (L, bn, 4nh) bulk VPU

    h = jnp.zeros((bn, nh), jnp.float32)
    c = jnp.zeros((bn, nh), jnp.float32)
    hs = []
    for t in range(L):
        h, c = lstm_step(dec_pre[t], h, c, dwhh)
        hs.append(h)

    # fcd (nout == 1) applied ONCE after the recurrence as a bulk multiply +
    # lane reduce over the stacked hidden states — no per-step XLU reduces or
    # one-hot mask accumulates interleaved with the serial loop.
    hs_all = jnp.stack(hs, axis=0)                       # (L, bn, nh)
    pred = jnp.sum(hs_all * fcdw_ref[...], axis=-1, keepdims=True) + fcdb_ref[...]
    # TODO(synk): a fully lane-dense (L, bn) store (dropping the size-1 minor
    # dim) would avoid the masked vst; kept 3-D for relayout-free lowering —
    # the output is only L*bn floats so the store cost is negligible.
    pred_ref[...] = pred                                 # (L, bn, 1) time-major


def _scale_g_gate(w, nh):
    """Scale the g-gate block (columns [2nh, 3nh)) of an LSTM weight/bias by 2.

    tanh(x) == 2*sigmoid(2x) - 1, so with pre-scaled g columns the kernel needs
    only one sigmoid EUP pass over the full gate vector per step.
    """
    scale = jnp.concatenate([jnp.ones((2 * nh,), w.dtype),
                             jnp.full((nh,), 2.0, w.dtype),
                             jnp.ones((nh,), w.dtype)])
    return w * scale


def _pick_bn(n):
    """Batch-tile size: fat tiles, but guarantee >= 2 grid steps on 2-TC chips."""
    try:
        kind = jax.devices()[0].device_kind.lower()
    except Exception:  # pragma: no cover - CPU/interpret fallback
        kind = ""
    two_core = "v7" in kind                  # v7x: 2 TensorCores per chip
    min_steps = 2 if two_core else 1
    for cand in (512, 256, 128):             # fat tiles amortize MXU fill/drain
        if n % cand == 0 and n // cand >= min_steps:
            return cand
    if two_core and n % 2 == 0 and (n // 2) % 8 == 0:
        return n // 2                        # both TensorCores get work
    return n                                 # small/awkward batch: single step


def lstmae_forward(x, seq_len, params):
    """Fused LSTMAE forward. seq_len is clamped to [1, L] (see header note)."""
    n, L, nin = x.shape
    nh = params["enc_w_hh"].shape[0]
    nl = params["fce_w"].shape[1]
    nout = params["fcd_w"].shape[0]
    assert nout == 1  # TODO(synk): nout > 1 would need a matmul-based fcd path

    bn = _pick_bn(n)

    x_tm = jnp.transpose(x, (1, 0, 2)).astype(jnp.float32)   # time-major (L, n, nin)
    sl = seq_len.reshape(n, 1).astype(jnp.int32)

    # g-gate columns pre-scaled by 2 outside the kernel (effectively free) so
    # the kernel uses a single sigmoid EUP pass per step.
    g2 = lambda w: _scale_g_gate(w, nh)
    weights = (g2(params["enc_w_ih"]), g2(params["enc_w_hh"]), g2(params["enc_b"]),
               params["fce_w"], params["fce_b"],
               g2(params["dec_wz"]), g2(params["dec_wdt"]), g2(params["dec_w_hh"]),
               g2(params["dec_b"]), params["fcd_w"], params["fcd_b"])

    def wspec(a):
        return pl.BlockSpec(a.shape, lambda i: (0, 0))

    pred_tm, z = pl.pallas_call(
        lstmae_kernel,
        out_shape=(jax.ShapeDtypeStruct((L, n, 1), jnp.float32),
                   jax.ShapeDtypeStruct((n, nl), jnp.float32)),
        grid=(n // bn,),
        in_specs=[pl.BlockSpec((bn, 1), lambda i: (i, 0)),
                  pl.BlockSpec((L, bn, nin), lambda i: (0, i, 0)),
                  *[wspec(w) for w in weights]],
        out_specs=(pl.BlockSpec((L, bn, 1), lambda i: (0, i, 0)),
                   pl.BlockSpec((bn, nl), lambda i: (i, 0))),
        compiler_params=pltpu.CompilerParams(
            dimension_semantics=("parallel",)),
    )(sl, x_tm, *weights)

    # (L, n, 1) time-major -> (n, L); matches torch .squeeze() for nout=1, n>1.
    pred = jnp.transpose(pred_tm[:, :, 0], (1, 0))
    return pred, z


def init_params(key, nin, nh, nl, nout):
    ks = jax.random.split(key, 12)
    bound = 1.0 / float(nh) ** 0.5
    u = lambda k, shp: jax.random.uniform(k, shp, jnp.float32, -bound, bound)
    dec_w_ih = u(ks[6], (4 * nh, nl + 1)).T                          # (nl+1, 4nh)
    # PyTorch LSTM/Linear parameter shapes, pre-transposed for x @ W layout.
    return dict(
        enc_w_ih=u(ks[0], (4 * nh, nin)).T,                          # (nin, 4nh)
        enc_w_hh=u(ks[1], (4 * nh, nh)).T,                           # (nh, 4nh)
        enc_b=(u(ks[2], (4 * nh,)) + u(ks[3], (4 * nh,))).reshape(1, 4 * nh),
        fce_w=u(ks[4], (nl, nh)).T,                                  # (nh, nl)
        fce_b=u(ks[5], (nl,)).reshape(1, nl),
        dec_wz=dec_w_ih[:nl, :],                                     # (nl, 4nh)  z rows
        dec_wdt=dec_w_ih[nl:nl + 1, :],                              # (1, 4nh)   dt row
        dec_w_hh=u(ks[7], (4 * nh, nh)).T,                           # (nh, 4nh)
        dec_b=(u(ks[8], (4 * nh,)) + u(ks[9], (4 * nh,))).reshape(1, 4 * nh),
        fcd_w=u(ks[10], (nout, nh)),                                 # (1, nh) row
        fcd_b=u(ks[11], (nout,)).reshape(1, nout),                   # (1, 1)
    )


def _ref_forward(x, seq_len, p):
    """Pure-JAX reference mirroring the PyTorch LSTMAE forward (true tanh,
    unscaled weights)."""
    n, L, _ = x.shape
    nh = p["enc_w_hh"].shape[0]
    nl = p["fce_w"].shape[1]

    def run_lstm(inputs, w_ih, w_hh, b):          # inputs: (n, L, d)
        h = jnp.zeros((n, nh), jnp.float32)
        c = jnp.zeros((n, nh), jnp.float32)
        hs = []
        for t in range(L):
            gates = inputs[:, t, :] @ w_ih + h @ w_hh + b
            i = jax.nn.sigmoid(gates[:, :nh])
            f = jax.nn.sigmoid(gates[:, nh:2 * nh])
            g = jnp.tanh(gates[:, 2 * nh:3 * nh])
            o = jax.nn.sigmoid(gates[:, 3 * nh:])
            c = f * c + i * g
            h = o * jnp.tanh(c)
            hs.append(h)
        return jnp.stack(hs, axis=1)              # (n, L, nh)

    hs = run_lstm(x, p["enc_w_ih"], p["enc_w_hh"], p["enc_b"])
    z_seq = hs @ p["fce_w"] + p["fce_b"]
    z = z_seq[jnp.arange(n), seq_len - 1]
    dt = x[:, :, 0]
    dec_w_ih = jnp.concatenate([p["dec_wz"], p["dec_wdt"]], axis=0)
    x_lat = jnp.concatenate(
        [jnp.broadcast_to(z[:, None, :], (n, L, nl)), dt[:, :, None]], axis=-1)
    hs_d = run_lstm(x_lat, dec_w_ih, p["dec_w_hh"], p["dec_b"])
    pred = (hs_d @ p["fcd_w"].T + p["fcd_b"]).squeeze(-1)   # (n, L)
    return pred, z


if __name__ == "__main__":
    nin, nh, nl, nout = 4, 32, 8, 1
    n, L = 16, 8      # n=16 exercises the fused (sublane-aligned) encoder path

    key = jax.random.PRNGKey(0)
    kx, ks, kp = jax.random.split(key, 3)
    x = jax.random.normal(kx, (n, L, nin), jnp.float32)
    seq_len = jax.random.randint(ks, (n,), 1, L + 1).astype(jnp.int32)

    params = init_params(kp, nin, nh, nl, nout)

    fwd = jax.jit(lstmae_forward)
    pred, z = fwd(x, seq_len, params)
    jax.block_until_ready((pred, z))

    assert pred.shape == (n, L), pred.shape
    assert z.shape == (n, nl), z.shape

    # Correctness check against a pure-JAX reference (loose tol absorbs MXU
    # default-precision bf16 passes vs the f32 reference; structural bugs would
    # be O(0.1+)).
    pred_exp, z_exp = _ref_forward(x, seq_len, params)
    assert bool(jnp.allclose(pred, pred_exp, atol=5e-2, rtol=5e-2)), \
        float(jnp.max(jnp.abs(pred - pred_exp)))
    assert bool(jnp.allclose(z, z_exp, atol=5e-2, rtol=5e-2)), \
        float(jnp.max(jnp.abs(z - z_exp)))

    print("KERNEL_OK")
</pallas_src>

<mosaic_0001>
module attributes {stable_mosaic.version = 11 : i64} {
  func.func @lstmae_kernel(%arg0: i32, %arg1: memref<16x1xi32, #tpu.memory_space<vmem>>, %arg2: memref<8x16x4xf32, #tpu.memory_space<vmem>>, %arg3: memref<4x128xf32, #tpu.memory_space<vmem>>, %arg4: memref<32x128xf32, #tpu.memory_space<vmem>>, %arg5: memref<1x128xf32, #tpu.memory_space<vmem>>, %arg6: memref<32x8xf32, #tpu.memory_space<vmem>>, %arg7: memref<1x8xf32, #tpu.memory_space<vmem>>, %arg8: memref<8x128xf32, #tpu.memory_space<vmem>>, %arg9: memref<1x128xf32, #tpu.memory_space<vmem>>, %arg10: memref<32x128xf32, #tpu.memory_space<vmem>>, %arg11: memref<1x128xf32, #tpu.memory_space<vmem>>, %arg12: memref<1x32xf32, #tpu.memory_space<vmem>>, %arg13: memref<1x1xf32, #tpu.memory_space<vmem>>, %arg14: memref<8x16x1xf32, #tpu.memory_space<vmem>>, %arg15: memref<16x8xf32, #tpu.memory_space<vmem>>) attributes {dimension_semantics = [#tpu.dimension_semantics<parallel>], iteration_bounds = array<i64: 1>, scalar_prefetch = 0 : i64, scratch_operands = 0 : i64, tpu.core_type = #tpu.core_type<tc>, window_params = [{transform_indices = @transform_0, window_bounds = array<i64: 16, 1>}, {transform_indices = @transform_1, window_bounds = array<i64: 8, 16, 4>}, {pipeline_mode = #tpu.pipeline_mode<synchronous>, transform_indices = @transform_2, window_bounds = array<i64: 4, 128>}, {pipeline_mode = #tpu.pipeline_mode<synchronous>, transform_indices = @transform_3, window_bounds = array<i64: 32, 128>}, {pipeline_mode = #tpu.pipeline_mode<synchronous>, transform_indices = @transform_4, window_bounds = array<i64: 1, 128>}, {pipeline_mode = #tpu.pipeline_mode<synchronous>, transform_indices = @transform_5, window_bounds = array<i64: 32, 8>}, {pipeline_mode = #tpu.pipeline_mode<synchronous>, transform_indices = @transform_6, window_bounds = array<i64: 1, 8>}, {pipeline_mode = #tpu.pipeline_mode<synchronous>, transform_indices = @transform_7, window_bounds = array<i64: 8, 128>}, {pipeline_mode = #tpu.pipeline_mode<synchronous>, transform_indices = @transform_8, window_bounds = array<i64: 1, 128>}, {pipeline_mode = #tpu.pipeline_mode<synchronous>, transform_indices = @transform_9, window_bounds = array<i64: 32, 128>}, {pipeline_mode = #tpu.pipeline_mode<synchronous>, transform_indices = @transform_10, window_bounds = array<i64: 1, 128>}, {pipeline_mode = #tpu.pipeline_mode<synchronous>, transform_indices = @transform_11, window_bounds = array<i64: 1, 32>}, {pipeline_mode = #tpu.pipeline_mode<synchronous>, transform_indices = @transform_12, window_bounds = array<i64: 1, 1>}, {transform_indices = @transform_13, window_bounds = array<i64: 8, 16, 1>}, {transform_indices = @transform_14, window_bounds = array<i64: 16, 8>}]} {
    %c0 = arith.constant 0 : index
    %c0_0 = arith.constant 0 : index
    %c0_1 = arith.constant 0 : index
    %0 = vector.load %arg2[%c0, %c0_0, %c0_1] : memref<8x16x4xf32, #tpu.memory_space<vmem>>, vector<8x16x4xf32>
    %c0_2 = arith.constant 0 : index
    %c0_3 = arith.constant 0 : index
    %1 = vector.load %arg4[%c0_2, %c0_3] : memref<32x128xf32, #tpu.memory_space<vmem>>, vector<32x128xf32>
    %c0_4 = arith.constant 0 : index
    %c0_5 = arith.constant 0 : index
    %2 = vector.load %arg10[%c0_4, %c0_5] : memref<32x128xf32, #tpu.memory_space<vmem>>, vector<32x128xf32>
    %c0_6 = arith.constant 0 : index
    %c0_7 = arith.constant 0 : index
    %3 = vector.load %arg3[%c0_6, %c0_7] : memref<4x128xf32, #tpu.memory_space<vmem>>, vector<4x128xf32>
    %c0_8 = arith.constant 0 : index
    %c0_9 = arith.constant 0 : index
    %4 = vector.load %arg5[%c0_8, %c0_9] : memref<1x128xf32, #tpu.memory_space<vmem>>, vector<1x128xf32>
    %5 = vector.shape_cast %0 : vector<8x16x4xf32> to vector<128x4xf32>
    %cst = arith.constant dense<0.000000e+00> : vector<128x128xf32>
    %6 = tpu.matmul %5, %3, %cst {dimension_numbers = #tpu.dot_dimension_numbers<[1], [0], [0], [1], [0, 0, 1, 1], [], []>} : vector<128x4xf32>, vector<4x128xf32>, vector<128x128xf32> -> vector<128x128xf32>
    %7 = vector.broadcast %4 : vector<1x128xf32> to vector<128x128xf32>
    %8 = arith.addf %6, %7 : vector<128x128xf32>
    %9 = vector.extract_strided_slice %8 {offsets = [0, 0], sizes = [16, 128], strides = [1, 1]} : vector<128x128xf32> to vector<16x128xf32>
    %10 = vector.extract_strided_slice %8 {offsets = [16, 0], sizes = [16, 128], strides = [1, 1]} : vector<128x128xf32> to vector<16x128xf32>
    %11 = vector.extract_strided_slice %8 {offsets = [32, 0], sizes = [16, 128], strides = [1, 1]} : vector<128x128xf32> to vector<16x128xf32>
    %12 = vector.extract_strided_slice %8 {offsets = [48, 0], sizes = [16, 128], strides = [1, 1]} : vector<128x128xf32> to vector<16x128xf32>
    %13 = vector.extract_strided_slice %8 {offsets = [64, 0], sizes = [16, 128], strides = [1, 1]} : vector<128x128xf32> to vector<16x128xf32>
    %14 = vector.extract_strided_slice %8 {offsets = [80, 0], sizes = [16, 128], strides = [1, 1]} : vector<128x128xf32> to vector<16x128xf32>
    %15 = vector.extract_strided_slice %8 {offsets = [96, 0], sizes = [16, 128], strides = [1, 1]} : vector<128x128xf32> to vector<16x128xf32>
    %16 = vector.extract_strided_slice %8 {offsets = [112, 0], sizes = [16, 128], strides = [1, 1]} : vector<128x128xf32> to vector<16x128xf32>
    %c0_10 = arith.constant 0 : index
    %c0_11 = arith.constant 0 : index
    %17 = vector.load %arg1[%c0_10, %c0_11] : memref<16x1xi32, #tpu.memory_space<vmem>>, vector<16x1xi32>
    %c1_i32 = arith.constant 1 : i32
    %18 = vector.broadcast %c1_i32 : i32 to vector<16x1xi32>
    %19 = arith.subi %17, %18 : vector<16x1xi32>
    %c0_i32 = arith.constant 0 : i32
    %c7_i32 = arith.constant 7 : i32
    %20 = vector.broadcast %c0_i32 : i32 to vector<16x1xi32>
    %21 = arith.maxsi %20, %19 : vector<16x1xi32>
    %22 = vector.broadcast %c7_i32 : i32 to vector<16x1xi32>
    %23 = arith.minsi %22, %21 : vector<16x1xi32>
    %cst_12 = arith.constant 0.000000e+00 : f32
    %24 = vector.broadcast %cst_12 : f32 to vector<16x32xf32>
    %cst_13 = arith.constant 0.000000e+00 : f32
    %25 = vector.broadcast %cst_13 : f32 to vector<16x32xf32>
    %cst_14 = arith.constant 0.000000e+00 : f32
    %26 = vector.broadcast %cst_14 : f32 to vector<16x32xf32>
    %cst_15 = arith.constant dense<0.000000e+00> : vector<16x128xf32>
    %27 = tpu.matmul %24, %1, %cst_15 {dimension_numbers = #tpu.dot_dimension_numbers<[1], [0], [0], [1], [0, 0, 1, 1], [], []>} : vector<16x32xf32>, vector<32x128xf32>, vector<16x128xf32> -> vector<16x128xf32>
    %28 = arith.addf %9, %27 : vector<16x128xf32>
    %29 = arith.negf %28 : vector<16x128xf32>
    %30 = math.exp %29 : vector<16x128xf32>
    %cst_16 = arith.constant 1.000000e+00 : f32
    %31 = vector.broadcast %cst_16 : f32 to vector<16x128xf32>
    %32 = arith.addf %31, %30 : vector<16x128xf32>
    %33 = arith.divf %31, %32 : vector<16x128xf32>
    %34 = vector.extract_strided_slice %33 {offsets = [0, 0], sizes = [16, 32], strides = [1, 1]} : vector<16x128xf32> to vector<16x32xf32>
    %35 = vector.extract_strided_slice %33 {offsets = [0, 32], sizes = [16, 32], strides = [1, 1]} : vector<16x128xf32> to vector<16x32xf32>
    %36 = vector.extract_strided_slice %33 {offsets = [0, 64], sizes = [16, 32], strides = [1, 1]} : vector<16x128xf32> to vector<16x32xf32>
    %cst_17 = arith.constant 2.000000e+00 : f32
    %37 = vector.broadcast %cst_17 : f32 to vector<16x32xf32>
    %38 = arith.mulf %37, %36 : vector<16x32xf32>
    %cst_18 = arith.constant 1.000000e+00 : f32
    %39 = vector.broadcast %cst_18 : f32 to vector<16x32xf32>
    %40 = arith.subf %38, %39 : vector<16x32xf32>
    %41 = vector.extract_strided_slice %33 {offsets = [0, 96], sizes = [16, 32], strides = [1, 1]} : vector<16x128xf32> to vector<16x32xf32>
    %42 = arith.mulf %35, %25 : vector<16x32xf32>
    %43 = arith.mulf %34, %40 : vector<16x32xf32>
    %44 = arith.addf %42, %43 : vector<16x32xf32>
    %45 = math.tanh %44 : vector<16x32xf32>
    %46 = arith.mulf %41, %45 : vector<16x32xf32>
    %c0_i32_19 = arith.constant 0 : i32
    %47 = vector.broadcast %c0_i32_19 : i32 to vector<16x1xi32>
    %48 = arith.cmpi eq, %23, %47 : vector<16x1xi32>
    %49 = arith.extui %48 : vector<16x1xi1> to vector<16x1xi32>
    %50 = arith.sitofp %49 : vector<16x1xi32> to vector<16x1xf32>
    %51 = vector.broadcast %50 : vector<16x1xf32> to vector<16x32xf32>
    %52 = arith.mulf %46, %51 : vector<16x32xf32>
    %53 = arith.addf %26, %52 : vector<16x32xf32>
    %cst_20 = arith.constant dense<0.000000e+00> : vector<16x128xf32>
    %54 = tpu.matmul %46, %1, %cst_20 {dimension_numbers = #tpu.dot_dimension_numbers<[1], [0], [0], [1], [0, 0, 1, 1], [], []>} : vector<16x32xf32>, vector<32x128xf32>, vector<16x128xf32> -> vector<16x128xf32>
    %55 = arith.addf %10, %54 : vector<16x128xf32>
    %56 = arith.negf %55 : vector<16x128xf32>
    %57 = math.exp %56 : vector<16x128xf32>
    %cst_21 = arith.constant 1.000000e+00 : f32
    %58 = vector.broadcast %cst_21 : f32 to vector<16x128xf32>
    %59 = arith.addf %58, %57 : vector<16x128xf32>
    %60 = arith.divf %58, %59 : vector<16x128xf32>
    %61 = vector.extract_strided_slice %60 {offsets = [0, 0], sizes = [16, 32], strides = [1, 1]} : vector<16x128xf32> to vector<16x32xf32>
    %62 = vector.extract_strided_slice %60 {offsets = [0, 32], sizes = [16, 32], strides = [1, 1]} : vector<16x128xf32> to vector<16x32xf32>
    %63 = vector.extract_strided_slice %60 {offsets = [0, 64], sizes = [16, 32], strides = [1, 1]} : vector<16x128xf32> to vector<16x32xf32>
    %cst_22 = arith.constant 2.000000e+00 : f32
    %64 = vector.broadcast %cst_22 : f32 to vector<16x32xf32>
    %65 = arith.mulf %64, %63 : vector<16x32xf32>
    %cst_23 = arith.constant 1.000000e+00 : f32
    %66 = vector.broadcast %cst_23 : f32 to vector<16x32xf32>
    %67 = arith.subf %65, %66 : vector<16x32xf32>
    %68 = vector.extract_strided_slice %60 {offsets = [0, 96], sizes = [16, 32], strides = [1, 1]} : vector<16x128xf32> to vector<16x32xf32>
    %69 = arith.mulf %62, %44 : vector<16x32xf32>
    %70 = arith.mulf %61, %67 : vector<16x32xf32>
    %71 = arith.addf %69, %70 : vector<16x32xf32>
    %72 = math.tanh %71 : vector<16x32xf32>
    %73 = arith.mulf %68, %72 : vector<16x32xf32>
    %c1_i32_24 = arith.constant 1 : i32
    %74 = vector.broadcast %c1_i32_24 : i32 to vector<16x1xi32>
    %75 = arith.cmpi eq, %23, %74 : vector<16x1xi32>
    %76 = arith.extui %75 : vector<16x1xi1> to vector<16x1xi32>
    %77 = arith.sitofp %76 : vector<16x1xi32> to vector<16x1xf32>
    %78 = vector.broadcast %77 : vector<16x1xf32> to vector<16x32xf32>
    %79 = arith.mulf %73, %78 : vector<16x32xf32>
    %80 = arith.addf %53, %79 : vector<16x32xf32>
    %cst_25 = arith.constant dense<0.000000e+00> : vector<16x128xf32>
    %81 = tpu.matmul %73, %1, %cst_25 {dimension_numbers = #tpu.dot_dimension_numbers<[1], [0], [0], [1], [0, 0, 1, 1], [], []>} : vector<16x32xf32>, vector<32x128xf32>, vector<16x128xf32> -> vector<16x128xf32>
    %82 = arith.addf %11, %81 : vector<16x128xf32>
    %83 = arith.negf %82 : vector<16x128xf32>
    %84 = math.exp %83 : vector<16x128xf32>
    %cst_26 = arith.constant 1.000000e+00 : f32
    %85 = vector.broadcast %cst_26 : f32 to vector<16x128xf32>
    %86 = arith.addf %85, %84 : vector<16x128xf32>
    %87 = arith.divf %85, %86 : vector<16x128xf32>
    %88 = vector.extract_strided_slice %87 {offsets = [0, 0], sizes = [16, 32], strides = [1, 1]} : vector<16x128xf32> to vector<16x32xf32>
    %89 = vector.extract_strided_slice %87 {offsets = [0, 32], sizes = [16, 32], strides = [1, 1]} : vector<16x128xf32> to vector<16x32xf32>
    %90 = vector.extract_strided_slice %87 {offsets = [0, 64], sizes = [16, 32], strides = [1, 1]} : vector<16x128xf32> to vector<16x32xf32>
    %cst_27 = arith.constant 2.000000e+00 : f32
    %91 = vector.broadcast %cst_27 : f32 to vector<16x32xf32>
    %92 = arith.mulf %91, %90 : vector<16x32xf32>
    %cst_28 = arith.constant 1.000000e+00 : f32
    %93 = vector.broadcast %cst_28 : f32 to vector<16x32xf32>
    %94 = arith.subf %92, %93 : vector<16x32xf32>
    %95 = vector.extract_strided_slice %87 {offsets = [0, 96], sizes = [16, 32], strides = [1, 1]} : vector<16x128xf32> to vector<16x32xf32>
    %96 = arith.mulf %89, %71 : vector<16x32xf32>
    %97 = arith.mulf %88, %94 : vector<16x32xf32>
    %98 = arith.addf %96, %97 : vector<16x32xf32>
    %99 = math.tanh %98 : vector<16x32xf32>
    %100 = arith.mulf %95, %99 : vector<16x32xf32>
    %c2_i32 = arith.constant 2 : i32
    %101 = vector.broadcast %c2_i32 : i32 to vector<16x1xi32>
    %102 = arith.cmpi eq, %23, %101 : vector<16x1xi32>
    %103 = arith.extui %102 : vector<16x1xi1> to vector<16x1xi32>
    %104 = arith.sitofp %103 : vector<16x1xi32> to vector<16x1xf32>
    %105 = vector.broadcast %104 : vector<16x1xf32> to vector<16x32xf32>
    %106 = arith.mulf %100, %105 : vector<16x32xf32>
    %107 = arith.addf %80, %106 : vector<16x32xf32>
    %cst_29 = arith.constant dense<0.000000e+00> : vector<16x128xf32>
    %108 = tpu.matmul %100, %1, %cst_29 {dimension_numbers = #tpu.dot_dimension_numbers<[1], [0], [0], [1], [0, 0, 1, 1], [], []>} : vector<16x32xf32>, vector<32x128xf32>, vector<16x128xf32> -> vector<16x128xf32>
    %109 = arith.addf %12, %108 : vector<16x128xf32>
    %110 = arith.negf %109 : vector<16x128xf32>
    %111 = math.exp %110 : vector<16x128xf32>
    %cst_30 = arith.constant 1.000000e+00 : f32
    %112 = vector.broadcast %cst_30 : f32 to vector<16x128xf32>
    %113 = arith.addf %112, %111 : vector<16x128xf32>
    %114 = arith.divf %112, %113 : vector<16x128xf32>
    %115 = vector.extract_strided_slice %114 {offsets = [0, 0], sizes = [16, 32], strides = [1, 1]} : vector<16x128xf32> to vector<16x32xf32>
    %116 = vector.extract_strided_slice %114 {offsets = [0, 32], sizes = [16, 32], strides = [1, 1]} : vector<16x128xf32> to vector<16x32xf32>
    %117 = vector.extract_strided_slice %114 {offsets = [0, 64], sizes = [16, 32], strides = [1, 1]} : vector<16x128xf32> to vector<16x32xf32>
    %cst_31 = arith.constant 2.000000e+00 : f32
    %118 = vector.broadcast %cst_31 : f32 to vector<16x32xf32>
    %119 = arith.mulf %118, %117 : vector<16x32xf32>
    %cst_32 = arith.constant 1.000000e+00 : f32
    %120 = vector.broadcast %cst_32 : f32 to vector<16x32xf32>
    %121 = arith.subf %119, %120 : vector<16x32xf32>
    %122 = vector.extract_strided_slice %114 {offsets = [0, 96], sizes = [16, 32], strides = [1, 1]} : vector<16x128xf32> to vector<16x32xf32>
    %123 = arith.mulf %116, %98 : vector<16x32xf32>
    %124 = arith.mulf %115, %121 : vector<16x32xf32>
    %125 = arith.addf %123, %124 : vector<16x32xf32>
    %126 = math.tanh %125 : vector<16x32xf32>
    %127 = arith.mulf %122, %126 : vector<16x32xf32>
    %c3_i32 = arith.constant 3 : i32
    %128 = vector.broadcast %c3_i32 : i32 to vector<16x1xi32>
    %129 = arith.cmpi eq, %23, %128 : vector<16x1xi32>
    %130 = arith.extui %129 : vector<16x1xi1> to vector<16x1xi32>
    %131 = arith.sitofp %130 : vector<16x1xi32> to vector<16x1xf32>
    %132 = vector.broadcast %131 : vector<16x1xf32> to vector<16x32xf32>
    %133 = arith.mulf %127, %132 : vector<16x32xf32>
    %134 = arith.addf %107, %133 : vector<16x32xf32>
    %cst_33 = arith.constant dense<0.000000e+00> : vector<16x128xf32>
    %135 = tpu.matmul %127, %1, %cst_33 {dimension_numbers = #tpu.dot_dimension_numbers<[1], [0], [0], [1], [0, 0, 1, 1], [], []>} : vector<16x32xf32>, vector<32x128xf32>, vector<16x128xf32> -> vector<16x128xf32>
    %136 = arith.addf %13, %135 : vector<16x128xf32>
    %137 = arith.negf %136 : vector<16x128xf32>
    %138 = math.exp %137 : vector<16x128xf32>
    %cst_34 = arith.constant 1.000000e+00 : f32
    %139 = vector.broadcast %cst_34 : f32 to vector<16x128xf32>
    %140 = arith.addf %139, %138 : vector<16x128xf32>
    %141 = arith.divf %139, %140 : vector<16x128xf32>
    %142 = vector.extract_strided_slice %141 {offsets = [0, 0], sizes = [16, 32], strides = [1, 1]} : vector<16x128xf32> to vector<16x32xf32>
    %143 = vector.extract_strided_slice %141 {offsets = [0, 32], sizes = [16, 32], strides = [1, 1]} : vector<16x128xf32> to vector<16x32xf32>
    %144 = vector.extract_strided_slice %141 {offsets = [0, 64], sizes = [16, 32], strides = [1, 1]} : vector<16x128xf32> to vector<16x32xf32>
    %cst_35 = arith.constant 2.000000e+00 : f32
    %145 = vector.broadcast %cst_35 : f32 to vector<16x32xf32>
    %146 = arith.mulf %145, %144 : vector<16x32xf32>
    %cst_36 = arith.constant 1.000000e+00 : f32
    %147 = vector.broadcast %cst_36 : f32 to vector<16x32xf32>
    %148 = arith.subf %146, %147 : vector<16x32xf32>
    %149 = vector.extract_strided_slice %141 {offsets = [0, 96], sizes = [16, 32], strides = [1, 1]} : vector<16x128xf32> to vector<16x32xf32>
    %150 = arith.mulf %143, %125 : vector<16x32xf32>
    %151 = arith.mulf %142, %148 : vector<16x32xf32>
    %152 = arith.addf %150, %151 : vector<16x32xf32>
    %153 = math.tanh %152 : vector<16x32xf32>
    %154 = arith.mulf %149, %153 : vector<16x32xf32>
    %c4_i32 = arith.constant 4 : i32
    %155 = vector.broadcast %c4_i32 : i32 to vector<16x1xi32>
    %156 = arith.cmpi eq, %23, %155 : vector<16x1xi32>
    %157 = arith.extui %156 : vector<16x1xi1> to vector<16x1xi32>
    %158 = arith.sitofp %157 : vector<16x1xi32> to vector<16x1xf32>
    %159 = vector.broadcast %158 : vector<16x1xf32> to vector<16x32xf32>
    %160 = arith.mulf %154, %159 : vector<16x32xf32>
    %161 = arith.addf %134, %160 : vector<16x32xf32>
    %cst_37 = arith.constant dense<0.000000e+00> : vector<16x128xf32>
    %162 = tpu.matmul %154, %1, %cst_37 {dimension_numbers = #tpu.dot_dimension_numbers<[1], [0], [0], [1], [0, 0, 1, 1], [], []>} : vector<16x32xf32>, vector<32x128xf32>, vector<16x128xf32> -> vector<16x128xf32>
    %163 = arith.addf %14, %162 : vector<16x128xf32>
    %164 = arith.negf %163 : vector<16x128xf32>
    %165 = math.exp %164 : vector<16x128xf32>
    %cst_38 = arith.constant 1.000000e+00 : f32
    %166 = vector.broadcast %cst_38 : f32 to vector<16x128xf32>
    %167 = arith.addf %166, %165 : vector<16x128xf32>
    %168 = arith.divf %166, %167 : vector<16x128xf32>
    %169 = vector.extract_strided_slice %168 {offsets = [0, 0], sizes = [16, 32], strides = [1, 1]} : vector<16x128xf32> to vector<16x32xf32>
    %170 = vector.extract_strided_slice %168 {offsets = [0, 32], sizes = [16, 32], strides = [1, 1]} : vector<16x128xf32> to vector<16x32xf32>
    %171 = vector.extract_strided_slice %168 {offsets = [0, 64], sizes = [16, 32], strides = [1, 1]} : vector<16x128xf32> to vector<16x32xf32>
    %cst_39 = arith.constant 2.000000e+00 : f32
    %172 = vector.broadcast %cst_39 : f32 to vector<16x32xf32>
    %173 = arith.mulf %172, %171 : vector<16x32xf32>
    %cst_40 = arith.constant 1.000000e+00 : f32
    %174 = vector.broadcast %cst_40 : f32 to vector<16x32xf32>
    %175 = arith.subf %173, %174 : vector<16x32xf32>
    %176 = vector.extract_strided_slice %168 {offsets = [0, 96], sizes = [16, 32], strides = [1, 1]} : vector<16x128xf32> to vector<16x32xf32>
    %177 = arith.mulf %170, %152 : vector<16x32xf32>
    %178 = arith.mulf %169, %175 : vector<16x32xf32>
    %179 = arith.addf %177, %178 : vector<16x32xf32>
    %180 = math.tanh %179 : vector<16x32xf32>
    %181 = arith.mulf %176, %180 : vector<16x32xf32>
    %c5_i32 = arith.constant 5 : i32
    %182 = vector.broadcast %c5_i32 : i32 to vector<16x1xi32>
    %183 = arith.cmpi eq, %23, %182 : vector<16x1xi32>
    %184 = arith.extui %183 : vector<16x1xi1> to vector<16x1xi32>
    %185 = arith.sitofp %184 : vector<16x1xi32> to vector<16x1xf32>
    %186 = vector.broadcast %185 : vector<16x1xf32> to vector<16x32xf32>
    %187 = arith.mulf %181, %186 : vector<16x32xf32>
    %188 = arith.addf %161, %187 : vector<16x32xf32>
    %cst_41 = arith.constant dense<0.000000e+00> : vector<16x128xf32>
    %189 = tpu.matmul %181, %1, %cst_41 {dimension_numbers = #tpu.dot_dimension_numbers<[1], [0], [0], [1], [0, 0, 1, 1], [], []>} : vector<16x32xf32>, vector<32x128xf32>, vector<16x128xf32> -> vector<16x128xf32>
    %190 = arith.addf %15, %189 : vector<16x128xf32>
    %191 = arith.negf %190 : vector<16x128xf32>
    %192 = math.exp %191 : vector<16x128xf32>
    %cst_42 = arith.constant 1.000000e+00 : f32
    %193 = vector.broadcast %cst_42 : f32 to vector<16x128xf32>
    %194 = arith.addf %193, %192 : vector<16x128xf32>
    %195 = arith.divf %193, %194 : vector<16x128xf32>
    %196 = vector.extract_strided_slice %195 {offsets = [0, 0], sizes = [16, 32], strides = [1, 1]} : vector<16x128xf32> to vector<16x32xf32>
    %197 = vector.extract_strided_slice %195 {offsets = [0, 32], sizes = [16, 32], strides = [1, 1]} : vector<16x128xf32> to vector<16x32xf32>
    %198 = vector.extract_strided_slice %195 {offsets = [0, 64], sizes = [16, 32], strides = [1, 1]} : vector<16x128xf32> to vector<16x32xf32>
    %cst_43 = arith.constant 2.000000e+00 : f32
    %199 = vector.broadcast %cst_43 : f32 to vector<16x32xf32>
    %200 = arith.mulf %199, %198 : vector<16x32xf32>
    %cst_44 = arith.constant 1.000000e+00 : f32
    %201 = vector.broadcast %cst_44 : f32 to vector<16x32xf32>
    %202 = arith.subf %200, %201 : vector<16x32xf32>
    %203 = vector.extract_strided_slice %195 {offsets = [0, 96], sizes = [16, 32], strides = [1, 1]} : vector<16x128xf32> to vector<16x32xf32>
    %204 = arith.mulf %197, %179 : vector<16x32xf32>
    %205 = arith.mulf %196, %202 : vector<16x32xf32>
    %206 = arith.addf %204, %205 : vector<16x32xf32>
    %207 = math.tanh %206 : vector<16x32xf32>
    %208 = arith.mulf %203, %207 : vector<16x32xf32>
    %c6_i32 = arith.constant 6 : i32
    %209 = vector.broadcast %c6_i32 : i32 to vector<16x1xi32>
    %210 = arith.cmpi eq, %23, %209 : vector<16x1xi32>
    %211 = arith.extui %210 : vector<16x1xi1> to vector<16x1xi32>
    %212 = arith.sitofp %211 : vector<16x1xi32> to vector<16x1xf32>
    %213 = vector.broadcast %212 : vector<16x1xf32> to vector<16x32xf32>
    %214 = arith.mulf %208, %213 : vector<16x32xf32>
    %215 = arith.addf %188, %214 : vector<16x32xf32>
    %cst_45 = arith.constant dense<0.000000e+00> : vector<16x128xf32>
    %216 = tpu.matmul %208, %1, %cst_45 {dimension_numbers = #tpu.dot_dimension_numbers<[1], [0], [0], [1], [0, 0, 1, 1], [], []>} : vector<16x32xf32>, vector<32x128xf32>, vector<16x128xf32> -> vector<16x128xf32>
    %217 = arith.addf %16, %216 : vector<16x128xf32>
    %218 = arith.negf %217 : vector<16x128xf32>
    %219 = math.exp %218 : vector<16x128xf32>
    %cst_46 = arith.constant 1.000000e+00 : f32
    %220 = vector.broadcast %cst_46 : f32 to vector<16x128xf32>
    %221 = arith.addf %220, %219 : vector<16x128xf32>
    %222 = arith.divf %220, %221 : vector<16x128xf32>
    %223 = vector.extract_strided_slice %222 {offsets = [0, 0], sizes = [16, 32], strides = [1, 1]} : vector<16x128xf32> to vector<16x32xf32>
    %224 = vector.extract_strided_slice %222 {offsets = [0, 32], sizes = [16, 32], strides = [1, 1]} : vector<16x128xf32> to vector<16x32xf32>
    %225 = vector.extract_strided_slice %222 {offsets = [0, 64], sizes = [16, 32], strides = [1, 1]} : vector<16x128xf32> to vector<16x32xf32>
    %cst_47 = arith.constant 2.000000e+00 : f32
    %226 = vector.broadcast %cst_47 : f32 to vector<16x32xf32>
    %227 = arith.mulf %226, %225 : vector<16x32xf32>
    %cst_48 = arith.constant 1.000000e+00 : f32
    %228 = vector.broadcast %cst_48 : f32 to vector<16x32xf32>
    %229 = arith.subf %227, %228 : vector<16x32xf32>
    %230 = vector.extract_strided_slice %222 {offsets = [0, 96], sizes = [16, 32], strides = [1, 1]} : vector<16x128xf32> to vector<16x32xf32>
    %231 = arith.mulf %224, %206 : vector<16x32xf32>
    %232 = arith.mulf %223, %229 : vector<16x32xf32>
    %233 = arith.addf %231, %232 : vector<16x32xf32>
    %234 = math.tanh %233 : vector<16x32xf32>
    %235 = arith.mulf %230, %234 : vector<16x32xf32>
    %c7_i32_49 = arith.constant 7 : i32
    %236 = vector.broadcast %c7_i32_49 : i32 to vector<16x1xi32>
    %237 = arith.cmpi eq, %23, %236 : vector<16x1xi32>
    %238 = arith.extui %237 : vector<16x1xi1> to vector<16x1xi32>
    %239 = arith.sitofp %238 : vector<16x1xi32> to vector<16x1xf32>
    %240 = vector.broadcast %239 : vector<16x1xf32> to vector<16x32xf32>
    %241 = arith.mulf %235, %240 : vector<16x32xf32>
    %242 = arith.addf %215, %241 : vector<16x32xf32>
    %c0_50 = arith.constant 0 : index
    %c0_51 = arith.constant 0 : index
    %243 = vector.load %arg6[%c0_50, %c0_51] : memref<32x8xf32, #tpu.memory_space<vmem>>, vector<32x8xf32>
    %cst_52 = arith.constant dense<0.000000e+00> : vector<16x8xf32>
    %244 = tpu.matmul %242, %243, %cst_52 {dimension_numbers = #tpu.dot_dimension_numbers<[1], [0], [0], [1], [0, 0, 1, 1], [], []>} : vector<16x32xf32>, vector<32x8xf32>, vector<16x8xf32> -> vector<16x8xf32>
    %c0_53 = arith.constant 0 : index
    %c0_54 = arith.constant 0 : index
    %245 = vector.load %arg7[%c0_53, %c0_54] : memref<1x8xf32, #tpu.memory_space<vmem>>, vector<1x8xf32>
    %246 = vector.broadcast %245 : vector<1x8xf32> to vector<16x8xf32>
    %247 = arith.addf %244, %246 : vector<16x8xf32>
    %c0_55 = arith.constant 0 : index
    %c0_56 = arith.constant 0 : index
    %248 = vector.load %arg15[%c0_55, %c0_56] : memref<16x8xf32, #tpu.memory_space<vmem>>, vector<16x8xf32>
    tpu.vector_store %arg15[%c0_55, %c0_56], %247 {strides = array<i32>} : memref<16x8xf32, #tpu.memory_space<vmem>>, vector<16x8xf32>,
    %c0_57 = arith.constant 0 : index
    %c0_58 = arith.constant 0 : index
    %249 = vector.load %arg8[%c0_57, %c0_58] : memref<8x128xf32, #tpu.memory_space<vmem>>, vector<8x128xf32>
    %cst_59 = arith.constant dense<0.000000e+00> : vector<16x128xf32>
    %250 = tpu.matmul %247, %249, %cst_59 {dimension_numbers = #tpu.dot_dimension_numbers<[1], [0], [0], [1], [0, 0, 1, 1], [], []>} : vector<16x8xf32>, vector<8x128xf32>, vector<16x128xf32> -> vector<16x128xf32>
    %c0_60 = arith.constant 0 : index
    %c0_61 = arith.constant 0 : index
    %251 = vector.load %arg11[%c0_60, %c0_61] : memref<1x128xf32, #tpu.memory_space<vmem>>, vector<1x128xf32>
    %252 = vector.broadcast %251 : vector<1x128xf32> to vector<16x128xf32>
    %253 = arith.addf %250, %252 : vector<16x128xf32>
    %254 = vector.extract_strided_slice %0 {offsets = [0, 0, 0], sizes = [8, 16, 1], strides = [1, 1, 1]} : vector<8x16x4xf32> to vector<8x16x1xf32>
    %c0_62 = arith.constant 0 : index
    %c0_63 = arith.constant 0 : index
    %255 = vector.load %arg9[%c0_62, %c0_63] : memref<1x128xf32, #tpu.memory_space<vmem>>, vector<1x128xf32>
    %256 = vector.shape_cast %255 : vector<1x128xf32> to vector<1x1x128xf32>
    %257 = vector.broadcast %254 : vector<8x16x1xf32> to vector<8x16x128xf32>
    %258 = vector.broadcast %256 : vector<1x1x128xf32> to vector<8x16x128xf32>
    %259 = arith.mulf %257, %258 : vector<8x16x128xf32>
    %260 = vector.shape_cast %253 : vector<16x128xf32> to vector<1x16x128xf32>
    %261 = vector.broadcast %260 : vector<1x16x128xf32> to vector<8x16x128xf32>
    %262 = arith.addf %259, %261 : vector<8x16x128xf32>
    %cst_64 = arith.constant 0.000000e+00 : f32
    %263 = vector.broadcast %cst_64 : f32 to vector<16x32xf32>
    %cst_65 = arith.constant 0.000000e+00 : f32
    %264 = vector.broadcast %cst_65 : f32 to vector<16x32xf32>
    %265 = vector.extract_strided_slice %262 {offsets = [0, 0, 0], sizes = [1, 16, 128], strides = [1, 1, 1]} : vector<8x16x128xf32> to vector<1x16x128xf32>
    %266 = vector.shape_cast %265 : vector<1x16x128xf32> to vector<16x128xf32>
    %cst_66 = arith.constant dense<0.000000e+00> : vector<16x128xf32>
    %267 = tpu.matmul %263, %2, %cst_66 {dimension_numbers = #tpu.dot_dimension_numbers<[1], [0], [0], [1], [0, 0, 1, 1], [], []>} : vector<16x32xf32>, vector<32x128xf32>, vector<16x128xf32> -> vector<16x128xf32>
    %268 = arith.addf %266, %267 : vector<16x128xf32>
    %269 = arith.negf %268 : vector<16x128xf32>
    %270 = math.exp %269 : vector<16x128xf32>
    %cst_67 = arith.constant 1.000000e+00 : f32
    %271 = vector.broadcast %cst_67 : f32 to vector<16x128xf32>
    %272 = arith.addf %271, %270 : vector<16x128xf32>
    %273 = arith.divf %271, %272 : vector<16x128xf32>
    %274 = vector.extract_strided_slice %273 {offsets = [0, 0], sizes = [16, 32], strides = [1, 1]} : vector<16x128xf32> to vector<16x32xf32>
    %275 = vector.extract_strided_slice %273 {offsets = [0, 32], sizes = [16, 32], strides = [1, 1]} : vector<16x128xf32> to vector<16x32xf32>
    %276 = vector.extract_strided_slice %273 {offsets = [0, 64], sizes = [16, 32], strides = [1, 1]} : vector<16x128xf32> to vector<16x32xf32>
    %cst_68 = arith.constant 2.000000e+00 : f32
    %277 = vector.broadcast %cst_68 : f32 to vector<16x32xf32>
    %278 = arith.mulf %277, %276 : vector<16x32xf32>
    %cst_69 = arith.constant 1.000000e+00 : f32
    %279 = vector.broadcast %cst_69 : f32 to vector<16x32xf32>
    %280 = arith.subf %278, %279 : vector<16x32xf32>
    %281 = vector.extract_strided_slice %273 {offsets = [0, 96], sizes = [16, 32], strides = [1, 1]} : vector<16x128xf32> to vector<16x32xf32>
    %282 = arith.mulf %275, %264 : vector<16x32xf32>
    %283 = arith.mulf %274, %280 : vector<16x32xf32>
    %284 = arith.addf %282, %283 : vector<16x32xf32>
    %285 = math.tanh %284 : vector<16x32xf32>
    %286 = arith.mulf %281, %285 : vector<16x32xf32>
    %287 = vector.extract_strided_slice %262 {offsets = [1, 0, 0], sizes = [1, 16, 128], strides = [1, 1, 1]} : vector<8x16x128xf32> to vector<1x16x128xf32>
    %288 = vector.shape_cast %287 : vector<1x16x128xf32> to vector<16x128xf32>
    %cst_70 = arith.constant dense<0.000000e+00> : vector<16x128xf32>
    %289 = tpu.matmul %286, %2, %cst_70 {dimension_numbers = #tpu.dot_dimension_numbers<[1], [0], [0], [1], [0, 0, 1, 1], [], []>} : vector<16x32xf32>, vector<32x128xf32>, vector<16x128xf32> -> vector<16x128xf32>
    %290 = arith.addf %288, %289 : vector<16x128xf32>
    %291 = arith.negf %290 : vector<16x128xf32>
    %292 = math.exp %291 : vector<16x128xf32>
    %cst_71 = arith.constant 1.000000e+00 : f32
    %293 = vector.broadcast %cst_71 : f32 to vector<16x128xf32>
    %294 = arith.addf %293, %292 : vector<16x128xf32>
    %295 = arith.divf %293, %294 : vector<16x128xf32>
    %296 = vector.extract_strided_slice %295 {offsets = [0, 0], sizes = [16, 32], strides = [1, 1]} : vector<16x128xf32> to vector<16x32xf32>
    %297 = vector.extract_strided_slice %295 {offsets = [0, 32], sizes = [16, 32], strides = [1, 1]} : vector<16x128xf32> to vector<16x32xf32>
    %298 = vector.extract_strided_slice %295 {offsets = [0, 64], sizes = [16, 32], strides = [1, 1]} : vector<16x128xf32> to vector<16x32xf32>
    %cst_72 = arith.constant 2.000000e+00 : f32
    %299 = vector.broadcast %cst_72 : f32 to vector<16x32xf32>
    %300 = arith.mulf %299, %298 : vector<16x32xf32>
    %cst_73 = arith.constant 1.000000e+00 : f32
    %301 = vector.broadcast %cst_73 : f32 to vector<16x32xf32>
    %302 = arith.subf %300, %301 : vector<16x32xf32>
    %303 = vector.extract_strided_slice %295 {offsets = [0, 96], sizes = [16, 32], strides = [1, 1]} : vector<16x128xf32> to vector<16x32xf32>
    %304 = arith.mulf %297, %284 : vector<16x32xf32>
    %305 = arith.mulf %296, %302 : vector<16x32xf32>
    %306 = arith.addf %304, %305 : vector<16x32xf32>
    %307 = math.tanh %306 : vector<16x32xf32>
    %308 = arith.mulf %303, %307 : vector<16x32xf32>
    %309 = vector.extract_strided_slice %262 {offsets = [2, 0, 0], sizes = [1, 16, 128], strides = [1, 1, 1]} : vector<8x16x128xf32> to vector<1x16x128xf32>
    %310 = vector.shape_cast %309 : vector<1x16x128xf32> to vector<16x128xf32>
    %cst_74 = arith.constant dense<0.000000e+00> : vector<16x128xf32>
    %311 = tpu.matmul %308, %2, %cst_74 {dimension_numbers = #tpu.dot_dimension_numbers<[1], [0], [0], [1], [0, 0, 1, 1], [], []>} : vector<16x32xf32>, vector<32x128xf32>, vector<16x128xf32> -> vector<16x128xf32>
    %312 = arith.addf %310, %311 : vector<16x128xf32>
    %313 = arith.negf %312 : vector<16x128xf32>
    %314 = math.exp %313 : vector<16x128xf32>
    %cst_75 = arith.constant 1.000000e+00 : f32
    %315 = vector.broadcast %cst_75 : f32 to vector<16x128xf32>
    %316 = arith.addf %315, %314 : vector<16x128xf32>
    %317 = arith.divf %315, %316 : vector<16x128xf32>
    %318 = vector.extract_strided_slice %317 {offsets = [0, 0], sizes = [16, 32], strides = [1, 1]} : vector<16x128xf32> to vector<16x32xf32>
    %319 = vector.extract_strided_slice %317 {offsets = [0, 32], sizes = [16, 32], strides = [1, 1]} : vector<16x128xf32> to vector<16x32xf32>
    %320 = vector.extract_strided_slice %317 {offsets = [0, 64], sizes = [16, 32], strides = [1, 1]} : vector<16x128xf32> to vector<16x32xf32>
    %cst_76 = arith.constant 2.000000e+00 : f32
    %321 = vector.broadcast %cst_76 : f32 to vector<16x32xf32>
    %322 = arith.mulf %321, %320 : vector<16x32xf32>
    %cst_77 = arith.constant 1.000000e+00 : f32
    %323 = vector.broadcast %cst_77 : f32 to vector<16x32xf32>
    %324 = arith.subf %322, %323 : vector<16x32xf32>
    %325 = vector.extract_strided_slice %317 {offsets = [0, 96], sizes = [16, 32], strides = [1, 1]} : vector<16x128xf32> to vector<16x32xf32>
    %326 = arith.mulf %319, %306 : vector<16x32xf32>
    %327 = arith.mulf %318, %324 : vector<16x32xf32>
    %328 = arith.addf %326, %327 : vector<16x32xf32>
    %329 = math.tanh %328 : vector<16x32xf32>
    %330 = arith.mulf %325, %329 : vector<16x32xf32>
    %331 = vector.extract_strided_slice %262 {offsets = [3, 0, 0], sizes = [1, 16, 128], strides = [1, 1, 1]} : vector<8x16x128xf32> to vector<1x16x128xf32>
    %332 = vector.shape_cast %331 : vector<1x16x128xf32> to vector<16x128xf32>
    %cst_78 = arith.constant dense<0.000000e+00> : vector<16x128xf32>
    %333 = tpu.matmul %330, %2, %cst_78 {dimension_numbers = #tpu.dot_dimension_numbers<[1], [0], [0], [1], [0, 0, 1, 1], [], []>} : vector<16x32xf32>, vector<32x128xf32>, vector<16x128xf32> -> vector<16x128xf32>
    %334 = arith.addf %332, %333 : vector<16x128xf32>
    %335 = arith.negf %334 : vector<16x128xf32>
    %336 = math.exp %335 : vector<16x128xf32>
    %cst_79 = arith.constant 1.000000e+00 : f32
    %337 = vector.broadcast %cst_79 : f32 to vector<16x128xf32>
    %338 = arith.addf %337, %336 : vector<16x128xf32>
    %339 = arith.divf %337, %338 : vector<16x128xf32>
    %340 = vector.extract_strided_slice %339 {offsets = [0, 0], sizes = [16, 32], strides = [1, 1]} : vector<16x128xf32> to vector<16x32xf32>
    %341 = vector.extract_strided_slice %339 {offsets = [0, 32], sizes = [16, 32], strides = [1, 1]} : vector<16x128xf32> to vector<16x32xf32>
    %342 = vector.extract_strided_slice %339 {offsets = [0, 64], sizes = [16, 32], strides = [1, 1]} : vector<16x128xf32> to vector<16x32xf32>
    %cst_80 = arith.constant 2.000000e+00 : f32
    %343 = vector.broadcast %cst_80 : f32 to vector<16x32xf32>
    %344 = arith.mulf %343, %342 : vector<16x32xf32>
    %cst_81 = arith.constant 1.000000e+00 : f32
    %345 = vector.broadcast %cst_81 : f32 to vector<16x32xf32>
    %346 = arith.subf %344, %345 : vector<16x32xf32>
    %347 = vector.extract_strided_slice %339 {offsets = [0, 96], sizes = [16, 32], strides = [1, 1]} : vector<16x128xf32> to vector<16x32xf32>
    %348 = arith.mulf %341, %328 : vector<16x32xf32>
    %349 = arith.mulf %340, %346 : vector<16x32xf32>
    %350 = arith.addf %348, %349 : vector<16x32xf32>
    %351 = math.tanh %350 : vector<16x32xf32>
    %352 = arith.mulf %347, %351 : vector<16x32xf32>
    %353 = vector.extract_strided_slice %262 {offsets = [4, 0, 0], sizes = [1, 16, 128], strides = [1, 1, 1]} : vector<8x16x128xf32> to vector<1x16x128xf32>
    %354 = vector.shape_cast %353 : vector<1x16x128xf32> to vector<16x128xf32>
    %cst_82 = arith.constant dense<0.000000e+00> : vector<16x128xf32>
    %355 = tpu.matmul %352, %2, %cst_82 {dimension_numbers = #tpu.dot_dimension_numbers<[1], [0], [0], [1], [0, 0, 1, 1], [], []>} : vector<16x32xf32>, vector<32x128xf32>, vector<16x128xf32> -> vector<16x128xf32>
    %356 = arith.addf %354, %355 : vector<16x128xf32>
    %357 = arith.negf %356 : vector<16x128xf32>
    %358 = math.exp %357 : vector<16x128xf32>
    %cst_83 = arith.constant 1.000000e+00 : f32
    %359 = vector.broadcast %cst_83 : f32 to vector<16x128xf32>
    %360 = arith.addf %359, %358 : vector<16x128xf32>
    %361 = arith.divf %359, %360 : vector<16x128xf32>
    %362 = vector.extract_strided_slice %361 {offsets = [0, 0], sizes = [16, 32], strides = [1, 1]} : vector<16x128xf32> to vector<16x32xf32>
    %363 = vector.extract_strided_slice %361 {offsets = [0, 32], sizes = [16, 32], strides = [1, 1]} : vector<16x128xf32> to vector<16x32xf32>
    %364 = vector.extract_strided_slice %361 {offsets = [0, 64], sizes = [16, 32], strides = [1, 1]} : vector<16x128xf32> to vector<16x32xf32>
    %cst_84 = arith.constant 2.000000e+00 : f32
    %365 = vector.broadcast %cst_84 : f32 to vector<16x32xf32>
    %366 = arith.mulf %365, %364 : vector<16x32xf32>
    %cst_85 = arith.constant 1.000000e+00 : f32
    %367 = vector.broadcast %cst_85 : f32 to vector<16x32xf32>
    %368 = arith.subf %366, %367 : vector<16x32xf32>
    %369 = vector.extract_strided_slice %361 {offsets = [0, 96], sizes = [16, 32], strides = [1, 1]} : vector<16x128xf32> to vector<16x32xf32>
    %370 = arith.mulf %363, %350 : vector<16x32xf32>
    %371 = arith.mulf %362, %368 : vector<16x32xf32>
    %372 = arith.addf %370, %371 : vector<16x32xf32>
    %373 = math.tanh %372 : vector<16x32xf32>
    %374 = arith.mulf %369, %373 : vector<16x32xf32>
    %375 = vector.extract_strided_slice %262 {offsets = [5, 0, 0], sizes = [1, 16, 128], strides = [1, 1, 1]} : vector<8x16x128xf32> to vector<1x16x128xf32>
    %376 = vector.shape_cast %375 : vector<1x16x128xf32> to vector<16x128xf32>
    %cst_86 = arith.constant dense<0.000000e+00> : vector<16x128xf32>
    %377 = tpu.matmul %374, %2, %cst_86 {dimension_numbers = #tpu.dot_dimension_numbers<[1], [0], [0], [1], [0, 0, 1, 1], [], []>} : vector<16x32xf32>, vector<32x128xf32>, vector<16x128xf32> -> vector<16x128xf32>
    %378 = arith.addf %376, %377 : vector<16x128xf32>
    %379 = arith.negf %378 : vector<16x128xf32>
    %380 = math.exp %379 : vector<16x128xf32>
    %cst_87 = arith.constant 1.000000e+00 : f32
    %381 = vector.broadcast %cst_87 : f32 to vector<16x128xf32>
    %382 = arith.addf %381, %380 : vector<16x128xf32>
    %383 = arith.divf %381, %382 : vector<16x128xf32>
    %384 = vector.extract_strided_slice %383 {offsets = [0, 0], sizes = [16, 32], strides = [1, 1]} : vector<16x128xf32> to vector<16x32xf32>
    %385 = vector.extract_strided_slice %383 {offsets = [0, 32], sizes = [16, 32], strides = [1, 1]} : vector<16x128xf32> to vector<16x32xf32>
    %386 = vector.extract_strided_slice %383 {offsets = [0, 64], sizes = [16, 32], strides = [1, 1]} : vector<16x128xf32> to vector<16x32xf32>
    %cst_88 = arith.constant 2.000000e+00 : f32
    %387 = vector.broadcast %cst_88 : f32 to vector<16x32xf32>
    %388 = arith.mulf %387, %386 : vector<16x32xf32>
    %cst_89 = arith.constant 1.000000e+00 : f32
    %389 = vector.broadcast %cst_89 : f32 to vector<16x32xf32>
    %390 = arith.subf %388, %389 : vector<16x32xf32>
    %391 = vector.extract_strided_slice %383 {offsets = [0, 96], sizes = [16, 32], strides = [1, 1]} : vector<16x128xf32> to vector<16x32xf32>
    %392 = arith.mulf %385, %372 : vector<16x32xf32>
    %393 = arith.mulf %384, %390 : vector<16x32xf32>
    %394 = arith.addf %392, %393 : vector<16x32xf32>
    %395 = math.tanh %394 : vector<16x32xf32>
    %396 = arith.mulf %391, %395 : vector<16x32xf32>
    %397 = vector.extract_strided_slice %262 {offsets = [6, 0, 0], sizes = [1, 16, 128], strides = [1, 1, 1]} : vector<8x16x128xf32> to vector<1x16x128xf32>
    %398 = vector.shape_cast %397 : vector<1x16x128xf32> to vector<16x128xf32>
    %cst_90 = arith.constant dense<0.000000e+00> : vector<16x128xf32>
    %399 = tpu.matmul %396, %2, %cst_90 {dimension_numbers = #tpu.dot_dimension_numbers<[1], [0], [0], [1], [0, 0, 1, 1], [], []>} : vector<16x32xf32>, vector<32x128xf32>, vector<16x128xf32> -> vector<16x128xf32>
    %400 = arith.addf %398, %399 : vector<16x128xf32>
    %401 = arith.negf %400 : vector<16x128xf32>
    %402 = math.exp %401 : vector<16x128xf32>
    %cst_91 = arith.constant 1.000000e+00 : f32
    %403 = vector.broadcast %cst_91 : f32 to vector<16x128xf32>
    %404 = arith.addf %403, %402 : vector<16x128xf32>
    %405 = arith.divf %403, %404 : vector<16x128xf32>
    %406 = vector.extract_strided_slice %405 {offsets = [0, 0], sizes = [16, 32], strides = [1, 1]} : vector<16x128xf32> to vector<16x32xf32>
    %407 = vector.extract_strided_slice %405 {offsets = [0, 32], sizes = [16, 32], strides = [1, 1]} : vector<16x128xf32> to vector<16x32xf32>
    %408 = vector.extract_strided_slice %405 {offsets = [0, 64], sizes = [16, 32], strides = [1, 1]} : vector<16x128xf32> to vector<16x32xf32>
    %cst_92 = arith.constant 2.000000e+00 : f32
    %409 = vector.broadcast %cst_92 : f32 to vector<16x32xf32>
    %410 = arith.mulf %409, %408 : vector<16x32xf32>
    %cst_93 = arith.constant 1.000000e+00 : f32
    %411 = vector.broadcast %cst_93 : f32 to vector<16x32xf32>
    %412 = arith.subf %410, %411 : vector<16x32xf32>
    %413 = vector.extract_strided_slice %405 {offsets = [0, 96], sizes = [16, 32], strides = [1, 1]} : vector<16x128xf32> to vector<16x32xf32>
    %414 = arith.mulf %407, %394 : vector<16x32xf32>
    %415 = arith.mulf %406, %412 : vector<16x32xf32>
    %416 = arith.addf %414, %415 : vector<16x32xf32>
    %417 = math.tanh %416 : vector<16x32xf32>
    %418 = arith.mulf %413, %417 : vector<16x32xf32>
    %419 = vector.extract_strided_slice %262 {offsets = [7, 0, 0], sizes = [1, 16, 128], strides = [1, 1, 1]} : vector<8x16x128xf32> to vector<1x16x128xf32>
    %420 = vector.shape_cast %419 : vector<1x16x128xf32> to vector<16x128xf32>
    %cst_94 = arith.constant dense<0.000000e+00> : vector<16x128xf32>
    %421 = tpu.matmul %418, %2, %cst_94 {dimension_numbers = #tpu.dot_dimension_numbers<[1], [0], [0], [1], [0, 0, 1, 1], [], []>} : vector<16x32xf32>, vector<32x128xf32>, vector<16x128xf32> -> vector<16x128xf32>
    %422 = arith.addf %420, %421 : vector<16x128xf32>
    %423 = arith.negf %422 : vector<16x128xf32>
    %424 = math.exp %423 : vector<16x128xf32>
    %cst_95 = arith.constant 1.000000e+00 : f32
    %425 = vector.broadcast %cst_95 : f32 to vector<16x128xf32>
    %426 = arith.addf %425, %424 : vector<16x128xf32>
    %427 = arith.divf %425, %426 : vector<16x128xf32>
    %428 = vector.extract_strided_slice %427 {offsets = [0, 0], sizes = [16, 32], strides = [1, 1]} : vector<16x128xf32> to vector<16x32xf32>
    %429 = vector.extract_strided_slice %427 {offsets = [0, 32], sizes = [16, 32], strides = [1, 1]} : vector<16x128xf32> to vector<16x32xf32>
    %430 = vector.extract_strided_slice %427 {offsets = [0, 64], sizes = [16, 32], strides = [1, 1]} : vector<16x128xf32> to vector<16x32xf32>
    %cst_96 = arith.constant 2.000000e+00 : f32
    %431 = vector.broadcast %cst_96 : f32 to vector<16x32xf32>
    %432 = arith.mulf %431, %430 : vector<16x32xf32>
    %cst_97 = arith.constant 1.000000e+00 : f32
    %433 = vector.broadcast %cst_97 : f32 to vector<16x32xf32>
    %434 = arith.subf %432, %433 : vector<16x32xf32>
    %435 = vector.extract_strided_slice %427 {offsets = [0, 96], sizes = [16, 32], strides = [1, 1]} : vector<16x128xf32> to vector<16x32xf32>
    %436 = arith.mulf %429, %416 : vector<16x32xf32>
    %437 = arith.mulf %428, %434 : vector<16x32xf32>
    %438 = arith.addf %436, %437 : vector<16x32xf32>
    %439 = math.tanh %438 : vector<16x32xf32>
    %440 = arith.mulf %435, %439 : vector<16x32xf32>
    %441 = vector.shape_cast %286 : vector<16x32xf32> to vector<1x16x32xf32>
    %442 = vector.shape_cast %308 : vector<16x32xf32> to vector<1x16x32xf32>
    %443 = vector.shape_cast %330 : vector<16x32xf32> to vector<1x16x32xf32>
    %444 = vector.shape_cast %352 : vector<16x32xf32> to vector<1x16x32xf32>
    %445 = vector.shape_cast %374 : vector<16x32xf32> to vector<1x16x32xf32>
    %446 = vector.shape_cast %396 : vector<16x32xf32> to vector<1x16x32xf32>
    %447 = vector.shape_cast %418 : vector<16x32xf32> to vector<1x16x32xf32>
    %448 = vector.shape_cast %440 : vector<16x32xf32> to vector<1x16x32xf32>
    %449 = tpu.concatenate %441, %442, %443, %444, %445, %446, %447, %448 in 0 : vector<1x16x32xf32>, vector<1x16x32xf32>, vector<1x16x32xf32>, vector<1x16x32xf32>, vector<1x16x32xf32>, vector<1x16x32xf32>, vector<1x16x32xf32>, vector<1x16x32xf32> -> vector<8x16x32xf32>
    %c0_98 = arith.constant 0 : index
    %c0_99 = arith.constant 0 : index
    %450 = vector.load %arg12[%c0_98, %c0_99] : memref<1x32xf32, #tpu.memory_space<vmem>>, vector<1x32xf32>
    %451 = vector.shape_cast %450 : vector<1x32xf32> to vector<1x1x32xf32>
    %452 = vector.broadcast %451 : vector<1x1x32xf32> to vector<8x16x32xf32>
    %453 = arith.mulf %449, %452 : vector<8x16x32xf32>
    %cst_100 = arith.constant dense<0.000000e+00> : vector<8x16xf32>
    %454 = vector.multi_reduction <add>, %453, %cst_100 [2] : vector<8x16x32xf32> to vector<8x16xf32>
    %455 = vector.shape_cast %454 : vector<8x16xf32> to vector<8x16x1xf32>
    %c0_101 = arith.constant 0 : index
    %c0_102 = arith.constant 0 : index
    %456 = vector.load %arg13[%c0_101, %c0_102] : memref<1x1xf32, #tpu.memory_space<vmem>>, vector<1x1xf32>
    %457 = vector.shape_cast %456 : vector<1x1xf32> to vector<1x1x1xf32>
    %458 = vector.broadcast %457 : vector<1x1x1xf32> to vector<8x16x1xf32>
    %459 = arith.addf %455, %458 : vector<8x16x1xf32>
    %c0_103 = arith.constant 0 : index
    %c0_104 = arith.constant 0 : index
    %c0_105 = arith.constant 0 : index
    %460 = vector.load %arg14[%c0_103, %c0_104, %c0_105] : memref<8x16x1xf32, #tpu.memory_space<vmem>>, vector<8x16x1xf32>
    tpu.vector_store %arg14[%c0_103, %c0_104, %c0_105], %459 {strides = array<i32>} : memref<8x16x1xf32, #tpu.memory_space<vmem>>, vector<8x16x1xf32>,
    return
  }
  func.func @transform_0(%arg0: i32) -> (i32, i32) {
    %c0_i32 = arith.constant 0 : i32
    %c0_i32_0 = arith.constant 0 : i32
    return %arg0, %c0_i32 : i32, i32
  }
  func.func @transform_1(%arg0: i32) -> (i32, i32, i32) {
    %c0_i32 = arith.constant 0 : i32
    %c0_i32_0 = arith.constant 0 : i32
    %c0_i32_1 = arith.constant 0 : i32
    return %c0_i32, %arg0, %c0_i32_0 : i32, i32, i32
  }
  func.func @transform_2(%arg0: i32) -> (i32, i32) {
    %c0_i32 = arith.constant 0 : i32
    %c0_i32_0 = arith.constant 0 : i32
    %c0_i32_1 = arith.constant 0 : i32
    return %c0_i32, %c0_i32_0 : i32, i32
  }
  func.func @transform_3(%arg0: i32) -> (i32, i32) {
    %c0_i32 = arith.constant 0 : i32
    %c0_i32_0 = arith.constant 0 : i32
    %c0_i32_1 = arith.constant 0 : i32
    return %c0_i32, %c0_i32_0 : i32, i32
  }
  func.func @transform_4(%arg0: i32) -> (i32, i32) {
    %c0_i32 = arith.constant 0 : i32
    %c0_i32_0 = arith.constant 0 : i32
    %c0_i32_1 = arith.constant 0 : i32
    return %c0_i32, %c0_i32_0 : i32, i32
  }
  func.func @transform_5(%arg0: i32) -> (i32, i32) {
    %c0_i32 = arith.constant 0 : i32
    %c0_i32_0 = arith.constant 0 : i32
    %c0_i32_1 = arith.constant 0 : i32
    return %c0_i32, %c0_i32_0 : i32, i32
  }
  func.func @transform_6(%arg0: i32) -> (i32, i32) {
    %c0_i32 = arith.constant 0 : i32
    %c0_i32_0 = arith.constant 0 : i32
    %c0_i32_1 = arith.constant 0 : i32
    return %c0_i32, %c0_i32_0 : i32, i32
  }
  func.func @transform_7(%arg0: i32) -> (i32, i32) {
    %c0_i32 = arith.constant 0 : i32
    %c0_i32_0 = arith.constant 0 : i32
    %c0_i32_1 = arith.constant 0 : i32
    return %c0_i32, %c0_i32_0 : i32, i32
  }
  func.func @transform_8(%arg0: i32) -> (i32, i32) {
    %c0_i32 = arith.constant 0 : i32
    %c0_i32_0 = arith.constant 0 : i32
    %c0_i32_1 = arith.constant 0 : i32
    return %c0_i32, %c0_i32_0 : i32, i32
  }
  func.func @transform_9(%arg0: i32) -> (i32, i32) {
    %c0_i32 = arith.constant 0 : i32
    %c0_i32_0 = arith.constant 0 : i32
    %c0_i32_1 = arith.constant 0 : i32
    return %c0_i32, %c0_i32_0 : i32, i32
  }
  func.func @transform_10(%arg0: i32) -> (i32, i32) {
    %c0_i32 = arith.constant 0 : i32
    %c0_i32_0 = arith.constant 0 : i32
    %c0_i32_1 = arith.constant 0 : i32
    return %c0_i32, %c0_i32_0 : i32, i32
  }
  func.func @transform_11(%arg0: i32) -> (i32, i32) {
    %c0_i32 = arith.constant 0 : i32
    %c0_i32_0 = arith.constant 0 : i32
    %c0_i32_1 = arith.constant 0 : i32
    return %c0_i32, %c0_i32_0 : i32, i32
  }
  func.func @transform_12(%arg0: i32) -> (i32, i32) {
    %c0_i32 = arith.constant 0 : i32
    %c0_i32_0 = arith.constant 0 : i32
    %c0_i32_1 = arith.constant 0 : i32
    return %c0_i32, %c0_i32_0 : i32, i32
  }
  func.func @transform_13(%arg0: i32) -> (i32, i32, i32) {
    %c0_i32 = arith.constant 0 : i32
    %c0_i32_0 = arith.constant 0 : i32
    %c0_i32_1 = arith.constant 0 : i32
    return %c0_i32, %arg0, %c0_i32_0 : i32, i32, i32
  }
  func.func @transform_14(%arg0: i32) -> (i32, i32) {
    %c0_i32 = arith.constant 0 : i32
    %c0_i32_0 = arith.constant 0 : i32
    return %arg0, %c0_i32 : i32, i32
  }
}

</mosaic_0001>

<bundles_post_ra>
// kernel: lstmae_forward.1
= control target key start
LH: loop header
LB: loop body
LE: loop exit
PB: predicated region body
PF: predicated region fallthrough
CT: control target
= control target key end

     0   :  { %vm129_vm0 = vcmask 1043456   ;;  %vm80_vm1 = vcmask 31744   ;;  %v3834_v3 = vmov 0.0   ;;  %s3836_s27 = smov 32   ;;  %vm290_vm2 = vcmask 261120   ;;  %s3838_s19 = smov 96   ;;  %s4788_s3 = inlined_call_operand.vmem [shape: f32[32,128], index: 3, kind: input, shape index: {}]   ;;  %s4789_s2 = inlined_call_operand.vmem [shape: f32[4,128], index: 2, kind: input, shape index: {}]   ;;  %s4790_s1 = inlined_call_operand.vmem [shape: f32[8,16,4], index: 1, kind: input, shape index: {}]   ;;  %s4791_s4 = inlined_call_operand.vmem [shape: f32[1,128], index: 4, kind: input, shape index: {}]   ;;  %s4792_s0 = inlined_call_operand.vmem [shape: s32[16,1], index: 0, kind: input, shape index: {}]   ;;  %s4793_s5 = inlined_call_operand.vmem [shape: f32[32,8], index: 5, kind: input, shape index: {}]   ;;  %s4794_s9 = inlined_call_operand.vmem [shape: f32[32,128], index: 9, kind: input, shape index: {}]   ;;  %s4795_s7 = inlined_call_operand.vmem [shape: f32[8,128], index: 7, kind: input, shape index: {}]   ;;  %s4796_s6 = inlined_call_operand.vmem [shape: f32[1,8], index: 6, kind: input, shape index: {}]   ;;  %s4797_s14 = inlined_call_operand.vmem [shape: f32[16,8], index: 14, kind: output, shape index: {1}]   ;;  %s4798_s8 = inlined_call_operand.vmem [shape: f32[1,128], index: 8, kind: input, shape index: {}]   ;;  %s4799_s10 = inlined_call_operand.vmem [shape: f32[1,128], index: 10, kind: input, shape index: {}]   ;;  %s4800_s11 = inlined_call_operand.vmem [shape: f32[1,32], index: 11, kind: input, shape index: {}]   ;;  %s4801_s12 = inlined_call_operand.<no memory space> [shape: f32[1,1], index: 12, kind: input, shape index: {}]   ;;  %s4802_s13 = inlined_call_operand.vmem [shape: f32[8,16,1], index: 13, kind: output, shape index: {0}]  }
   0x1   :  { %v3917_v0 = vld [vmem:[%s4788_s3 + $0x18] sm:$0xff]  ;;  %v72_v1 = vld [vmem:[%s4789_s2] sm:$0xf]  ;;  %v3925_v2 = vld [vmem:[%s4788_s3 + $0x10] sm:$0xff]  ;;  %3395 = vmatprep.mubr.f32.mxu1 %v3834_v3 }
   0x2   :  { %3387 = vmatprep.subr.mxu1 %v3917_v0  ;;  %3361 = vmatprep.subr.msk.mxu0 %vm129_vm0, %v72_v1  ;;  %v48_v4 = vld [vmem:[%s4790_s1] sm:$0xff]  ;;  %v49_v5 = vld [vmem:[%s4790_s1 + $0x8] sm:$0xff]  ;;  %v50_v39 = vld [vmem:[%s4790_s1 + $0x10] sm:$0xff] }
   0x3   :  { %3388 = vmatpush3.msra.mxu1 %v3917_v0  ;;  %3362 = vmatpush3.msk.msra.mxu0 %vm129_vm0, %v72_v1  ;;  %v3939_v6 = vld [vmem:[%s4788_s3 + $0x8] sm:$0xff]  ;;  %v3948_v7 = vld [vmem:[%s4788_s3] sm:$0xff]  ;;  %v51_v42 = vld [vmem:[%s4790_s1 + $0x18] sm:$0xff] }
   0x4   :  { %3389 = vmatprep.subr.mxu1 %v3925_v2  ;;  %3363 = vmatprep.mubr.msk.f32.mxu0 %vm80_vm1, %v48_v4  ;;  %v3976_v8 = vld [vmem:[%s4791_s4] ss:$0 sm:$0xff]  ;;  %s3835_s4 = smov 64  }
   0x5   :  { %3390 = vmatpush3.msra.mxu1 %v3925_v2  ;;  %3364 = vmatmul.mubr.msk.f32.vlgmr.msra.gmra.mxu0 %vm80_vm1, %v49_v5 }
   0x6   :  { %3391 = vmatprep.subr.mxu1 %v3939_v6  ;;  %3431 = vmatprep.subr.mxu0 %v3917_v0 }
   0x7   :  { %3392 = vmatpush3.msra.mxu1 %v3939_v6  ;;  %3432 = vmatpush3.msra.mxu0 %v3917_v0 }
   0x8   :  { %3393 = vmatprep.subr.mxu1 %v3948_v7  ;;  %3433 = vmatprep.subr.mxu0 %v3925_v2 }
   0x9   :  { %3394 = vmatpush3.msra.mxu1 %v3948_v7  ;;  %3434 = vmatpush3.msra.mxu0 %v3925_v2 }
   0xa   :  { %3396 = vmatmul.mubr.f32.vlgmr.msra.gmra.mxu1 %v3834_v3  ;;  %3398 = vmatprep.subr.mxu1 %v3917_v0 }
   0xb   :  { %3399 = vmatpush3.msra.mxu1 %v3917_v0  ;;  %3435 = vmatprep.subr.mxu0 %v3939_v6 }
   0xc   :  { %3400 = vmatprep.subr.mxu1 %v3925_v2  ;;  %3436 = vmatpush3.msra.mxu0 %v3939_v6 }
   0xd   :  { %3401 = vmatpush3.msra.mxu1 %v3925_v2  ;;  %3437 = vmatprep.subr.mxu0 %v3948_v7 }
   0xe   :  { %3402 = vmatprep.subr.mxu1 %v3939_v6  ;;  %3438 = vmatpush3.msra.mxu0 %v3948_v7 }
   0xf   :  { %3403 = vmatpush3.msra.mxu1 %v3939_v6  ;;  %3453 = vmatprep.subr.mxu0 %v3917_v0 }
  0x10   :  { %3404 = vmatprep.subr.mxu1 %v3948_v7  ;;  %3366 = vmatprep.mubr.msk.f32.mxu0 %vm80_vm1, %v50_v39 }
  0x11   :  { %3405 = vmatpush3.msra.mxu1 %v3948_v7  ;;  %3367 = vmatmul.mubr.msk.f32.gmra.mxu0 %vm80_vm1, %v51_v42 }
  0x12   :  { %3409 = vmatprep.subr.mxu1 %v3917_v0 }
  0xc5   :  { %v3365_v9 = vpop.f32.mrf.mxu0 }
  0xc6   :  { %v205_v10 = vadd.f32 %v3365_v9, %v3976_v8 }
  0xc7   :  { %v199_v11 = vpop.f32.mrf.mxu0 }
  0xc8   :  { %v200_v13 = vadd.f32 %v3976_v8, %v199_v11 }
  0xca   :  { %v3397_v12 = vpop.f32.mrf.mxu1 }
  0xcb   :  { %v370_v14 = vadd.f32 %v3397_v12, %v205_v10 }
  0xcc   :  { %v360_v15 = vpop.f32.mrf.mxu1 }
  0xcd   :  { %v3123_v16 = vmul.f32 -1.442695, %v370_v14  ;;  %v369_v17 = vadd.f32 %v360_v15, %v200_v13 }
  0xcf   :  { %3626 = vpow2.f32 %v3123_v16  ;;  %v3122_v18 = vmul.f32 -1.442695, %v369_v17 }
  0xd1   :  { %3628 = vpow2.f32 %v3122_v18  ;;  %v3368_v49 = vpop.f32.mrf.mxu0 }
  0xd2   :  { %v215_v50 = vadd.f32 %v3368_v49, %v3976_v8 }
  0xd3   :  { %v209_v51 = vpop.f32.mrf.mxu0 }
  0xd4   :  { %v210_v53 = vadd.f32 %v3976_v8, %v209_v51 }
  0xdc   :  { %v3627_v19 = vpop.eup %3626 }
  0xdd   :  { %v378_v20 = vadd.f32 1.0, %v3627_v19 }
  0xde   :  { %v3629_v21 = vpop.eup %3628 }
  0xdf   :  { %v377_v22 = vadd.f32 1.0, %v3629_v21  ;;  %3630 = vrcp.f32 %v378_v20  ;;  %v52_v21 = vld [vmem:[%s4790_s1 + $0x20] sm:$0xff] }
  0xe0   :  { %3369 = vmatprep.mubr.msk.f32.mxu0 %vm80_vm1, %v52_v21 }
  0xe1   :  { %3632 = vrcp.f32 %v377_v22  ;;  %v53_v22 = vld [vmem:[%s4790_s1 + $0x28] sm:$0xff] }
  0xe2   :  { %3370 = vmatmul.mubr.msk.f32.gmra.mxu0 %vm80_vm1, %v53_v22 }
  0xec   :  { %v3631_v23 = vpop.eup %3630 }
  0xed   :  { %v384_v27 = vmul.f32 2.0, %v3631_v23  ;;  %v388_v36 = vmul.f32 0.0, %v3631_v23 }
  0xee   :  { %v3633_v24 = vpop.eup %3632 }
  0xef   :  { %v383_v25 = vmul.f32 2.0, %v3633_v24  ;;  %v3125_v28 = vadd.f32 -1.0, %v384_v27  ;;  %v387_v33 = vmul.f32 0.0, %v3633_v24 }
  0xf1   :  { %v3124_v26 = vadd.f32 -1.0, %v383_v25 }
  0xf3   :  { %391 = vrot.lane.b32.xlu0 %v3124_v26, %s3835_s4 }
  0xf7   :  { %393 = vrot.lane.b32.xlu0 %v3125_v28, %s3835_s4 }
 0x165   :  { %v392_v29 = vpop.permute.xlu0 %391 }
 0x166   :  { %v397_v30 = vmul.f32 %v3633_v24, %v392_v29 }
 0x168   :  { %401 = vrot.lane.b32.xlu1 %v397_v30, %s3836_s27 }
 0x169   :  { %v394_v31 = vpop.permute.xlu0 %393 }
 0x16a   :  { %v398_v32 = vmul.f32 %v3631_v23, %v394_v31 }
 0x16c   :  { %403 = vrot.lane.b32.xlu1 %v398_v32, %s3836_s27 }
 0x1a2   :  { %v3371_v31 = vpop.f32.mrf.mxu0 }
 0x1a3   :  { %v225_v32 = vadd.f32 %v3371_v31, %v3976_v8 }
 0x1da   :  { %v402_v34 = vpop.permute.xlu1 %401 }
 0x1db   :  { %v3984_v35 = vadd.f32 %v402_v34, %v387_v33  ;;  %v219_v33 = vpop.f32.mrf.mxu0 }
 0x1dd   :  { %3634 = vtanh.f32 %v3984_v35 }
 0x1de   :  { %v404_v37 = vpop.permute.xlu1 %403 }
 0x1df   :  { %v408_v38 = vadd.f32 %v404_v37, %v388_v36 }
 0x1e1   :  { %3636 = vtanh.f32 %v408_v38 }
 0x1ea   :  { %v3635_v40 = vpop.eup %3634 }
 0x1eb   :  { %413 = vrot.lane.b32.xlu0 %v3635_v40, %s3835_s4 }
 0x1ee   :  { %v3637_v41 = vpop.eup %3636 }
 0x1ef   :  { %415 = vrot.lane.b32.xlu1 %v3637_v41, %s3835_s4 }
 0x25d   :  { %v414_v43 = vpop.permute.xlu0 %413 }
 0x25e   :  { %v3997_v44 = vmul.f32 %v3633_v24, %v414_v43 }
 0x260   :  { %443 = vrot.lane.b32.xlu0 %v3997_v44, %s3836_s27 }
 0x261   :  { %v416_v45 = vpop.permute.xlu1 %415 }
 0x262   :  { %v4001_v46 = vmul.f32 %v3631_v23, %v416_v45 }
 0x264   :  { %445 = vrot.lane.b32.xlu1 %v4001_v46, %s3836_s27 }
 0x2d2   :  { %v444_v47 = vpop.permute.xlu0 %443 }
 0x2d3   :  { %3406 = vmatprep.mubr.msk.f32.mxu1 %vm290_vm2, %v444_v47 }
 0x2d6   :  { %v446_v48 = vpop.permute.xlu1 %445 }
 0x2d7   :  { %3407 = vmatmul.mubr.msk.f32.vlgmr.msra.gmra.mxu1 %vm290_vm2, %v446_v48 }
 0x2d8   :  { %3410 = vmatpush3.msra.mxu1 %v3917_v0 }
 0x2d9   :  { %3411 = vmatprep.subr.mxu1 %v3925_v2 }
 0x2da   :  { %3412 = vmatpush3.msra.mxu1 %v3925_v2 }
 0x2db   :  { %3413 = vmatprep.subr.mxu1 %v3939_v6 }
 0x2dc   :  { %3414 = vmatpush3.msra.mxu1 %v3939_v6 }
 0x2dd   :  { %3415 = vmatprep.subr.mxu1 %v3948_v7 }
 0x2de   :  { %3416 = vmatpush3.msra.mxu1 %v3948_v7 }
 0x2df   :  { %3420 = vmatprep.subr.mxu1 %v3917_v0 }
 0x397   :  { %v3408_v52 = vpop.f32.mrf.mxu1 }
 0x398   :  { %v527_v54 = vadd.f32 %v3408_v52, %v215_v50 }
 0x399   :  { %v517_v55 = vpop.f32.mrf.mxu1 }
 0x39a   :  { %v3131_v56 = vmul.f32 -1.442695, %v527_v54  ;;  %v526_v57 = vadd.f32 %v517_v55, %v210_v53 }
 0x39c   :  { %3638 = vpow2.f32 %v3131_v56  ;;  %v3130_v58 = vmul.f32 -1.442695, %v526_v57 }
 0x39e   :  { %3640 = vpow2.f32 %v3130_v58 }
 0x3a9   :  { %v3639_v59 = vpop.eup %3638 }
 0x3aa   :  { %v535_v60 = vadd.f32 1.0, %v3639_v59 }
 0x3ab   :  { %v3641_v61 = vpop.eup %3640 }
 0x3ac   :  { %3642 = vrcp.f32 %v535_v60  ;;  %v534_v62 = vadd.f32 1.0, %v3641_v61 }
 0x3ae   :  { %3644 = vrcp.f32 %v534_v62 }
 0x3b9   :  { %v3643_v63 = vpop.eup %3642 }
 0x3ba   :  { %v541_v1 = vmul.f32 2.0, %v3643_v63  ;;  %v545_v15 = vmul.f32 %v3643_v63, %v408_v38 }
 0x3bb   :  { %v3645_v4 = vpop.eup %3644 }
 0x3bc   :  { %v3133_v5 = vadd.f32 -1.0, %v541_v1  ;;  %v540_v9 = vmul.f32 2.0, %v3645_v4  ;;  %v544_v18 = vmul.f32 %v3645_v4, %v3984_v35  ;;  %v220_v35 = vadd.f32 %v3976_v8, %v219_v33  ;;  %v55_v1 = vld [vmem:[%s4790_s1 + $0x38] sm:$0xff] }
 0x3be   :  { %550 = vrot.lane.b32.xlu1 %v3133_v5, %s3835_s4  ;;  %v3132_v10 = vadd.f32 -1.0, %v540_v9 }
 0x3c0   :  { %548 = vrot.lane.b32.xlu0 %v3132_v10, %s3835_s4 }
 0x430   :  { %v551_v11 = vpop.permute.xlu1 %550 }
 0x431   :  { %v555_v12 = vmul.f32 %v3643_v63, %v551_v11 }
 0x432   :  { %v549_v13 = vpop.permute.xlu0 %548 }
 0x433   :  { %v554_v14 = vmul.f32 %v3645_v4, %v549_v13  ;;  %560 = vrot.lane.b32.xlu1 %v555_v12, %s3836_s27 }
 0x435   :  { %558 = vrot.lane.b32.xlu0 %v554_v14, %s3836_s27 }
 0x4a5   :  { %v561_v16 = vpop.permute.xlu1 %560 }
 0x4a6   :  { %v4021_v17 = vadd.f32 %v561_v16, %v545_v15 }
 0x4a7   :  { %v559_v19 = vpop.permute.xlu0 %558 }
 0x4a8   :  { %3646 = vtanh.f32 %v4021_v17  ;;  %v4025_v20 = vadd.f32 %v559_v19, %v544_v18 }
 0x4aa   :  { %3648 = vtanh.f32 %v4025_v20 }
 0x4b5   :  { %v3647_v23 = vpop.eup %3646 }
 0x4b6   :  { %572 = vrot.lane.b32.xlu1 %v3647_v23, %s3835_s4 }
 0x4b7   :  { %v3649_v24 = vpop.eup %3648 }
 0x4b8   :  { %570 = vrot.lane.b32.xlu0 %v3649_v24, %s3835_s4 }
 0x528   :  { %v573_v25 = vpop.permute.xlu1 %572 }
 0x529   :  { %v4038_v26 = vmul.f32 %v3643_v63, %v573_v25  ;;  %v54_v63 = vld [vmem:[%s4790_s1 + $0x30] sm:$0xff] }
 0x52a   :  { %v571_v27 = vpop.permute.xlu0 %570  ;;  %3372 = vmatprep.mubr.msk.f32.mxu0 %vm80_vm1, %v54_v63 }
 0x52b   :  { %v4040_v28 = vmul.f32 %v3645_v4, %v571_v27  ;;  %602 = vrot.lane.b32.xlu1 %v4038_v26, %s3836_s27  ;;  %3373 = vmatmul.mubr.msk.f32.gmra.mxu0 %vm80_vm1, %v55_v1 }
 0x52d   :  { %600 = vrot.lane.b32.xlu0 %v4040_v28, %s3836_s27 }
 0x59d   :  { %v603_v30 = vpop.permute.xlu1 %602 }
 0x59f   :  { %v601_v29 = vpop.permute.xlu0 %600 }
 0x5a0   :  { %3417 = vmatprep.mubr.msk.f32.mxu1 %vm290_vm2, %v601_v29 }
 0x5a1   :  { %3418 = vmatmul.mubr.msk.f32.vlgmr.msra.gmra.mxu1 %vm290_vm2, %v603_v30 }
 0x5a2   :  { %3421 = vmatpush3.msra.mxu1 %v3917_v0 }
 0x5a3   :  { %3422 = vmatprep.subr.mxu1 %v3925_v2 }
 0x5a4   :  { %3423 = vmatpush3.msra.mxu1 %v3925_v2 }
 0x5a5   :  { %3424 = vmatprep.subr.mxu1 %v3939_v6 }
 0x5a6   :  { %3425 = vmatpush3.msra.mxu1 %v3939_v6 }
 0x5a7   :  { %3426 = vmatprep.subr.mxu1 %v3948_v7 }
 0x5a8   :  { %3427 = vmatpush3.msra.mxu1 %v3948_v7 }
 0x5a9   :  { %3442 = vmatprep.subr.mxu1 %v3917_v0 }
 0x5eb   :  { %v3374_v15 = vpop.f32.mrf.mxu0 }
 0x5ec   :  { %v235_v16 = vadd.f32 %v3374_v15, %v3976_v8 }
 0x661   :  { %v3419_v34 = vpop.f32.mrf.mxu1 }
 0x662   :  { %v684_v36 = vadd.f32 %v3419_v34, %v225_v32 }
 0x663   :  { %v674_v37 = vpop.f32.mrf.mxu1 }
 0x664   :  { %v3139_v38 = vmul.f32 -1.442695, %v684_v36  ;;  %v683_v39 = vadd.f32 %v674_v37, %v220_v35 }
 0x666   :  { %3650 = vpow2.f32 %v3139_v38  ;;  %v3138_v40 = vmul.f32 -1.442695, %v683_v39 }
 0x668   :  { %3652 = vpow2.f32 %v3138_v40 }
 0x673   :  { %v3651_v41 = vpop.eup %3650 }
 0x674   :  { %v692_v42 = vadd.f32 1.0, %v3651_v41 }
 0x675   :  { %v3653_v43 = vpop.eup %3652 }
 0x676   :  { %3654 = vrcp.f32 %v692_v42  ;;  %v691_v45 = vadd.f32 1.0, %v3653_v43 }
 0x678   :  { %3656 = vrcp.f32 %v691_v45 }
 0x683   :  { %v3655_v47 = vpop.eup %3654 }
 0x684   :  { %v698_v48 = vmul.f32 2.0, %v3655_v47  ;;  %v702_v57 = vmul.f32 %v3655_v47, %v4021_v17  ;;  %v229_v17 = vpop.f32.mrf.mxu0 }
 0x685   :  { %v3657_v49 = vpop.eup %3656  ;;  %v230_v19 = vadd.f32 %v3976_v8, %v229_v17 }
 0x686   :  { %v3141_v50 = vadd.f32 -1.0, %v698_v48  ;;  %v697_v51 = vmul.f32 2.0, %v3657_v49  ;;  %v701_v60 = vmul.f32 %v3657_v49, %v4025_v20 }
 0x688   :  { %707 = vrot.lane.b32.xlu1 %v3141_v50, %s3835_s4  ;;  %v3140_v52 = vadd.f32 -1.0, %v697_v51  ;;  %v57_v50 = vld [vmem:[%s4790_s1 + $0x48] sm:$0xff]  ;;  %v58_v51 = vld [vmem:[%s4790_s1 + $0x50] sm:$0xff] }
 0x68a   :  { %705 = vrot.lane.b32.xlu0 %v3140_v52, %s3835_s4  ;;  %v59_v52 = vld [vmem:[%s4790_s1 + $0x58] sm:$0xff] }
 0x6fa   :  { %v708_v53 = vpop.permute.xlu1 %707 }
 0x6fb   :  { %v712_v54 = vmul.f32 %v3655_v47, %v708_v53  ;;  %v60_v53 = vld [vmem:[%s4790_s1 + $0x60] sm:$0xff] }
 0x6fc   :  { %v706_v55 = vpop.permute.xlu0 %705 }
 0x6fd   :  { %v711_v56 = vmul.f32 %v3657_v49, %v706_v55  ;;  %717 = vrot.lane.b32.xlu1 %v712_v54, %s3836_s27  ;;  %v61_v54 = vld [vmem:[%s4790_s1 + $0x68] sm:$0xff] }
 0x6ff   :  { %715 = vrot.lane.b32.xlu0 %v711_v56, %s3836_s27  ;;  %v62_v56 = vld [vmem:[%s4790_s1 + $0x70] sm:$0xff] }
 0x76f   :  { %v718_v58 = vpop.permute.xlu1 %717 }
 0x770   :  { %v4063_v59 = vadd.f32 %v718_v58, %v702_v57  ;;  %v63_v58 = vld [vmem:[%s4790_s1 + $0x78] sm:$0xff] }
 0x771   :  { %v716_v61 = vpop.permute.xlu0 %715 }
 0x772   :  { %3658 = vtanh.f32 %v4063_v59  ;;  %v4067_v62 = vadd.f32 %v716_v61, %v701_v60 }
 0x774   :  { %3660 = vtanh.f32 %v4067_v62 }
 0x77f   :  { %v3659_v4 = vpop.eup %3658 }
 0x780   :  { %729 = vrot.lane.b32.xlu1 %v3659_v4, %s3835_s4 }
 0x781   :  { %v3661_v5 = vpop.eup %3660 }
 0x782   :  { %727 = vrot.lane.b32.xlu0 %v3661_v5, %s3835_s4 }
 0x7f2   :  { %v730_v9 = vpop.permute.xlu1 %729 }
 0x7f3   :  { %v4080_v10 = vmul.f32 %v3655_v47, %v730_v9 }
 0x7f4   :  { %v728_v11 = vpop.permute.xlu0 %727 }
 0x7f5   :  { %v4082_v12 = vmul.f32 %v3657_v49, %v728_v11  ;;  %759 = vrot.lane.b32.xlu1 %v4080_v10, %s3836_s27  ;;  %v56_v49 = vld [vmem:[%s4790_s1 + $0x40] sm:$0xff] }
 0x7f6   :  { %3375 = vmatprep.mubr.msk.f32.mxu0 %vm80_vm1, %v56_v49 }
 0x7f7   :  { %757 = vrot.lane.b32.xlu0 %v4082_v12, %s3836_s27  ;;  %3376 = vmatmul.mubr.msk.f32.gmra.mxu0 %vm80_vm1, %v57_v50 }
 0x7f8   :  { %3378 = vmatprep.mubr.msk.f32.mxu0 %vm80_vm1, %v58_v51 }
 0x7fb   :  { %3379 = vmatmul.mubr.msk.f32.gmra.mxu0 %vm80_vm1, %v59_v52 }
 0x7fc   :  { %3381 = vmatprep.mubr.msk.f32.mxu0 %vm80_vm1, %v60_v53 }
 0x7ff   :  { %3382 = vmatmul.mubr.msk.f32.gmra.mxu0 %vm80_vm1, %v61_v54 }
 0x800   :  { %3384 = vmatprep.mubr.msk.f32.mxu0 %vm80_vm1, %v62_v56 }
 0x803   :  { %3385 = vmatmul.mubr.msk.f32.gmra.mxu0 %vm80_vm1, %v63_v58 }
 0x867   :  { %v760_v14 = vpop.permute.xlu1 %759 }
 0x869   :  { %v758_v13 = vpop.permute.xlu0 %757 }
 0x86a   :  { %3428 = vmatprep.mubr.msk.f32.mxu1 %vm290_vm2, %v758_v13 }
 0x86b   :  { %3429 = vmatmul.mubr.msk.f32.vlgmr.msra.gmra.mxu1 %vm290_vm2, %v760_v14 }
 0x86c   :  { %3443 = vmatpush3.msra.mxu1 %v3917_v0 }
 0x86d   :  { %3444 = vmatprep.subr.mxu1 %v3925_v2 }
 0x86e   :  { %3445 = vmatpush3.msra.mxu1 %v3925_v2 }
 0x86f   :  { %3446 = vmatprep.subr.mxu1 %v3939_v6 }
 0x870   :  { %3447 = vmatpush3.msra.mxu1 %v3939_v6 }
 0x871   :  { %3448 = vmatprep.subr.mxu1 %v3948_v7 }
 0x872   :  { %3449 = vmatpush3.msra.mxu1 %v3948_v7 }
 0x873   :  { %3464 = vmatprep.subr.mxu1 %v3917_v0 }
 0x8b7   :  { %v3377_v4 = vpop.f32.mrf.mxu0 }
 0x8b8   :  { %v245_v17 = vadd.f32 %v3377_v4, %v3976_v8 }
 0x8b9   :  { %v239_v5 = vpop.f32.mrf.mxu0 }
 0x8bb   :  { %v4163_v9 = vpop.f32.mrf.mxu0 }
 0x8bd   :  { %v4165_v11 = vpop.f32.mrf.mxu0 }
 0x8bf   :  { %v4167_v13 = vpop.f32.mrf.mxu0 }
 0x8c1   :  { %v4169_v14 = vpop.f32.mrf.mxu0 }
 0x8c3   :  { %v4171_v15 = vpop.f32.mrf.mxu0 }
 0x92b   :  { %v3430_v18 = vpop.f32.mrf.mxu1 }
 0x92c   :  { %v841_v20 = vadd.f32 %v3430_v18, %v235_v16  ;;  %v4173_v16 = vpop.f32.mrf.mxu0 }
 0x92d   :  { %v831_v21 = vpop.f32.mrf.mxu1 }
 0x92e   :  { %v3147_v22 = vmul.f32 -1.442695, %v841_v20  ;;  %v840_v23 = vadd.f32 %v831_v21, %v230_v19  ;;  %v240_v19 = vadd.f32 %v3976_v8, %v239_v5 }
 0x930   :  { %3662 = vpow2.f32 %v3147_v22  ;;  %v3146_v24 = vmul.f32 -1.442695, %v840_v23 }
 0x932   :  { %3664 = vpow2.f32 %v3146_v24 }
 0x93d   :  { %v3663_v25 = vpop.eup %3662 }
 0x93e   :  { %v849_v27 = vadd.f32 1.0, %v3663_v25 }
 0x93f   :  { %v3665_v29 = vpop.eup %3664 }
 0x940   :  { %3666 = vrcp.f32 %v849_v27  ;;  %v848_v30 = vadd.f32 1.0, %v3665_v29 }
 0x942   :  { %3668 = vrcp.f32 %v848_v30 }
 0x94d   :  { %v3667_v31 = vpop.eup %3666 }
 0x94e   :  { %v855_v32 = vmul.f32 2.0, %v3667_v31  ;;  %v859_v41 = vmul.f32 %v3667_v31, %v4063_v59 }
 0x94f   :  { %v3669_v33 = vpop.eup %3668 }
 0x950   :  { %v3149_v34 = vadd.f32 -1.0, %v855_v32  ;;  %v854_v35 = vmul.f32 2.0, %v3669_v33  ;;  %v858_v45 = vmul.f32 %v3669_v33, %v4067_v62 }
 0x952   :  { %864 = vrot.lane.b32.xlu1 %v3149_v34, %s3835_s4  ;;  %v3148_v36 = vadd.f32 -1.0, %v854_v35 }
 0x954   :  { %862 = vrot.lane.b32.xlu0 %v3148_v36, %s3835_s4 }
 0x9c4   :  { %v865_v37 = vpop.permute.xlu1 %864 }
 0x9c5   :  { %v869_v38 = vmul.f32 %v3667_v31, %v865_v37 }
 0x9c6   :  { %v863_v39 = vpop.permute.xlu0 %862 }
 0x9c7   :  { %v868_v40 = vmul.f32 %v3669_v33, %v863_v39  ;;  %874 = vrot.lane.b32.xlu1 %v869_v38, %s3836_s27 }
 0x9c9   :  { %872 = vrot.lane.b32.xlu0 %v868_v40, %s3836_s27 }
 0xa39   :  { %v875_v42 = vpop.permute.xlu1 %874 }
 0xa3a   :  { %v4105_v43 = vadd.f32 %v875_v42, %v859_v41 }
 0xa3b   :  { %v873_v47 = vpop.permute.xlu0 %872 }
 0xa3c   :  { %3670 = vtanh.f32 %v4105_v43  ;;  %v4109_v48 = vadd.f32 %v873_v47, %v858_v45 }
 0xa3e   :  { %3672 = vtanh.f32 %v4109_v48 }
 0xa49   :  { %v3671_v55 = vpop.eup %3670 }
 0xa4a   :  { %886 = vrot.lane.b32.xlu1 %v3671_v55, %s3835_s4 }
 0xa4b   :  { %v3673_v57 = vpop.eup %3672 }
 0xa4c   :  { %884 = vrot.lane.b32.xlu0 %v3673_v57, %s3835_s4  ;;  %v255_v57 = vadd.f32 %v4163_v9, %v3976_v8 }
 0xabc   :  { %v887_v59 = vpop.permute.xlu1 %886 }
 0xabd   :  { %v4146_v60 = vmul.f32 %v3667_v31, %v887_v59  ;;  %v250_v59 = vadd.f32 %v3976_v8, %v4165_v11 }
 0xabe   :  { %v885_v61 = vpop.permute.xlu0 %884 }
 0xabf   :  { %v4148_v62 = vmul.f32 %v3669_v33, %v885_v61  ;;  %916 = vrot.lane.b32.xlu1 %v4146_v60, %s3836_s27 }
 0xac1   :  { %914 = vrot.lane.b32.xlu0 %v4148_v62, %s3836_s27 }
 0xb31   :  { %v917_v1 = vpop.permute.xlu1 %916 }
 0xb33   :  { %v915_v63 = vpop.permute.xlu0 %914 }
 0xb34   :  { %3439 = vmatprep.mubr.msk.f32.mxu0 %vm290_vm2, %v915_v63 }
 0xb35   :  { %3440 = vmatmul.mubr.msk.f32.vlgmr.msra.gmra.mxu0 %vm290_vm2, %v917_v1 }
 0xb36   :  { %3454 = vmatpush3.msra.mxu0 %v3917_v0 }
 0xb37   :  { %3455 = vmatprep.subr.mxu0 %v3925_v2 }
 0xb38   :  { %3456 = vmatpush3.msra.mxu0 %v3925_v2 }
 0xb39   :  { %3457 = vmatprep.subr.mxu0 %v3939_v6 }
 0xb3a   :  { %3458 = vmatpush3.msra.mxu0 %v3939_v6 }
 0xb3b   :  { %3459 = vmatprep.subr.mxu0 %v3948_v7 }
 0xb3c   :  { %3460 = vmatpush3.msra.mxu0 %v3948_v7 }
 0xbf5   :  { %v3441_v18 = vpop.f32.mrf.mxu0 }
 0xbf6   :  { %v998_v20 = vadd.f32 %v3441_v18, %v245_v17 }
 0xbf7   :  { %v988_v21 = vpop.f32.mrf.mxu0 }
 0xbf8   :  { %v3155_v22 = vmul.f32 -1.442695, %v998_v20  ;;  %v997_v23 = vadd.f32 %v988_v21, %v240_v19 }
 0xbfa   :  { %3674 = vpow2.f32 %v3155_v22  ;;  %v3154_v24 = vmul.f32 -1.442695, %v997_v23 }
 0xbfc   :  { %3676 = vpow2.f32 %v3154_v24 }
 0xc07   :  { %v3675_v25 = vpop.eup %3674 }
 0xc08   :  { %v1006_v27 = vadd.f32 1.0, %v3675_v25 }
 0xc09   :  { %v3677_v29 = vpop.eup %3676 }
 0xc0a   :  { %3678 = vrcp.f32 %v1006_v27  ;;  %v1005_v30 = vadd.f32 1.0, %v3677_v29 }
 0xc0c   :  { %3680 = vrcp.f32 %v1005_v30 }
 0xc17   :  { %v3679_v31 = vpop.eup %3678 }
 0xc18   :  { %v1012_v32 = vmul.f32 2.0, %v3679_v31  ;;  %v1016_v41 = vmul.f32 %v3679_v31, %v4105_v43 }
 0xc19   :  { %v3681_v33 = vpop.eup %3680 }
 0xc1a   :  { %v3157_v34 = vadd.f32 -1.0, %v1012_v32  ;;  %v1011_v35 = vmul.f32 2.0, %v3681_v33  ;;  %v1015_v47 = vmul.f32 %v3681_v33, %v4109_v48 }
 0xc1c   :  { %1021 = vrot.lane.b32.xlu1 %v3157_v34, %s3835_s4  ;;  %v3156_v36 = vadd.f32 -1.0, %v1011_v35 }
 0xc1e   :  { %1019 = vrot.lane.b32.xlu0 %v3156_v36, %s3835_s4 }
 0xc8e   :  { %v1022_v37 = vpop.permute.xlu1 %1021 }
 0xc8f   :  { %v1026_v38 = vmul.f32 %v3679_v31, %v1022_v37 }
 0xc90   :  { %v1020_v39 = vpop.permute.xlu0 %1019 }
 0xc91   :  { %v1025_v40 = vmul.f32 %v3681_v33, %v1020_v39  ;;  %1031 = vrot.lane.b32.xlu1 %v1026_v38, %s3836_s27 }
 0xc93   :  { %1029 = vrot.lane.b32.xlu0 %v1025_v40, %s3836_s27 }
 0xd03   :  { %v1032_v42 = vpop.permute.xlu1 %1031 }
 0xd04   :  { %v1036_v45 = vadd.f32 %v1032_v42, %v1016_v41  ;;  %v265_v41 = vadd.f32 %v4167_v13, %v3976_v8 }
 0xd05   :  { %v1030_v49 = vpop.permute.xlu0 %1029 }
 0xd06   :  { %3682 = vtanh.f32 %v1036_v45  ;;  %v1035_v50 = vadd.f32 %v1030_v49, %v1015_v47 }
 0xd08   :  { %3684 = vtanh.f32 %v1035_v50 }
 0xd13   :  { %v3683_v51 = vpop.eup %3682 }
 0xd14   :  { %1043 = vrot.lane.b32.xlu1 %v3683_v51, %s3835_s4 }
 0xd15   :  { %v3685_v52 = vpop.eup %3684 }
 0xd16   :  { %1041 = vrot.lane.b32.xlu0 %v3685_v52, %s3835_s4 }
 0xd86   :  { %v1044_v53 = vpop.permute.xlu1 %1043 }
 0xd87   :  { %v4185_v54 = vmul.f32 %v3679_v31, %v1044_v53 }
 0xd88   :  { %v1042_v55 = vpop.permute.xlu0 %1041 }
 0xd89   :  { %v4187_v56 = vmul.f32 %v3681_v33, %v1042_v55  ;;  %1073 = vrot.lane.b32.xlu1 %v4185_v54, %s3836_s27 }
 0xd8b   :  { %1071 = vrot.lane.b32.xlu0 %v4187_v56, %s3836_s27 }
 0xdfb   :  { %v1074_v48 = vpop.permute.xlu1 %1073 }
 0xdfd   :  { %v1072_v43 = vpop.permute.xlu0 %1071 }
 0xdfe   :  { %3450 = vmatprep.mubr.msk.f32.mxu1 %vm290_vm2, %v1072_v43 }
 0xdff   :  { %3451 = vmatmul.mubr.msk.f32.vlgmr.msra.gmra.mxu1 %vm290_vm2, %v1074_v48 }
 0xe00   :  { %3465 = vmatpush3.msra.mxu1 %v3917_v0 }
 0xe01   :  { %3466 = vmatprep.subr.mxu1 %v3925_v2 }
 0xe02   :  { %3467 = vmatpush3.msra.mxu1 %v3925_v2 }
 0xe03   :  { %3468 = vmatprep.subr.mxu1 %v3939_v6 }
 0xe04   :  { %3469 = vmatpush3.msra.mxu1 %v3939_v6 }
 0xe05   :  { %3470 = vmatprep.subr.mxu1 %v3948_v7 }
 0xe06   :  { %3471 = vmatpush3.msra.mxu1 %v3948_v7 }
 0xebf   :  { %v3452_v58 = vpop.f32.mrf.mxu1 }
 0xec0   :  { %v1155_v0 = vadd.f32 %v3452_v58, %v255_v57 }
 0xec1   :  { %v1145_v61 = vpop.f32.mrf.mxu1 }
 0xec2   :  { %v3163_v63 = vmul.f32 -1.442695, %v1155_v0  ;;  %v1154_v1 = vadd.f32 %v1145_v61, %v250_v59 }
 0xec4   :  { %3686 = vpow2.f32 %v3163_v63  ;;  %v3162_v2 = vmul.f32 -1.442695, %v1154_v1 }
 0xec6   :  { %3688 = vpow2.f32 %v3162_v2 }
 0xed1   :  { %v3687_v4 = vpop.eup %3686 }
 0xed2   :  { %v1163_v6 = vadd.f32 1.0, %v3687_v4 }
 0xed3   :  { %v3689_v5 = vpop.eup %3688 }
 0xed4   :  { %3690 = vrcp.f32 %v1163_v6  ;;  %v1162_v17 = vadd.f32 1.0, %v3689_v5 }
 0xed6   :  { %3692 = vrcp.f32 %v1162_v17 }
 0xee1   :  { %v3691_v7 = vpop.eup %3690 }
 0xee2   :  { %v1169_v18 = vmul.f32 2.0, %v3691_v7  ;;  %v1173_v25 = vmul.f32 %v3691_v7, %v1036_v45  ;;  %v260_v45 = vadd.f32 %v3976_v8, %v4169_v14 }
 0xee3   :  { %v3693_v9 = vpop.eup %3692 }
 0xee4   :  { %v3165_v19 = vadd.f32 -1.0, %v1169_v18  ;;  %v1168_v20 = vmul.f32 2.0, %v3693_v9  ;;  %v1172_v30 = vmul.f32 %v3693_v9, %v1035_v50 }
 0xee6   :  { %1178 = vrot.lane.b32.xlu1 %v3165_v19, %s3835_s4  ;;  %v3164_v11 = vadd.f32 -1.0, %v1168_v20 }
 0xee8   :  { %1176 = vrot.lane.b32.xlu0 %v3164_v11, %s3835_s4 }
 0xf58   :  { %v1179_v21 = vpop.permute.xlu1 %1178 }
 0xf59   :  { %v1183_v22 = vmul.f32 %v3691_v7, %v1179_v21 }
 0xf5a   :  { %v1177_v23 = vpop.permute.xlu0 %1176 }
 0xf5b   :  { %v1182_v24 = vmul.f32 %v3693_v9, %v1177_v23  ;;  %1188 = vrot.lane.b32.xlu1 %v1183_v22, %s3836_s27 }
 0xf5d   :  { %1186 = vrot.lane.b32.xlu0 %v1182_v24, %s3836_s27 }
 0xfcd   :  { %v1189_v27 = vpop.permute.xlu1 %1188 }
 0xfce   :  { %v1193_v29 = vadd.f32 %v1189_v27, %v1173_v25  ;;  %v275_v25 = vadd.f32 %v4171_v15, %v3976_v8 }
 0xfcf   :  { %v1187_v31 = vpop.permute.xlu0 %1186 }
 0xfd0   :  { %3694 = vtanh.f32 %v1193_v29  ;;  %v1192_v32 = vadd.f32 %v1187_v31, %v1172_v30 }
 0xfd2   :  { %3696 = vtanh.f32 %v1192_v32 }
 0xfdd   :  { %v3695_v33 = vpop.eup %3694 }
 0xfde   :  { %1200 = vrot.lane.b32.xlu1 %v3695_v33, %s3835_s4 }
 0xfdf   :  { %v3697_v34 = vpop.eup %3696 }
 0xfe0   :  { %1198 = vrot.lane.b32.xlu0 %v3697_v34, %s3835_s4 }
0x1050   :  { %v1201_v35 = vpop.permute.xlu1 %1200 }
0x1051   :  { %v4212_v36 = vmul.f32 %v3691_v7, %v1201_v35 }
0x1052   :  { %v1199_v37 = vpop.permute.xlu0 %1198 }
0x1053   :  { %v4214_v38 = vmul.f32 %v3693_v9, %v1199_v37  ;;  %1230 = vrot.lane.b32.xlu1 %v4212_v36, %s3836_s27 }
0x1055   :  { %1228 = vrot.lane.b32.xlu0 %v4214_v38, %s3836_s27 }
0x10c5   :  { %v1231_v40 = vpop.permute.xlu1 %1230 }
0x10c7   :  { %v1229_v39 = vpop.permute.xlu0 %1228 }
0x10c8   :  { %3461 = vmatprep.mubr.msk.f32.mxu0 %vm290_vm2, %v1229_v39 }
0x10c9   :  { %3462 = vmatmul.mubr.msk.f32.vlgmr.msra.gmra.mxu0 %vm290_vm2, %v1231_v40 }
0x1189   :  { %v3463_v42 = vpop.f32.mrf.mxu0 }
0x118a   :  { %v1312_v47 = vadd.f32 %v3463_v42, %v265_v41  ;;  %v3837_v41 = vmov 0  }
0x118b   :  { %v1302_v49 = vpop.f32.mrf.mxu0  ;;  %3590 = vset.pattern.permute.xlu1 %v3837_v41  ;;  %3584 = vset.pattern.permute.xlu0 %v3837_v41 }
0x118c   :  { %v3171_v50 = vmul.f32 -1.442695, %v1312_v47  ;;  %v1311_v51 = vadd.f32 %v1302_v49, %v260_v45  ;;  %v279_v49 = vld [vmem:[%s4792_s0 + $0x8] sm:$0xff] }
0x118e   :  { %3698 = vpow2.f32 %v3171_v50  ;;  %v3170_v52 = vmul.f32 -1.442695, %v1311_v51  ;;  %v278_v50 = vld [vmem:[%s4792_s0] sm:$0xff]  ;;  %v3121_v51 = vadd.s32 4294967295, %v279_v49 }
0x1190   :  { %3700 = vpow2.f32 %v3170_v52  ;;  %v3120_v52 = vadd.s32 4294967295, %v278_v50  ;;  %vm284_vm3 = vcmp.gt.s32.totalorder %v3121_v51, 0 }
0x1192   :  { %vm282_vm4 = vcmp.gt.s32.totalorder %v3120_v52, 0 }
0x119b   :  { %v3699_v53 = vpop.eup %3698 }
0x119c   :  { %v1320_v55 = vadd.f32 1.0, %v3699_v53  ;;  %v285_v53 = vsel %vm284_vm3, %v3121_v51, 0 }
0x119d   :  { %v3701_v43 = vpop.eup %3700  ;;  %vm288_vm5 = vcmp.lt.s32.totalorder %v285_v53, 7 }
0x119e   :  { %3702 = vrcp.f32 %v1320_v55  ;;  %v1319_v48 = vadd.f32 1.0, %v3701_v43  ;;  %v283_v55 = vsel %vm282_vm4, %v3120_v52, 0  ;;  %v289_v43 = vsel %vm288_vm5, %v285_v53, 7 }
0x119f   :  { %vm286_vm6 = vcmp.lt.s32.totalorder %v283_v55, 7  ;;  %vm422_vm7 = vcmp.eq.s32.totalorder %v289_v43, 0  ;;  %vm579_vm8 = vcmp.eq.s32.totalorder %v289_v43, 1  ;;  %vm736_vm12 = vcmp.eq.s32.totalorder %v289_v43, 2 }
0x11a0   :  { %3704 = vrcp.f32 %v1319_v48  ;;  %v287_v48 = vsel %vm286_vm6, %v283_v55, 7  ;;  %vm893_vm14 = vcmp.eq.s32.totalorder %v289_v43, 3  ;;  %vm1050_vm0 = vcmp.eq.s32.totalorder %v289_v43, 4 }
0x11a1   :  { %vm421_vm9 = vcmp.eq.s32.totalorder %v287_v48, 0  ;;  %vm578_vm10 = vcmp.eq.s32.totalorder %v287_v48, 1  ;;  %vm735_vm11 = vcmp.eq.s32.totalorder %v287_v48, 2  ;;  %vm892_vm13 = vcmp.eq.s32.totalorder %v287_v48, 3 }
0x11a2   :  { %vm1049_vm15 = vcmp.eq.s32.totalorder %v287_v48, 4  ;;  %vm1206_vm1 = vcmp.eq.s32.totalorder %v287_v48, 5  ;;  %vm1207_vm3 = vcmp.eq.s32.totalorder %v289_v43, 5  ;;  %vm1363_vm4 = vcmp.eq.s32.totalorder %v287_v48, 6 }
0x11a3   :  { %vm1364_vm5 = vcmp.eq.s32.totalorder %v289_v43, 6  ;;  %vm1520_vm6 = vcmp.eq.s32.totalorder %v287_v48, 7 }
0x11ab   :  { %v3703_v57 = vpop.eup %3702 }
0x11ac   :  { %v1326_v58 = vmul.f32 2.0, %v3703_v57  ;;  %v1330_v4 = vmul.f32 %v3703_v57, %v1193_v29  ;;  %v270_v29 = vadd.f32 %v3976_v8, %v4173_v16 }
0x11ad   :  { %v3705_v13 = vpop.eup %3704 }
0x11ae   :  { %v3173_v59 = vadd.f32 -1.0, %v1326_v58  ;;  %v1325_v0 = vmul.f32 2.0, %v3705_v13  ;;  %v1329_v17 = vmul.f32 %v3705_v13, %v1192_v32  ;;  %v3127_v58 = vsel %vm422_vm7, 1.0, %v3834_v3 }
0x11af   :  { %vm1521_vm7 = vcmp.eq.s32.totalorder %v289_v43, 7 }
0x11b0   :  { %1335 = vrot.lane.b32.xlu1 %v3173_v59, %s3835_s4  ;;  %v3172_v14 = vadd.f32 -1.0, %v1325_v0 }
0x11b2   :  { %1333 = vrot.lane.b32.xlu0 %v3172_v14, %s3835_s4  ;;  %v3126_v14 = vsel %vm421_vm9, 1.0, %v3834_v3  ;;  %vm3077_vm9 = vcmask 7168  }
0x1222   :  { %v1336_v61 = vpop.permute.xlu1 %1335 }
0x1223   :  { %v1340_v63 = vmul.f32 %v3703_v57, %v1336_v61  ;;  %v3134_v61 = vsel %vm578_vm10, 1.0, %v3834_v3 }
0x1224   :  { %v1334_v1 = vpop.permute.xlu0 %1333 }
0x1225   :  { %v1339_v2 = vmul.f32 %v3705_v13, %v1334_v1  ;;  %1345 = vrot.lane.b32.xlu1 %v1340_v63, %s3836_s27 }
0x1227   :  { %1343 = vrot.lane.b32.xlu0 %v1339_v2, %s3836_s27  ;;  %v3142_v2 = vsel %vm735_vm11, 1.0, %v3834_v3 }
0x1297   :  { %v1346_v6 = vpop.permute.xlu1 %1345 }
0x1298   :  { %v4230_v5 = vadd.f32 %v1346_v6, %v1330_v4  ;;  %v3143_v4 = vsel %vm736_vm12, 1.0, %v3834_v3  ;;  %v3585_v6 = vpack.i.bf16 %v3134_v61, %v3126_v14 }
0x1299   :  { %v1344_v7 = vpop.permute.xlu0 %1343 }
0x129a   :  { %3706 = vtanh.f32 %v4230_v5  ;;  %v4233_v18 = vadd.f32 %v1344_v7, %v1329_v17  ;;  %v3150_v17 = vsel %vm892_vm13, 1.0, %v3834_v3  ;;  %v3151_v7 = vsel %vm893_vm14, 1.0, %v3834_v3 }
0x129c   :  { %3708 = vtanh.f32 %v4233_v18 }
0x12a7   :  { %v3707_v9 = vpop.eup %3706 }
0x12a8   :  { %1357 = vrot.lane.b32.xlu1 %v3707_v9, %s3835_s4  ;;  %v3596_v9 = vpack.i.bf16 %v3143_v4, %v3142_v2 }
0x12a9   :  { %v3709_v19 = vpop.eup %3708 }
0x12aa   :  { %1355 = vrot.lane.b32.xlu0 %v3709_v19, %s3835_s4  ;;  %v3158_v19 = vsel %vm1049_vm15, 1.0, %v3834_v3 }
0x131a   :  { %v1358_v20 = vpop.permute.xlu1 %1357 }
0x131b   :  { %v4238_v11 = vmul.f32 %v3703_v57, %v1358_v20  ;;  %v3159_v20 = vsel %vm1050_vm0, 1.0, %v3834_v3 }
0x131c   :  { %v1356_v21 = vpop.permute.xlu0 %1355 }
0x131d   :  { %v4240_v22 = vmul.f32 %v3705_v13, %v1356_v21  ;;  %1387 = vrot.lane.b32.xlu1 %v4238_v11, %s3836_s27  ;;  %v3135_v13 = vsel %vm579_vm8, 1.0, %v3834_v3  ;;  %v3601_v21 = vpack.i.bf16 %v3151_v7, %v3150_v17  ;;  %vm1636_vm8 = vcmask 64512  }
0x131e   :  { %v3591_v1 = vpack.i.bf16 %v3135_v13, %v3127_v58 }
0x131f   :  { %1385 = vrot.lane.b32.xlu0 %v4240_v22, %s3836_s27 }
0x138f   :  { %v1388_v24 = vpop.permute.xlu1 %1387 }
0x1391   :  { %v1386_v23 = vpop.permute.xlu0 %1385 }
0x1392   :  { %3472 = vmatprep.mubr.msk.f32.mxu1 %vm290_vm2, %v1386_v23  ;;  %v3166_v23 = vsel %vm1206_vm1, 1.0, %v3834_v3 }
0x1393   :  { %3473 = vmatmul.mubr.msk.f32.vlgmr.msra.gmra.mxu1 %vm290_vm2, %v1388_v24  ;;  %v3167_v24 = vsel %vm1207_vm3, 1.0, %v3834_v3 }
0x1453   :  { %v3474_v27 = vpop.f32.mrf.mxu1 }
0x1454   :  { %v1469_v30 = vadd.f32 %v3474_v27, %v275_v25  ;;  %v3606_v25 = vpack.i.bf16 %v3159_v20, %v3158_v19  ;;  %v3174_v27 = vsel %vm1363_vm4, 1.0, %v3834_v3 }
0x1455   :  { %v1459_v31 = vpop.f32.mrf.mxu1 }
0x1456   :  { %v3179_v32 = vmul.f32 -1.442695, %v1469_v30  ;;  %v1468_v33 = vadd.f32 %v1459_v31, %v270_v29  ;;  %v3175_v29 = vsel %vm1364_vm5, 1.0, %v3834_v3  ;;  %v3611_v30 = vpack.i.bf16 %v3167_v24, %v3166_v23 }
0x1457   :  { %v3182_v31 = vsel %vm1520_vm6, 1.0, %v3834_v3 }
0x1458   :  { %3710 = vpow2.f32 %v3179_v32  ;;  %v3178_v34 = vmul.f32 -1.442695, %v1468_v33  ;;  %v3183_v32 = vsel %vm1521_vm7, 1.0, %v3834_v3  ;;  %v3616_v33 = vpack.i.bf16 %v3175_v29, %v3174_v27 }
0x145a   :  { %3712 = vpow2.f32 %v3178_v34  ;;  %v3621_v34 = vpack.i.bf16 %v3183_v32, %v3182_v31 }
0x1465   :  { %v3711_v35 = vpop.eup %3710 }
0x1466   :  { %v1477_v37 = vadd.f32 1.0, %v3711_v35 }
0x1467   :  { %v3713_v39 = vpop.eup %3712 }
0x1468   :  { %3714 = vrcp.f32 %v1477_v37  ;;  %v1476_v40 = vadd.f32 1.0, %v3713_v39 }
0x146a   :  { %3716 = vrcp.f32 %v1476_v40 }
0x1475   :  { %v4252_v15 = vpop.eup %3714 }
0x1476   :  { %v1483_v8 = vmul.f32 2.0, %v4252_v15  ;;  %v1487_v35 = vmul.f32 %v4252_v15, %v4230_v5  ;;  %v1542_v5 = vld [vmem:[%s4793_s5 + $0x10] sm:$0xff] }
0x1477   :  { %v4255_v16 = vpop.eup %3716 }
0x1478   :  { %v3181_v42 = vadd.f32 -1.0, %v1483_v8  ;;  %v1482_v45 = vmul.f32 2.0, %v4255_v16  ;;  %v1486_v40 = vmul.f32 %v4255_v16, %v4233_v18  ;;  %v1541_v18 = vld [vmem:[%s4793_s5 + $0x8] sm:$0xff] }
0x147a   :  { %1492 = vrot.lane.b32.xlu1 %v3181_v42, %s3835_s4  ;;  %v3180_v47 = vadd.f32 -1.0, %v1482_v45  ;;  %v1543_v45 = vld [vmem:[%s4793_s5 + $0x18] sm:$0xff] }
0x147b   :  { %3475 = vmatprep.subr.mxu0 %v1543_v45 }
0x147c   :  { %1490 = vrot.lane.b32.xlu0 %v3180_v47, %s3835_s4  ;;  %3476 = vmatpush3.msra.mxu0 %v1543_v45 }
0x147d   :  { %3477 = vmatprep.subr.mxu0 %v1542_v5 }
0x147e   :  { %3478 = vmatpush3.msra.mxu0 %v1542_v5 }
0x147f   :  { %3479 = vmatprep.subr.mxu0 %v1541_v18 }
0x1480   :  { %3480 = vmatpush3.msra.mxu0 %v1541_v18 }
0x14ec   :  { %v1493_v57 = vpop.permute.xlu1 %1492 }
0x14ed   :  { %v1497_v59 = vmul.f32 %v4252_v15, %v1493_v57 }
0x14ee   :  { %v1491_v0 = vpop.permute.xlu0 %1490 }
0x14ef   :  { %v1496_v63 = vmul.f32 %v4255_v16, %v1491_v0  ;;  %1502 = vrot.lane.b32.xlu1 %v1497_v59, %s3836_s27 }
0x14f1   :  { %1500 = vrot.lane.b32.xlu0 %v1496_v63, %s3836_s27 }
0x14f3   :  { %3592 = vperm.xlu1 %3590, %v3591_v1  }
0x14f5   :  { %3586 = vperm.xlu0 %3584, %v3585_v6  }
0x14f7   :  { %3597 = vperm.xlu1 %3590, %v3596_v9  }
0x14f9   :  { %3602 = vperm.xlu0 %3584, %v3601_v21  }
0x14fb   :  { %3607 = vperm.xlu1 %3590, %v3606_v25  }
0x14fd   :  { %3612 = vperm.xlu0 %3584, %v3611_v30  }
0x14ff   :  { %3617 = vperm.xlu1 %3590, %v3616_v33  }
0x1501   :  { %3622 = vperm.xlu0 %3584, %v3621_v34  }
0x1561   :  { %v1503_v37 = vpop.permute.xlu1 %1502 }
0x1562   :  { %v1507_v39 = vadd.f32 %v1503_v37, %v1487_v35 }
0x1563   :  { %v1501_v41 = vpop.permute.xlu0 %1500 }
0x1564   :  { %3718 = vtanh.f32 %v1507_v39  ;;  %v1506_v8 = vadd.f32 %v1501_v41, %v1486_v40 }
0x1566   :  { %3720 = vtanh.f32 %v1506_v8 }
0x156e   :  { %v3593_v49 = vpop.permute.xlu1 %3592 }
0x156f   :  { %v3595_v51 = vunpack.i.h.bf16 %v3593_v49  ;;  %v3594_v53 = vunpack.i.l.bf16 %v3593_v49  ;;  %v4334_v49 = vld [vmem:[%s4794_s9 + $0x18] sm:$0xff] }
0x1570   :  { %v3587_v50 = vpop.permute.xlu0 %3586 }
0x1571   :  { %v3719_v42 = vpop.eup %3718  ;;  %v3589_v55 = vunpack.i.h.bf16 %v3587_v50  ;;  %v3588_v43 = vunpack.i.l.bf16 %v3587_v50  ;;  %v595_v57 = vmul.f32 %v3595_v51, %v4038_v26  ;;  %v438_v13 = vmul.f32 %v3594_v53, %v4001_v46  ;;  %v1639_v50 = vld [vmem:[%s4795_s7] sm:$0xff]  ;;  %v4344_v51 = vld [vmem:[%s4794_s9 + $0x10] sm:$0xff] }
0x1572   :  { %1514 = vrot.lane.b32.xlu0 %v3719_v42, %s3835_s4  ;;  %v3598_v52 = vpop.permute.xlu1 %3597  ;;  %3486 = vmatprep.subr.mxu1 %v1639_v50  ;;  %v4359_v53 = vld [vmem:[%s4794_s9] sm:$0xff] }
0x1573   :  { %v3721_v47 = vpop.eup %3720  ;;  %v3600_v48 = vunpack.i.h.bf16 %v3598_v52  ;;  %v594_v59 = vmul.f32 %v3589_v55, %v4040_v28  ;;  %v437_v0 = vmul.f32 %v3588_v43, %v3997_v44  ;;  %v3599_v14 = vunpack.i.l.bf16 %v3598_v52  ;;  %v4350_v52 = vld [vmem:[%s4794_s9 + $0x8] sm:$0xff]  ;;  %3487 = vmatpush3.msra.mxu1 %v1639_v50 }
0x1574   :  { %1512 = vrot.lane.b32.xlu1 %v3721_v47, %s3835_s4  ;;  %v3603_v58 = vpop.permute.xlu0 %3602  ;;  %v597_v2 = vadd.f32 %v595_v57, %v438_v13  ;;  %3502 = vmatprep.subr.mxu1 %v4334_v49 }
0x1575   :  { %v752_v61 = vmul.f32 %v3600_v48, %v4080_v10  ;;  %v3605_v63 = vunpack.i.h.bf16 %v3603_v58  ;;  %v596_v4 = vadd.f32 %v594_v59, %v437_v0  ;;  %v751_v6 = vmul.f32 %v3599_v14, %v4082_v12  ;;  %v1540_v12 = vld [vmem:[%s4793_s5] sm:$0xff] }
0x1576   :  { %v3608_v1 = vpop.permute.xlu1 %3607  ;;  %v3604_v17 = vunpack.i.l.bf16 %v3603_v58  ;;  %3481 = vmatprep.subr.mxu0 %v1540_v12  ;;  %v4393_v58 = vld [vmem:[%s4798_s8] ss:$0 sm:$0xff] }
0x1577   :  { %v754_v7 = vadd.f32 %v752_v61, %v597_v2  ;;  %v909_v26 = vmul.f32 %v3605_v63, %v4146_v60  ;;  %v3610_v9 = vunpack.i.h.bf16 %v3608_v1  ;;  %v753_v46 = vadd.f32 %v751_v6, %v596_v4  ;;  %3482 = vmatpush3.msra.mxu0 %v1540_v12  ;;  %v3187_v59 = vld [vmem:[%s4799_s10] ss:$0 sm:$0xff] }
0x1578   :  { %v3613_v19 = vpop.permute.xlu0 %3612  ;;  %v908_v28 = vmul.f32 %v3604_v17, %v4148_v62  ;;  %v3609_v20 = vunpack.i.l.bf16 %v3608_v1  ;;  %3491 = vmatprep.subr.mxu0 %v4334_v49 }
0x1579   :  { %v911_v44 = vadd.f32 %v909_v26, %v754_v7  ;;  %v1066_v21 = vmul.f32 %v3610_v9, %v4185_v54  ;;  %v3615_v10 = vunpack.i.h.bf16 %v3613_v19  ;;  %v3614_v27 = vunpack.i.l.bf16 %v3613_v19 }
0x157a   :  { %v3618_v23 = vpop.permute.xlu1 %3617  ;;  %v910_v24 = vadd.f32 %v908_v28, %v753_v46  ;;  %v1065_v25 = vmul.f32 %v3609_v20, %v4187_v56 }
0x157b   :  { %v1068_v60 = vadd.f32 %v1066_v21, %v911_v44  ;;  %v1223_v29 = vmul.f32 %v3615_v10, %v4212_v36  ;;  %v3620_v30 = vunpack.i.h.bf16 %v3618_v23  ;;  %v1222_v54 = vmul.f32 %v3614_v27, %v4214_v38 }
0x157c   :  { %v3623_v62 = vpop.permute.xlu0 %3622  ;;  %v1067_v31 = vadd.f32 %v1065_v25, %v910_v24  ;;  %v3619_v32 = vunpack.i.l.bf16 %v3618_v23 }
0x157d   :  { %v1225_v33 = vadd.f32 %v1223_v29, %v1068_v60  ;;  %v1380_v34 = vmul.f32 %v3620_v30, %v4238_v11  ;;  %v3625_v39 = vunpack.i.h.bf16 %v3623_v62  ;;  %v3624_v8 = vunpack.i.l.bf16 %v3623_v62  ;;  %v3818_v11 = vld [vmem:[%s4790_s1 + $0x8] sm:$0xff] }
0x157e   :  { %v1224_v35 = vadd.f32 %v1222_v54, %v1067_v31  ;;  %v1379_v37 = vmul.f32 %v3619_v32, %v4240_v22  ;;  %v3819_v22 = vld [vmem:[%s4790_s1] sm:$0xff] }
0x157f   :  { %v1382_v45 = vadd.f32 %v1380_v34, %v1225_v33 }
0x1580   :  { %v1381_v38 = vadd.f32 %v1379_v37, %v1224_v35 }
0x15e4   :  { %v1515_v56 = vpop.permute.xlu0 %1514 }
0x15e5   :  { %v1519_v40 = vmul.f32 %v4252_v15, %v1515_v56 }
0x15e6   :  { %v1513_v41 = vpop.permute.xlu1 %1512 }
0x15e7   :  { %v1537_v36 = vmul.f32 %v3625_v39, %v1519_v40  ;;  %v1518_v42 = vmul.f32 %v4255_v16, %v1513_v41 }
0x15e9   :  { %v1536_v5 = vmul.f32 %v3624_v8, %v1518_v42  ;;  %v1539_v47 = vadd.f32 %v1537_v36, %v1382_v45  ;;  %v3820_v42 = vld [vmem:[%s4790_s1 + $0x18] sm:$0xff]  ;;  %v3821_v45 = vld [vmem:[%s4790_s1 + $0x10] sm:$0xff] }
0x15eb   :  { %1555 = vrot.lane.b32.xlu0 %v1539_v47, %s3836_s27  ;;  %v1538_v18 = vadd.f32 %v1536_v5, %v1381_v38 }
0x15ed   :  { %1553 = vrot.lane.b32.xlu1 %v1538_v18, %s3836_s27 }
0x15ef   :  { %1734 = vperm.xlu0 %3584, %v3818_v11  }
0x15f1   :  { %1730 = vperm.xlu1 %3590, %v3819_v22  }
0x165d   :  { %v1556_v16 = vpop.permute.xlu0 %1555 }
0x165f   :  { %v1554_v15 = vpop.permute.xlu1 %1553 }
0x1660   :  { %3483 = vmatprep.mubr.msk.f32.mxu0 %vm290_vm2, %v1554_v15 }
0x1661   :  { %3484 = vmatmul.mubr.msk.f32.vlgmr.msra.gmra.mxu0 %vm290_vm2, %v1556_v16 }
0x1662   :  { %3499 = vmatprep.mubr.f32.mxu0 %v3834_v3  ;;  %3492 = vmatpush3.msra.mxu0 %v4334_v49 }
0x1663   :  { %3493 = vmatprep.subr.mxu0 %v4344_v51 }
0x1664   :  { %3494 = vmatpush3.msra.mxu0 %v4344_v51 }
0x1665   :  { %3495 = vmatprep.subr.mxu0 %v4350_v52 }
0x1666   :  { %3496 = vmatpush3.msra.mxu0 %v4350_v52 }
0x1667   :  { %3497 = vmatprep.subr.mxu0 %v4359_v53 }
0x1668   :  { %3498 = vmatpush3.msra.mxu0 %v4359_v53 }
0x1669   :  { %3500 = vmatmul.mubr.f32.vlgmr.msra.gmra.mxu0 %v3834_v3  ;;  %3513 = vmatprep.subr.mxu0 %v4334_v49  ;;  %v3184_v3 = vld [vmem:[%s4796_s6] ss:$0 sm:$0xff] }
0x166a   :  { %3514 = vmatpush3.msra.mxu0 %v4334_v49  ;;  %v1735_v13 = vpop.permute.xlu0 %1734 }
0x166b   :  { %3515 = vmatprep.subr.mxu0 %v4344_v51  ;;  %v1800_v61 = vmul.f32 %v4393_v58, %v1735_v13 }
0x166c   :  { %3516 = vmatpush3.msra.mxu0 %v4344_v51  ;;  %v1731_v0 = vpop.permute.xlu1 %1730 }
0x166d   :  { %3517 = vmatprep.subr.mxu0 %v4350_v52  ;;  %v1799_v4 = vmul.f32 %v4393_v58, %v1731_v0 }
0x166e   :  { %3518 = vmatpush3.msra.mxu0 %v4350_v52 }
0x166f   :  { %3519 = vmatprep.subr.mxu0 %v4359_v53 }
0x1670   :  { %3520 = vmatpush3.msra.mxu0 %v4359_v53 }
0x1671   :  { %3535 = vmatprep.subr.mxu0 %v4334_v49 }
0x1721   :  { %v3485_v55 = vpop.f32.mrf.mxu0 }
0x1722   :  { %v1633_v43 = vadd.f32 %v3485_v55, %v3184_v3 }
0x1723   :  { %v1627_v48 = vpop.f32.mrf.mxu0 }
0x1724   :  { %v1628_v57 = vadd.f32 %v3184_v3, %v1627_v48  ;;  %1638 = vst.msk [vmem:[%s4797_s14 + $0x8] sm:$0xff] %vm1636_vm8, %v1633_v43 }
0x1726   :  { %1637 = vst.msk [vmem:[%s4797_s14] sm:$0xff] %vm1636_vm8, %v1628_v57  ;;  %3488 = vmatprep.mubr.msk.f32.mxu1 %vm1636_vm8, %v1628_v57 }
0x1727   :  { %3489 = vmatmul.mubr.msk.f32.vlgmr.msra.gmra.mxu1 %vm1636_vm8, %v1633_v43 }
0x1728   :  { %3503 = vmatpush3.msra.mxu1 %v4334_v49 }
0x1729   :  { %3504 = vmatprep.subr.mxu1 %v4344_v51  ;;  %v3501_v2 = vpop.f32.mrf.mxu0 }
0x172a   :  { %3505 = vmatpush3.msra.mxu1 %v4344_v51 }
0x172b   :  { %3506 = vmatprep.subr.mxu1 %v4350_v52  ;;  %v1897_v9 = vpop.f32.mrf.mxu0 }
0x172c   :  { %3507 = vmatpush3.msra.mxu1 %v4350_v52 }
0x172d   :  { %3508 = vmatprep.subr.mxu1 %v4359_v53 }
0x172e   :  { %3509 = vmatpush3.msra.mxu1 %v4359_v53 }
0x172f   :  { %3524 = vmatprep.subr.mxu1 %v4334_v49 }
0x17e7   :  { %v3490_v14 = vpop.f32.mrf.mxu1 }
0x17e8   :  { %v4399_v63 = vadd.f32 %v3490_v14, %v3187_v59 }
0x17e9   :  { %v1719_v1 = vpop.f32.mrf.mxu1 }
0x17ea   :  { %v4402_v6 = vadd.f32 %v3187_v59, %v1719_v1  ;;  %v1816_v17 = vadd.f32 %v1800_v61, %v4399_v63 }
0x17ec   :  { %v1907_v7 = vadd.f32 %v3501_v2, %v1816_v17  ;;  %v1815_v26 = vadd.f32 %v1799_v4, %v4402_v6 }
0x17ee   :  { %v3192_v19 = vmul.f32 -1.442695, %v1907_v7  ;;  %v1906_v46 = vadd.f32 %v1897_v9, %v1815_v26 }
0x17f0   :  { %3722 = vpow2.f32 %v3192_v19  ;;  %v3191_v28 = vmul.f32 -1.442695, %v1906_v46 }
0x17f2   :  { %3724 = vpow2.f32 %v3191_v28 }
0x17fd   :  { %v3723_v20 = vpop.eup %3722 }
0x17fe   :  { %v1915_v44 = vadd.f32 1.0, %v3723_v20 }
0x17ff   :  { %v3725_v21 = vpop.eup %3724 }
0x1800   :  { %3726 = vrcp.f32 %v1915_v44  ;;  %v1914_v10 = vadd.f32 1.0, %v3725_v21 }
0x1802   :  { %3728 = vrcp.f32 %v1914_v10 }
0x180d   :  { %v3727_v23 = vpop.eup %3726 }
0x180e   :  { %v1921_v24 = vmul.f32 2.0, %v3727_v23  ;;  %v1925_v54 = vmul.f32 0.0, %v3727_v23 }
0x180f   :  { %v3729_v25 = vpop.eup %3728 }
0x1810   :  { %v3194_v27 = vadd.f32 -1.0, %v1921_v24  ;;  %v1920_v12 = vmul.f32 2.0, %v3729_v25  ;;  %v1924_v34 = vmul.f32 0.0, %v3729_v25 }
0x1812   :  { %1930 = vrot.lane.b32.xlu0 %v3194_v27, %s3835_s4  ;;  %v3193_v60 = vadd.f32 -1.0, %v1920_v12 }
0x1814   :  { %1928 = vrot.lane.b32.xlu1 %v3193_v60, %s3835_s4 }
0x1884   :  { %v1931_v29 = vpop.permute.xlu0 %1930 }
0x1885   :  { %v1935_v30 = vmul.f32 %v3727_v23, %v1931_v29 }
0x1886   :  { %v1929_v62 = vpop.permute.xlu1 %1928 }
0x1887   :  { %v1934_v31 = vmul.f32 %v3729_v25, %v1929_v62  ;;  %1940 = vrot.lane.b32.xlu0 %v1935_v30, %s3836_s27  ;;  %v3822_v30 = vld [vmem:[%s4790_s1 + $0x28] sm:$0xff]  ;;  %v3823_v62 = vld [vmem:[%s4790_s1 + $0x20] sm:$0xff] }
0x1889   :  { %1938 = vrot.lane.b32.xlu1 %v1934_v31, %s3836_s27 }
0x18f9   :  { %v1941_v32 = vpop.permute.xlu0 %1940 }
0x18fa   :  { %v4410_v33 = vadd.f32 %v1941_v32, %v1925_v54 }
0x18fb   :  { %v1939_v56 = vpop.permute.xlu1 %1938 }
0x18fc   :  { %3730 = vtanh.f32 %v4410_v33  ;;  %v4413_v35 = vadd.f32 %v1939_v56, %v1924_v34 }
0x18fe   :  { %3732 = vtanh.f32 %v4413_v35 }
0x1909   :  { %v3731_v37 = vpop.eup %3730 }
0x190a   :  { %1952 = vrot.lane.b32.xlu0 %v3731_v37, %s3835_s4 }
0x190b   :  { %v3733_v39 = vpop.eup %3732 }
0x190c   :  { %1950 = vrot.lane.b32.xlu1 %v3733_v39, %s3835_s4 }
0x197c   :  { %v1953_v40 = vpop.permute.xlu0 %1952 }
0x197d   :  { %v4418_v41 = vmul.f32 %v3727_v23, %v1953_v40 }
0x197e   :  { %v1951_v8 = vpop.permute.xlu1 %1950 }
0x197f   :  { %v4420_v36 = vmul.f32 %v3729_v25, %v1951_v8  ;;  %1962 = vrot.lane.b32.xlu0 %v4418_v41, %s3836_s27 }
0x1981   :  { %1960 = vrot.lane.b32.xlu1 %v4420_v36, %s3836_s27 }
0x1983   :  { %1742 = vperm.xlu0 %3584, %v3820_v42  }
0x1985   :  { %1738 = vperm.xlu1 %3590, %v3821_v45  }
0x19f1   :  { %v1963_v47 = vpop.permute.xlu0 %1962 }
0x19f3   :  { %v1961_v5 = vpop.permute.xlu1 %1960 }
0x19f4   :  { %3510 = vmatprep.mubr.msk.f32.mxu1 %vm290_vm2, %v1961_v5 }
0x19f5   :  { %3511 = vmatmul.mubr.msk.f32.vlgmr.msra.gmra.mxu1 %vm290_vm2, %v1963_v47 }
0x19f6   :  { %3525 = vmatpush3.msra.mxu1 %v4334_v49 }
0x19f7   :  { %3526 = vmatprep.subr.mxu1 %v4344_v51 }
0x19f8   :  { %3527 = vmatpush3.msra.mxu1 %v4344_v51 }
0x19f9   :  { %3528 = vmatprep.subr.mxu1 %v4350_v52 }
0x19fa   :  { %3529 = vmatpush3.msra.mxu1 %v4350_v52 }
0x19fb   :  { %3530 = vmatprep.subr.mxu1 %v4359_v53 }
0x19fc   :  { %3531 = vmatpush3.msra.mxu1 %v4359_v53 }
0x19fd   :  { %3546 = vmatprep.subr.mxu1 %v4334_v49 }
0x19fe   :  { %v1743_v38 = vpop.permute.xlu0 %1742 }
0x19ff   :  { %v1802_v11 = vmul.f32 %v4393_v58, %v1743_v38 }
0x1a00   :  { %v1739_v18 = vpop.permute.xlu1 %1738 }
0x1a01   :  { %v1801_v22 = vmul.f32 %v4393_v58, %v1739_v18  ;;  %v1818_v15 = vadd.f32 %v1802_v11, %v4399_v63 }
0x1a03   :  { %v1817_v3 = vadd.f32 %v1801_v22, %v4402_v6 }
0x1ab5   :  { %v3512_v16 = vpop.f32.mrf.mxu1 }
0x1ab6   :  { %v2044_v50 = vadd.f32 %v3512_v16, %v1818_v15 }
0x1ab7   :  { %v2034_v55 = vpop.f32.mrf.mxu1 }
0x1ab8   :  { %v3198_v43 = vmul.f32 -1.442695, %v2044_v50  ;;  %v2043_v48 = vadd.f32 %v2034_v55, %v1817_v3 }
0x1aba   :  { %3734 = vpow2.f32 %v3198_v43  ;;  %v3197_v57 = vmul.f32 -1.442695, %v2043_v48 }
0x1abc   :  { %3736 = vpow2.f32 %v3197_v57 }
0x1ac7   :  { %v3735_v13 = vpop.eup %3734 }
0x1ac8   :  { %v2052_v59 = vadd.f32 1.0, %v3735_v13 }
0x1ac9   :  { %v3737_v0 = vpop.eup %3736 }
0x1aca   :  { %3738 = vrcp.f32 %v2052_v59  ;;  %v2051_v14 = vadd.f32 1.0, %v3737_v0 }
0x1acc   :  { %3740 = vrcp.f32 %v2051_v14 }
0x1ad7   :  { %v3739_v61 = vpop.eup %3738 }
0x1ad8   :  { %v2058_v1 = vmul.f32 2.0, %v3739_v61  ;;  %v2062_v28 = vmul.f32 %v3739_v61, %v4410_v33 }
0x1ad9   :  { %v3741_v2 = vpop.eup %3740 }
0x1ada   :  { %v3200_v4 = vadd.f32 -1.0, %v2058_v1  ;;  %v2057_v17 = vmul.f32 2.0, %v3741_v2  ;;  %v2061_v21 = vmul.f32 %v3741_v2, %v4413_v35 }
0x1adc   :  { %2067 = vrot.lane.b32.xlu0 %v3200_v4, %s3835_s4  ;;  %v3199_v7 = vadd.f32 -1.0, %v2057_v17 }
0x1ade   :  { %2065 = vrot.lane.b32.xlu1 %v3199_v7, %s3835_s4 }
0x1b4e   :  { %v2068_v26 = vpop.permute.xlu0 %2067 }
0x1b4f   :  { %v2072_v9 = vmul.f32 %v3739_v61, %v2068_v26 }
0x1b50   :  { %v2066_v19 = vpop.permute.xlu1 %2065 }
0x1b51   :  { %v2071_v46 = vmul.f32 %v3741_v2, %v2066_v19  ;;  %2077 = vrot.lane.b32.xlu0 %v2072_v9, %s3836_s27 }
0x1b53   :  { %2075 = vrot.lane.b32.xlu1 %v2071_v46, %s3836_s27  ;;  %v3824_v46 = vld [vmem:[%s4790_s1 + $0x38] sm:$0xff] }
0x1bc3   :  { %v2078_v20 = vpop.permute.xlu0 %2077 }
0x1bc4   :  { %v4451_v44 = vadd.f32 %v2078_v20, %v2062_v28  ;;  %v3825_v28 = vld [vmem:[%s4790_s1 + $0x30] sm:$0xff] }
0x1bc5   :  { %v2076_v10 = vpop.permute.xlu1 %2075 }
0x1bc6   :  { %3742 = vtanh.f32 %v4451_v44  ;;  %v4455_v23 = vadd.f32 %v2076_v10, %v2061_v21 }
0x1bc8   :  { %3744 = vtanh.f32 %v4455_v23 }
0x1bd3   :  { %v3743_v24 = vpop.eup %3742 }
0x1bd4   :  { %2089 = vrot.lane.b32.xlu0 %v3743_v24, %s3835_s4 }
0x1bd5   :  { %v3745_v25 = vpop.eup %3744 }
0x1bd6   :  { %2087 = vrot.lane.b32.xlu1 %v3745_v25, %s3835_s4 }
0x1c46   :  { %v2090_v27 = vpop.permute.xlu0 %2089 }
0x1c47   :  { %v4460_v12 = vmul.f32 %v3739_v61, %v2090_v27 }
0x1c48   :  { %v2088_v60 = vpop.permute.xlu1 %2087 }
0x1c49   :  { %v4462_v29 = vmul.f32 %v3741_v2, %v2088_v60  ;;  %2099 = vrot.lane.b32.xlu0 %v4460_v12, %s3836_s27 }
0x1c4b   :  { %2097 = vrot.lane.b32.xlu1 %v4462_v29, %s3836_s27 }
0x1c4d   :  { %1750 = vperm.xlu0 %3584, %v3822_v30  }
0x1c4f   :  { %1746 = vperm.xlu1 %3590, %v3823_v62  }
0x1cbb   :  { %v2100_v54 = vpop.permute.xlu0 %2099 }
0x1cbd   :  { %v2098_v31 = vpop.permute.xlu1 %2097 }
0x1cbe   :  { %3521 = vmatprep.mubr.msk.f32.mxu0 %vm290_vm2, %v2098_v31 }
0x1cbf   :  { %3522 = vmatmul.mubr.msk.f32.vlgmr.msra.gmra.mxu0 %vm290_vm2, %v2100_v54 }
0x1cc0   :  { %3536 = vmatpush3.msra.mxu0 %v4334_v49 }
0x1cc1   :  { %3537 = vmatprep.subr.mxu0 %v4344_v51 }
0x1cc2   :  { %3538 = vmatpush3.msra.mxu0 %v4344_v51 }
0x1cc3   :  { %3539 = vmatprep.subr.mxu0 %v4350_v52 }
0x1cc4   :  { %3540 = vmatpush3.msra.mxu0 %v4350_v52 }
0x1cc5   :  { %3541 = vmatprep.subr.mxu0 %v4359_v53 }
0x1cc6   :  { %3542 = vmatpush3.msra.mxu0 %v4359_v53 }
0x1cc7   :  { %3557 = vmatprep.subr.mxu0 %v4334_v49 }
0x1cc8   :  { %v1751_v32 = vpop.permute.xlu0 %1750 }
0x1cc9   :  { %v1804_v34 = vmul.f32 %v4393_v58, %v1751_v32 }
0x1cca   :  { %v1747_v33 = vpop.permute.xlu1 %1746 }
0x1ccb   :  { %v1803_v56 = vmul.f32 %v4393_v58, %v1747_v33  ;;  %v1820_v35 = vadd.f32 %v1804_v34, %v4399_v63 }
0x1ccd   :  { %v1819_v40 = vadd.f32 %v1803_v56, %v4402_v6 }
0x1d7f   :  { %v3523_v37 = vpop.f32.mrf.mxu0 }
0x1d80   :  { %v2181_v39 = vadd.f32 %v3523_v37, %v1820_v35 }
0x1d81   :  { %v2171_v8 = vpop.f32.mrf.mxu0 }
0x1d82   :  { %v3204_v42 = vmul.f32 -1.442695, %v2181_v39  ;;  %v2180_v45 = vadd.f32 %v2171_v8, %v1819_v40 }
0x1d84   :  { %3746 = vpow2.f32 %v3204_v42  ;;  %v3203_v5 = vmul.f32 -1.442695, %v2180_v45 }
0x1d86   :  { %3748 = vpow2.f32 %v3203_v5 }
0x1d91   :  { %v3747_v47 = vpop.eup %3746 }
0x1d92   :  { %v2189_v38 = vadd.f32 1.0, %v3747_v47 }
0x1d93   :  { %v3749_v18 = vpop.eup %3748 }
0x1d94   :  { %3750 = vrcp.f32 %v2189_v38  ;;  %v2188_v11 = vadd.f32 1.0, %v3749_v18 }
0x1d96   :  { %3752 = vrcp.f32 %v2188_v11 }
0x1da1   :  { %v3751_v22 = vpop.eup %3750 }
0x1da2   :  { %v2195_v15 = vmul.f32 2.0, %v3751_v22  ;;  %v2199_v59 = vmul.f32 %v3751_v22, %v4451_v44 }
0x1da3   :  { %v3753_v16 = vpop.eup %3752 }
0x1da4   :  { %v3206_v50 = vadd.f32 -1.0, %v2195_v15  ;;  %v2194_v3 = vmul.f32 2.0, %v3753_v16  ;;  %v2198_v61 = vmul.f32 %v3753_v16, %v4455_v23 }
0x1da6   :  { %2204 = vrot.lane.b32.xlu0 %v3206_v50, %s3835_s4  ;;  %v3205_v55 = vadd.f32 -1.0, %v2194_v3 }
0x1da8   :  { %2202 = vrot.lane.b32.xlu1 %v3205_v55, %s3835_s4 }
0x1e18   :  { %v2205_v43 = vpop.permute.xlu0 %2204 }
0x1e19   :  { %v2209_v48 = vmul.f32 %v3751_v22, %v2205_v43 }
0x1e1a   :  { %v2203_v57 = vpop.permute.xlu1 %2202 }
0x1e1b   :  { %v2208_v13 = vmul.f32 %v3753_v16, %v2203_v57  ;;  %2214 = vrot.lane.b32.xlu0 %v2209_v48, %s3836_s27 }
0x1e1d   :  { %2212 = vrot.lane.b32.xlu1 %v2208_v13, %s3836_s27 }
0x1e8d   :  { %v2215_v0 = vpop.permute.xlu0 %2214 }
0x1e8e   :  { %v4493_v14 = vadd.f32 %v2215_v0, %v2199_v59  ;;  %v3826_v0 = vld [vmem:[%s4790_s1 + $0x48] sm:$0xff] }
0x1e8f   :  { %v2213_v1 = vpop.permute.xlu1 %2212 }
0x1e90   :  { %3754 = vtanh.f32 %v4493_v14  ;;  %v4497_v2 = vadd.f32 %v2213_v1, %v2198_v61 }
0x1e92   :  { %3756 = vtanh.f32 %v4497_v2 }
0x1e9d   :  { %v3755_v4 = vpop.eup %3754 }
0x1e9e   :  { %2226 = vrot.lane.b32.xlu0 %v3755_v4, %s3835_s4 }
0x1e9f   :  { %v3757_v17 = vpop.eup %3756 }
0x1ea0   :  { %2224 = vrot.lane.b32.xlu1 %v3757_v17, %s3835_s4 }
0x1f10   :  { %v2227_v7 = vpop.permute.xlu0 %2226 }
0x1f11   :  { %v4502_v26 = vmul.f32 %v3751_v22, %v2227_v7 }
0x1f12   :  { %v2225_v9 = vpop.permute.xlu1 %2224 }
0x1f13   :  { %v4504_v19 = vmul.f32 %v3753_v16, %v2225_v9  ;;  %2236 = vrot.lane.b32.xlu0 %v4502_v26, %s3836_s27 }
0x1f15   :  { %2234 = vrot.lane.b32.xlu1 %v4504_v19, %s3836_s27 }
0x1f17   :  { %1758 = vperm.xlu0 %3584, %v3824_v46  }
0x1f19   :  { %1754 = vperm.xlu1 %3590, %v3825_v28  }
0x1f85   :  { %v2237_v44 = vpop.permute.xlu0 %2236 }
0x1f87   :  { %v2235_v20 = vpop.permute.xlu1 %2234 }
0x1f88   :  { %3532 = vmatprep.mubr.msk.f32.mxu1 %vm290_vm2, %v2235_v20 }
0x1f89   :  { %3533 = vmatmul.mubr.msk.f32.vlgmr.msra.gmra.mxu1 %vm290_vm2, %v2237_v44 }
0x1f8a   :  { %3547 = vmatpush3.msra.mxu1 %v4334_v49 }
0x1f8b   :  { %3548 = vmatprep.subr.mxu1 %v4344_v51 }
0x1f8c   :  { %3549 = vmatpush3.msra.mxu1 %v4344_v51 }
0x1f8d   :  { %3550 = vmatprep.subr.mxu1 %v4350_v52 }
0x1f8e   :  { %3551 = vmatpush3.msra.mxu1 %v4350_v52 }
0x1f8f   :  { %3552 = vmatprep.subr.mxu1 %v4359_v53 }
0x1f90   :  { %3553 = vmatpush3.msra.mxu1 %v4359_v53 }
0x1f91   :  { %3568 = vmatprep.subr.mxu1 %v4334_v49 }
0x1f92   :  { %v1759_v21 = vpop.permute.xlu0 %1758 }
0x1f93   :  { %v1806_v23 = vmul.f32 %v4393_v58, %v1759_v21 }
0x1f94   :  { %v1755_v10 = vpop.permute.xlu1 %1754 }
0x1f95   :  { %v1805_v24 = vmul.f32 %v4393_v58, %v1755_v10  ;;  %v1822_v25 = vadd.f32 %v1806_v23, %v4399_v63 }
0x1f97   :  { %v1821_v30 = vadd.f32 %v1805_v24, %v4402_v6 }
0x2049   :  { %v3534_v27 = vpop.f32.mrf.mxu1 }
0x204a   :  { %v2318_v60 = vadd.f32 %v3534_v27, %v1822_v25 }
0x204b   :  { %v2308_v62 = vpop.f32.mrf.mxu1 }
0x204c   :  { %v3210_v31 = vmul.f32 -1.442695, %v2318_v60  ;;  %v2317_v54 = vadd.f32 %v2308_v62, %v1821_v30 }
0x204e   :  { %3758 = vpow2.f32 %v3210_v31  ;;  %v3209_v32 = vmul.f32 -1.442695, %v2317_v54 }
0x2050   :  { %3760 = vpow2.f32 %v3209_v32 }
0x205b   :  { %v3759_v33 = vpop.eup %3758 }
0x205c   :  { %v2326_v34 = vadd.f32 1.0, %v3759_v33 }
0x205d   :  { %v3761_v56 = vpop.eup %3760 }
0x205e   :  { %3762 = vrcp.f32 %v2326_v34  ;;  %v2325_v35 = vadd.f32 1.0, %v3761_v56 }
0x2060   :  { %3764 = vrcp.f32 %v2325_v35 }
0x206b   :  { %v3763_v37 = vpop.eup %3762 }
0x206c   :  { %v2332_v39 = vmul.f32 2.0, %v3763_v37  ;;  %v2336_v11 = vmul.f32 %v3763_v37, %v4493_v14  ;;  %v3827_v14 = vld [vmem:[%s4790_s1 + $0x40] sm:$0xff] }
0x206d   :  { %v3765_v40 = vpop.eup %3764 }
0x206e   :  { %v3212_v8 = vadd.f32 -1.0, %v2332_v39  ;;  %v2331_v42 = vmul.f32 2.0, %v3765_v40  ;;  %v2335_v16 = vmul.f32 %v3765_v40, %v4497_v2 }
0x2070   :  { %2341 = vrot.lane.b32.xlu0 %v3212_v8, %s3835_s4  ;;  %v3211_v45 = vadd.f32 -1.0, %v2331_v42 }
0x2072   :  { %2339 = vrot.lane.b32.xlu1 %v3211_v45, %s3835_s4 }
0x20e2   :  { %v2342_v5 = vpop.permute.xlu0 %2341 }
0x20e3   :  { %v2346_v47 = vmul.f32 %v3763_v37, %v2342_v5 }
0x20e4   :  { %v2340_v38 = vpop.permute.xlu1 %2339 }
0x20e5   :  { %v2345_v18 = vmul.f32 %v3765_v40, %v2340_v38  ;;  %2351 = vrot.lane.b32.xlu0 %v2346_v47, %s3836_s27 }
0x20e7   :  { %2349 = vrot.lane.b32.xlu1 %v2345_v18, %s3836_s27 }
0x2157   :  { %v2352_v22 = vpop.permute.xlu0 %2351 }
0x2158   :  { %v4535_v15 = vadd.f32 %v2352_v22, %v2336_v11 }
0x2159   :  { %v2350_v50 = vpop.permute.xlu1 %2349 }
0x215a   :  { %3766 = vtanh.f32 %v4535_v15  ;;  %v4539_v3 = vadd.f32 %v2350_v50, %v2335_v16  ;;  %v3828_v16 = vld [vmem:[%s4790_s1 + $0x58] sm:$0xff]  ;;  %v3829_v50 = vld [vmem:[%s4790_s1 + $0x50] sm:$0xff] }
0x215c   :  { %3768 = vtanh.f32 %v4539_v3 }
0x2167   :  { %v3767_v55 = vpop.eup %3766 }
0x2168   :  { %2363 = vrot.lane.b32.xlu0 %v3767_v55, %s3835_s4 }
0x2169   :  { %v3769_v43 = vpop.eup %3768 }
0x216a   :  { %2361 = vrot.lane.b32.xlu1 %v3769_v43, %s3835_s4 }
0x21da   :  { %v2364_v48 = vpop.permute.xlu0 %2363 }
0x21db   :  { %v4544_v57 = vmul.f32 %v3763_v37, %v2364_v48 }
0x21dc   :  { %v2362_v13 = vpop.permute.xlu1 %2361 }
0x21dd   :  { %v4546_v59 = vmul.f32 %v3765_v40, %v2362_v13  ;;  %2373 = vrot.lane.b32.xlu0 %v4544_v57, %s3836_s27 }
0x21df   :  { %2371 = vrot.lane.b32.xlu1 %v4546_v59, %s3836_s27 }
0x21e1   :  { %1766 = vperm.xlu0 %3584, %v3826_v0  }
0x21e3   :  { %1762 = vperm.xlu1 %3590, %v3827_v14  }
0x224f   :  { %v2374_v1 = vpop.permute.xlu0 %2373 }
0x2251   :  { %v2372_v61 = vpop.permute.xlu1 %2371 }
0x2252   :  { %3543 = vmatprep.mubr.msk.f32.mxu0 %vm290_vm2, %v2372_v61 }
0x2253   :  { %3544 = vmatmul.mubr.msk.f32.vlgmr.msra.gmra.mxu0 %vm290_vm2, %v2374_v1 }
0x2254   :  { %3558 = vmatpush3.msra.mxu0 %v4334_v49 }
0x2255   :  { %3559 = vmatprep.subr.mxu0 %v4344_v51 }
0x2256   :  { %3560 = vmatpush3.msra.mxu0 %v4344_v51 }
0x2257   :  { %3561 = vmatprep.subr.mxu0 %v4350_v52 }
0x2258   :  { %3562 = vmatpush3.msra.mxu0 %v4350_v52 }
0x2259   :  { %3563 = vmatprep.subr.mxu0 %v4359_v53 }
0x225a   :  { %3564 = vmatpush3.msra.mxu0 %v4359_v53 }
0x225c   :  { %v1767_v2 = vpop.permute.xlu0 %1766 }
0x225d   :  { %v1808_v17 = vmul.f32 %v4393_v58, %v1767_v2 }
0x225e   :  { %v1763_v4 = vpop.permute.xlu1 %1762 }
0x225f   :  { %v1807_v7 = vmul.f32 %v4393_v58, %v1763_v4  ;;  %v1824_v9 = vadd.f32 %v1808_v17, %v4399_v63 }
0x2261   :  { %v1823_v20 = vadd.f32 %v1807_v7, %v4402_v6 }
0x2313   :  { %v3545_v46 = vpop.f32.mrf.mxu0 }
0x2314   :  { %v2455_v28 = vadd.f32 %v3545_v46, %v1824_v9 }
0x2315   :  { %v2445_v44 = vpop.f32.mrf.mxu0 }
0x2316   :  { %v3216_v21 = vmul.f32 -1.442695, %v2455_v28  ;;  %v2454_v10 = vadd.f32 %v2445_v44, %v1823_v20 }
0x2318   :  { %3770 = vpow2.f32 %v3216_v21  ;;  %v3215_v23 = vmul.f32 -1.442695, %v2454_v10 }
0x231a   :  { %3772 = vpow2.f32 %v3215_v23 }
0x2325   :  { %v3771_v24 = vpop.eup %3770 }
0x2326   :  { %v2463_v25 = vadd.f32 1.0, %v3771_v24 }
0x2327   :  { %v3773_v27 = vpop.eup %3772 }
0x2328   :  { %3774 = vrcp.f32 %v2463_v25  ;;  %v2462_v60 = vadd.f32 1.0, %v3773_v27 }
0x232a   :  { %3776 = vrcp.f32 %v2462_v60 }
0x2335   :  { %v3775_v30 = vpop.eup %3774 }
0x2336   :  { %v2469_v62 = vmul.f32 2.0, %v3775_v30  ;;  %v2473_v39 = vmul.f32 %v3775_v30, %v4535_v15 }
0x2337   :  { %v3777_v31 = vpop.eup %3776 }
0x2338   :  { %v3218_v54 = vadd.f32 -1.0, %v2469_v62  ;;  %v2468_v32 = vmul.f32 2.0, %v3777_v31  ;;  %v2472_v42 = vmul.f32 %v3777_v31, %v4539_v3 }
0x233a   :  { %2478 = vrot.lane.b32.xlu0 %v3218_v54, %s3835_s4  ;;  %v3217_v33 = vadd.f32 -1.0, %v2468_v32 }
0x233c   :  { %2476 = vrot.lane.b32.xlu1 %v3217_v33, %s3835_s4 }
0x23ac   :  { %v2479_v34 = vpop.permute.xlu0 %2478 }
0x23ad   :  { %v2483_v56 = vmul.f32 %v3775_v30, %v2479_v34 }
0x23ae   :  { %v2477_v35 = vpop.permute.xlu1 %2476 }
0x23af   :  { %v2482_v37 = vmul.f32 %v3777_v31, %v2477_v35  ;;  %2488 = vrot.lane.b32.xlu0 %v2483_v56, %s3836_s27 }
0x23b1   :  { %2486 = vrot.lane.b32.xlu1 %v2482_v37, %s3836_s27 }
0x2421   :  { %v2489_v40 = vpop.permute.xlu0 %2488 }
0x2422   :  { %v4576_v8 = vadd.f32 %v2489_v40, %v2473_v39  ;;  %v3830_v40 = vld [vmem:[%s4790_s1 + $0x68] sm:$0xff] }
0x2423   :  { %v2487_v45 = vpop.permute.xlu1 %2486 }
0x2424   :  { %3778 = vtanh.f32 %v4576_v8  ;;  %v4580_v5 = vadd.f32 %v2487_v45, %v2472_v42 }
0x2426   :  { %3780 = vtanh.f32 %v4580_v5 }
0x2431   :  { %v3779_v47 = vpop.eup %3778 }
0x2432   :  { %2500 = vrot.lane.b32.xlu0 %v3779_v47, %s3835_s4 }
0x2433   :  { %v3781_v38 = vpop.eup %3780 }
0x2434   :  { %2498 = vrot.lane.b32.xlu1 %v3781_v38, %s3835_s4 }
0x24a4   :  { %v2501_v18 = vpop.permute.xlu0 %2500 }
0x24a5   :  { %v4585_v11 = vmul.f32 %v3775_v30, %v2501_v18 }
0x24a6   :  { %v2499_v22 = vpop.permute.xlu1 %2498 }
0x24a7   :  { %v4587_v15 = vmul.f32 %v3777_v31, %v2499_v22  ;;  %2510 = vrot.lane.b32.xlu0 %v4585_v11, %s3836_s27 }
0x24a9   :  { %2508 = vrot.lane.b32.xlu1 %v4587_v15, %s3836_s27 }
0x24ab   :  { %1774 = vperm.xlu0 %3584, %v3828_v16  }
0x24ad   :  { %1770 = vperm.xlu1 %3590, %v3829_v50  }
0x2519   :  { %v2511_v55 = vpop.permute.xlu0 %2510 }
0x251b   :  { %v2509_v3 = vpop.permute.xlu1 %2508 }
0x251c   :  { %3554 = vmatprep.mubr.msk.f32.mxu1 %vm290_vm2, %v2509_v3 }
0x251d   :  { %3555 = vmatmul.mubr.msk.f32.vlgmr.msra.gmra.mxu1 %vm290_vm2, %v2511_v55 }
0x251e   :  { %3569 = vmatpush3.msra.mxu1 %v4334_v49 }
0x251f   :  { %3570 = vmatprep.subr.mxu1 %v4344_v51 }
0x2520   :  { %3571 = vmatpush3.msra.mxu1 %v4344_v51 }
0x2521   :  { %3572 = vmatprep.subr.mxu1 %v4350_v52 }
0x2522   :  { %3573 = vmatpush3.msra.mxu1 %v4350_v52 }
0x2523   :  { %3574 = vmatprep.subr.mxu1 %v4359_v53 }
0x2524   :  { %3575 = vmatpush3.msra.mxu1 %v4359_v53 }
0x2526   :  { %v1775_v43 = vpop.permute.xlu0 %1774 }
0x2527   :  { %v1810_v13 = vmul.f32 %v4393_v58, %v1775_v43 }
0x2528   :  { %v1771_v48 = vpop.permute.xlu1 %1770 }
0x2529   :  { %v1809_v0 = vmul.f32 %v4393_v58, %v1771_v48  ;;  %v1826_v49 = vadd.f32 %v1810_v13, %v4399_v63 }
0x252b   :  { %v1825_v51 = vadd.f32 %v1809_v0, %v4402_v6 }
0x25dd   :  { %v3556_v14 = vpop.f32.mrf.mxu1 }
0x25de   :  { %v2592_v61 = vadd.f32 %v3556_v14, %v1826_v49 }
0x25df   :  { %v2582_v1 = vpop.f32.mrf.mxu1 }
0x25e0   :  { %v3222_v2 = vmul.f32 -1.442695, %v2592_v61  ;;  %v2591_v4 = vadd.f32 %v2582_v1, %v1825_v51 }
0x25e2   :  { %3782 = vpow2.f32 %v3222_v2  ;;  %v3221_v52 = vmul.f32 -1.442695, %v2591_v4 }
0x25e4   :  { %3784 = vpow2.f32 %v3221_v52 }
0x25ef   :  { %v3783_v17 = vpop.eup %3782 }
0x25f0   :  { %v2600_v53 = vadd.f32 1.0, %v3783_v17 }
0x25f1   :  { %v3785_v7 = vpop.eup %3784 }
0x25f2   :  { %3786 = vrcp.f32 %v2600_v53  ;;  %v2599_v9 = vadd.f32 1.0, %v3785_v7 }
0x25f4   :  { %3788 = vrcp.f32 %v2599_v9 }
0x25ff   :  { %v3787_v46 = vpop.eup %3786 }
0x2600   :  { %v2606_v28 = vmul.f32 2.0, %v3787_v46  ;;  %v2610_v60 = vmul.f32 %v3787_v46, %v4576_v8  ;;  %v3831_v8 = vld [vmem:[%s4790_s1 + $0x60] sm:$0xff] }
0x2601   :  { %v3789_v20 = vpop.eup %3788 }
0x2602   :  { %v3224_v44 = vadd.f32 -1.0, %v2606_v28  ;;  %v2605_v21 = vmul.f32 2.0, %v3789_v20  ;;  %v2609_v31 = vmul.f32 %v3789_v20, %v4580_v5 }
0x2604   :  { %2615 = vrot.lane.b32.xlu0 %v3224_v44, %s3835_s4  ;;  %v3223_v10 = vadd.f32 -1.0, %v2605_v21 }
0x2606   :  { %2613 = vrot.lane.b32.xlu1 %v3223_v10, %s3835_s4 }
0x2676   :  { %v2616_v23 = vpop.permute.xlu0 %2615 }
0x2677   :  { %v2620_v24 = vmul.f32 %v3787_v46, %v2616_v23 }
0x2678   :  { %v2614_v25 = vpop.permute.xlu1 %2613 }
0x2679   :  { %v2619_v27 = vmul.f32 %v3789_v20, %v2614_v25  ;;  %2625 = vrot.lane.b32.xlu0 %v2620_v24, %s3836_s27 }
0x267b   :  { %2623 = vrot.lane.b32.xlu1 %v2619_v27, %s3836_s27 }
0x26eb   :  { %v2626_v30 = vpop.permute.xlu0 %2625 }
0x26ec   :  { %v2630_v62 = vadd.f32 %v2626_v30, %v2610_v60 }
0x26ed   :  { %v2624_v54 = vpop.permute.xlu1 %2623 }
0x26ee   :  { %3790 = vtanh.f32 %v2630_v62  ;;  %v2629_v32 = vadd.f32 %v2624_v54, %v2609_v31  ;;  %v3833_v54 = vld [vmem:[%s4790_s1 + $0x70] sm:$0xff] }
0x26f0   :  { %3792 = vtanh.f32 %v2629_v32 }
0x26fb   :  { %v3791_v33 = vpop.eup %3790 }
0x26fc   :  { %2637 = vrot.lane.b32.xlu0 %v3791_v33, %s3835_s4 }
0x26fd   :  { %v3793_v34 = vpop.eup %3792 }
0x26fe   :  { %2635 = vrot.lane.b32.xlu1 %v3793_v34, %s3835_s4 }
0x276e   :  { %v2638_v56 = vpop.permute.xlu0 %2637 }
0x276f   :  { %v4620_v35 = vmul.f32 %v3787_v46, %v2638_v56 }
0x2770   :  { %v2636_v37 = vpop.permute.xlu1 %2635 }
0x2771   :  { %v4622_v39 = vmul.f32 %v3789_v20, %v2636_v37  ;;  %2647 = vrot.lane.b32.xlu0 %v4620_v35, %s3836_s27 }
0x2773   :  { %2645 = vrot.lane.b32.xlu1 %v4622_v39, %s3836_s27 }
0x2775   :  { %1782 = vperm.xlu0 %3584, %v3830_v40  }
0x2777   :  { %1778 = vperm.xlu1 %3590, %v3831_v8  }
0x27e3   :  { %v2648_v45 = vpop.permute.xlu0 %2647 }
0x27e5   :  { %v2646_v42 = vpop.permute.xlu1 %2645 }
0x27e6   :  { %3565 = vmatprep.mubr.msk.f32.mxu0 %vm290_vm2, %v2646_v42 }
0x27e7   :  { %3566 = vmatmul.mubr.msk.f32.vlgmr.msra.gmra.mxu0 %vm290_vm2, %v2648_v45 }
0x27f0   :  { %v1783_v5 = vpop.permute.xlu0 %1782 }
0x27f1   :  { %v1812_v38 = vmul.f32 %v4393_v58, %v1783_v5 }
0x27f2   :  { %v1779_v47 = vpop.permute.xlu1 %1778 }
0x27f3   :  { %v1811_v18 = vmul.f32 %v4393_v58, %v1779_v47  ;;  %v1828_v22 = vadd.f32 %v1812_v38, %v4399_v63 }
0x27f5   :  { %v1827_v3 = vadd.f32 %v1811_v18, %v4402_v6 }
0x28a7   :  { %v3567_v16 = vpop.f32.mrf.mxu0 }
0x28a8   :  { %v2729_v50 = vadd.f32 %v3567_v16, %v1828_v22 }
0x28a9   :  { %v2719_v55 = vpop.f32.mrf.mxu0 }
0x28aa   :  { %v3228_v43 = vmul.f32 -1.442695, %v2729_v50  ;;  %v2728_v48 = vadd.f32 %v2719_v55, %v1827_v3 }
0x28ac   :  { %3794 = vpow2.f32 %v3228_v43  ;;  %v3227_v13 = vmul.f32 -1.442695, %v2728_v48 }
0x28ae   :  { %3796 = vpow2.f32 %v3227_v13 }
0x28b9   :  { %v3795_v0 = vpop.eup %3794 }
0x28ba   :  { %v2737_v49 = vadd.f32 1.0, %v3795_v0 }
0x28bb   :  { %v3797_v14 = vpop.eup %3796 }
0x28bc   :  { %3798 = vrcp.f32 %v2737_v49  ;;  %v2736_v61 = vadd.f32 1.0, %v3797_v14 }
0x28be   :  { %3800 = vrcp.f32 %v2736_v61 }
0x28c9   :  { %v3799_v51 = vpop.eup %3798 }
0x28ca   :  { %v2743_v1 = vmul.f32 2.0, %v3799_v51  ;;  %v2747_v28 = vmul.f32 %v3799_v51, %v2630_v62  ;;  %v3832_v62 = vld [vmem:[%s4790_s1 + $0x78] sm:$0xff] }
0x28cb   :  { %v3801_v2 = vpop.eup %3800 }
0x28cc   :  { %v3230_v4 = vadd.f32 -1.0, %v2743_v1  ;;  %v2742_v52 = vmul.f32 2.0, %v3801_v2  ;;  %v2746_v21 = vmul.f32 %v3801_v2, %v2629_v32 }
0x28ce   :  { %2752 = vrot.lane.b32.xlu0 %v3230_v4, %s3835_s4  ;;  %v3229_v17 = vadd.f32 -1.0, %v2742_v52 }
0x28d0   :  { %2750 = vrot.lane.b32.xlu1 %v3229_v17, %s3835_s4 }
0x2940   :  { %v2753_v53 = vpop.permute.xlu0 %2752 }
0x2941   :  { %v2757_v7 = vmul.f32 %v3799_v51, %v2753_v53 }
0x2942   :  { %v2751_v9 = vpop.permute.xlu1 %2750 }
0x2943   :  { %v2756_v46 = vmul.f32 %v3801_v2, %v2751_v9  ;;  %2762 = vrot.lane.b32.xlu0 %v2757_v7, %s3836_s27  ;;  %v3237_v9 = vld [vmem:[%s4800_s11] ss:$0 sm:$0xff] }
0x2945   :  { %2760 = vrot.lane.b32.xlu1 %v2756_v46, %s3836_s27 }
0x29b5   :  { %v2763_v20 = vpop.permute.xlu0 %2762 }
0x29b6   :  { %v2767_v44 = vadd.f32 %v2763_v20, %v2747_v28 }
0x29b7   :  { %v2761_v10 = vpop.permute.xlu1 %2760 }
0x29b8   :  { %3802 = vtanh.f32 %v2767_v44  ;;  %v2766_v23 = vadd.f32 %v2761_v10, %v2746_v21 }
0x29ba   :  { %3804 = vtanh.f32 %v2766_v23 }
0x29c5   :  { %v3803_v24 = vpop.eup %3802 }
0x29c6   :  { %2774 = vrot.lane.b32.xlu0 %v3803_v24, %s3835_s4 }
0x29c7   :  { %v3805_v25 = vpop.eup %3804 }
0x29c8   :  { %2772 = vrot.lane.b32.xlu1 %v3805_v25, %s3835_s4 }
0x2a38   :  { %v2775_v27 = vpop.permute.xlu0 %2774 }
0x2a39   :  { %v4646_v60 = vmul.f32 %v3799_v51, %v2775_v27 }
0x2a3a   :  { %v2773_v30 = vpop.permute.xlu1 %2772 }
0x2a3b   :  { %v4648_v31 = vmul.f32 %v3801_v2, %v2773_v30  ;;  %2784 = vrot.lane.b32.xlu0 %v4646_v60, %s3836_s27 }
0x2a3d   :  { %2782 = vrot.lane.b32.xlu1 %v4648_v31, %s3836_s27 }
0x2a3f   :  { %1790 = vperm.xlu0 %3584, %v3832_v62  }
0x2a41   :  { %1786 = vperm.xlu1 %3590, %v3833_v54  }
0x2aad   :  { %v2785_v33 = vpop.permute.xlu0 %2784 }
0x2aaf   :  { %v2783_v32 = vpop.permute.xlu1 %2782 }
0x2ab0   :  { %3576 = vmatprep.mubr.msk.f32.mxu1 %vm290_vm2, %v2783_v32 }
0x2ab1   :  { %3577 = vmatmul.mubr.msk.f32.vlgmr.msra.gmra.mxu1 %vm290_vm2, %v2785_v33 }
0x2aba   :  { %v1791_v34 = vpop.permute.xlu0 %1790 }
0x2abb   :  { %v1814_v37 = vmul.f32 %v4393_v58, %v1791_v34 }
0x2abc   :  { %v1787_v56 = vpop.permute.xlu1 %1786 }
0x2abd   :  { %v1813_v40 = vmul.f32 %v4393_v58, %v1787_v56  ;;  %v1830_v8 = vadd.f32 %v1814_v37, %v4399_v63 }
0x2abf   :  { %v1829_v5 = vadd.f32 %v1813_v40, %v4402_v6 }
0x2b71   :  { %v3578_v42 = vpop.f32.mrf.mxu1 }
0x2b72   :  { %v2866_v45 = vadd.f32 %v3578_v42, %v1830_v8 }
0x2b73   :  { %v2856_v47 = vpop.f32.mrf.mxu1 }
0x2b74   :  { %v3234_v38 = vmul.f32 -1.442695, %v2866_v45  ;;  %v2865_v18 = vadd.f32 %v2856_v47, %v1829_v5 }
0x2b76   :  { %3806 = vpow2.f32 %v3234_v38  ;;  %v3233_v22 = vmul.f32 -1.442695, %v2865_v18 }
0x2b78   :  { %3808 = vpow2.f32 %v3233_v22 }
0x2b83   :  { %v3807_v16 = vpop.eup %3806 }
0x2b84   :  { %v2874_v50 = vadd.f32 1.0, %v3807_v16 }
0x2b85   :  { %v3809_v3 = vpop.eup %3808 }
0x2b86   :  { %3810 = vrcp.f32 %v2874_v50  ;;  %v2873_v55 = vadd.f32 1.0, %v3809_v3 }
0x2b88   :  { %3812 = vrcp.f32 %v2873_v55 }
0x2b93   :  { %v3811_v43 = vpop.eup %3810 }
0x2b94   :  { %v2880_v58 = vmul.f32 2.0, %v3811_v43  ;;  %v2884_v51 = vmul.f32 %v3811_v43, %v2767_v44 }
0x2b95   :  { %v3813_v48 = vpop.eup %3812 }
0x2b96   :  { %v3236_v63 = vadd.f32 -1.0, %v2880_v58  ;;  %v2879_v13 = vmul.f32 2.0, %v3813_v48  ;;  %v2883_v4 = vmul.f32 %v3813_v48, %v2766_v23 }
0x2b98   :  { %2889 = vrot.lane.b32.xlu0 %v3236_v63, %s3835_s4  ;;  %v3235_v6 = vadd.f32 -1.0, %v2879_v13 }
0x2b9a   :  { %2887 = vrot.lane.b32.xlu1 %v3235_v6, %s3835_s4 }
0x2c0a   :  { %v2890_v0 = vpop.permute.xlu0 %2889 }
0x2c0b   :  { %v2894_v49 = vmul.f32 %v3811_v43, %v2890_v0 }
0x2c0c   :  { %v2888_v14 = vpop.permute.xlu1 %2887 }
0x2c0d   :  { %v2893_v61 = vmul.f32 %v3813_v48, %v2888_v14  ;;  %2899 = vrot.lane.b32.xlu0 %v2894_v49, %s3836_s27 }
0x2c0f   :  { %2897 = vrot.lane.b32.xlu1 %v2893_v61, %s3836_s27 }
0x2c7f   :  { %v2900_v1 = vpop.permute.xlu0 %2899 }
0x2c80   :  { %v2904_v2 = vadd.f32 %v2900_v1, %v2884_v51 }
0x2c81   :  { %v2898_v52 = vpop.permute.xlu1 %2897 }
0x2c82   :  { %3814 = vtanh.f32 %v2904_v2  ;;  %v2903_v17 = vadd.f32 %v2898_v52, %v2883_v4 }
0x2c84   :  { %3816 = vtanh.f32 %v2903_v17 }
0x2c8f   :  { %v3815_v53 = vpop.eup %3814 }
0x2c90   :  { %2911 = vrot.lane.b32.xlu0 %v3815_v53, %s3835_s4 }
0x2c91   :  { %v3817_v7 = vpop.eup %3816 }
0x2c92   :  { %2909 = vrot.lane.b32.xlu1 %v3817_v7, %s3835_s4 }
0x2c96   :  { %2923 = vrot.lane.b32.xlu1 %v3237_v9, %s3838_s19 }
0x2d04   :  { %v2910_v46 = vpop.permute.xlu1 %2909 }
0x2d05   :  { %v2915_v27 = vmul.f32 %v3813_v48, %v2910_v46 }
0x2d08   :  { %v2924_v28 = vpop.permute.xlu1 %2923 }
0x2d09   :  { %v2927_v20 = vmul.f32 %v2924_v28, %v4418_v41  ;;  %v2926_v44 = vmul.f32 %v2924_v28, %v4420_v36  ;;  %v2929_v21 = vmul.f32 %v2924_v28, %v4460_v12  ;;  %v2928_v10 = vmul.f32 %v2924_v28, %v4462_v29 }
0x2d0a   :  { %v2931_v23 = vmul.f32 %v2924_v28, %v4502_v26  ;;  %v2930_v24 = vmul.f32 %v2924_v28, %v4504_v19  ;;  %v2933_v41 = vmul.f32 %v2924_v28, %v4544_v57  ;;  %v2932_v36 = vmul.f32 %v2924_v28, %v4546_v59  ;;  %v2912_v57 = vpop.permute.xlu0 %2911 }
0x2d0b   :  { %2960 = vrot.lane.b32.xlu1 %v2927_v20, %s3836_s27  ;;  %2958 = vrot.lane.b32.xlu0 %v2926_v44, %s3836_s27  ;;  %v2935_v12 = vmul.f32 %v2924_v28, %v4585_v11  ;;  %v2934_v29 = vmul.f32 %v2924_v28, %v4587_v15  ;;  %v2937_v26 = vmul.f32 %v2924_v28, %v4620_v35  ;;  %v20_v59 = vstv %s4801_s12 }
0x2d0c   :  { %v2936_v19 = vmul.f32 %v2924_v28, %v4622_v39  ;;  %v2939_v11 = vmul.f32 %v2924_v28, %v4646_v60  ;;  %v2938_v15 = vmul.f32 %v2924_v28, %v4648_v31  ;;  %21 = vst [vmem:[#allocation2] sm:$0x1] %v20_v59  ;;  %v2916_v25 = vmul.f32 %v3811_v43, %v2912_v57 }
0x2d0d   :  { %v2940_v39 = vmul.f32 %v2924_v28, %v2915_v27 }
0x2d0e   :  { %v2941_v35 = vmul.f32 %v2924_v28, %v2916_v25 }
0x2d0f   :  { %2964 = vrot.lane.b32.xlu1 %v2929_v21, %s3836_s27  ;;  %2962 = vrot.lane.b32.xlu0 %v2928_v10, %s3836_s27 }
0x2d13   :  { %2968 = vrot.lane.b32.xlu1 %v2931_v23, %s3836_s27  ;;  %2966 = vrot.lane.b32.xlu0 %v2930_v24, %s3836_s27  ;;  %v3238_v61 = vld [vmem:[#allocation2] ss:$0 sm:$0xff] }
0x2d17   :  { %2972 = vrot.lane.b32.xlu1 %v2933_v41, %s3836_s27  ;;  %2970 = vrot.lane.b32.xlu0 %v2932_v36, %s3836_s27 }
0x2d1b   :  { %2976 = vrot.lane.b32.xlu1 %v2935_v12, %s3836_s27  ;;  %2974 = vrot.lane.b32.xlu0 %v2934_v29, %s3836_s27 }
0x2d1f   :  { %2980 = vrot.lane.b32.xlu1 %v2937_v26, %s3836_s27  ;;  %2978 = vrot.lane.b32.xlu0 %v2936_v19, %s3836_s27 }
0x2d23   :  { %2984 = vrot.lane.b32.xlu1 %v2939_v11, %s3836_s27  ;;  %2982 = vrot.lane.b32.xlu0 %v2938_v15, %s3836_s27 }
0x2d27   :  { %2988 = vrot.lane.b32.xlu1 %v2941_v35, %s3836_s27  ;;  %2986 = vrot.lane.b32.xlu0 %v2940_v39, %s3836_s27 }
0x2d7d   :  { %v2961_v30 = vpop.permute.xlu1 %2960  ;;  %v2959_v62 = vpop.permute.xlu0 %2958 }
0x2d7e   :  { %v3009_v54 = vsel %vm290_vm2, %v2961_v30, 0.0  ;;  %v3006_v60 = vsel %vm290_vm2, %v2959_v62, 0.0 }
0x2d7f   :  { %3010 = vadd.xlane.f32.xlu1 %v3009_v54  ;;  %3007 = vadd.xlane.f32.xlu0 %v3006_v60 }
0x2d81   :  { %v2965_v31 = vpop.permute.xlu1 %2964  ;;  %v2963_v32 = vpop.permute.xlu0 %2962 }
0x2d82   :  { %v3012_v33 = vsel %vm290_vm2, %v2963_v32, 0.0  ;;  %v3015_v37 = vsel %vm290_vm2, %v2965_v31, 0.0 }
0x2d83   :  { %3013 = vadd.xlane.f32.xlu0 %v3012_v33 }
0x2d85   :  { %v2969_v34 = vpop.permute.xlu1 %2968  ;;  %v2967_v56 = vpop.permute.xlu0 %2966 }
0x2d86   :  { %v3018_v40 = vsel %vm290_vm2, %v2967_v56, 0.0  ;;  %v3021_v45 = vsel %vm290_vm2, %v2969_v34, 0.0 }
0x2d87   :  { %3016 = vadd.xlane.f32.xlu0 %v3015_v37  ;;  %3019 = vadd.xlane.f32.xlu1 %v3018_v40 }
0x2d89   :  { %v2973_v8 = vpop.permute.xlu1 %2972  ;;  %v2971_v42 = vpop.permute.xlu0 %2970 }
0x2d8a   :  { %v3024_v5 = vsel %vm290_vm2, %v2971_v42, 0.0  ;;  %v3027_v18 = vsel %vm290_vm2, %v2973_v8, 0.0 }
0x2d8b   :  { %3022 = vadd.xlane.f32.xlu0 %v3021_v45  ;;  %3025 = vadd.xlane.f32.xlu1 %v3024_v5 }
0x2d8d   :  { %v2977_v47 = vpop.permute.xlu1 %2976  ;;  %v2975_v38 = vpop.permute.xlu0 %2974 }
0x2d8e   :  { %v3030_v22 = vsel %vm290_vm2, %v2975_v38, 0.0  ;;  %v3033_v3 = vsel %vm290_vm2, %v2977_v47, 0.0 }
0x2d8f   :  { %3028 = vadd.xlane.f32.xlu0 %v3027_v18  ;;  %3031 = vadd.xlane.f32.xlu1 %v3030_v22 }
0x2d91   :  { %v2981_v16 = vpop.permute.xlu1 %2980  ;;  %v2979_v50 = vpop.permute.xlu0 %2978 }
0x2d92   :  { %v3036_v55 = vsel %vm290_vm2, %v2979_v50, 0.0  ;;  %v3039_v48 = vsel %vm290_vm2, %v2981_v16, 0.0 }
0x2d93   :  { %3034 = vadd.xlane.f32.xlu0 %v3033_v3  ;;  %3037 = vadd.xlane.f32.xlu1 %v3036_v55 }
0x2d95   :  { %v2985_v43 = vpop.permute.xlu1 %2984  ;;  %v2983_v58 = vpop.permute.xlu0 %2982 }
0x2d96   :  { %v3042_v63 = vsel %vm290_vm2, %v2983_v58, 0.0  ;;  %v3045_v6 = vsel %vm290_vm2, %v2985_v43, 0.0 }
0x2d97   :  { %3040 = vadd.xlane.f32.xlu0 %v3039_v48  ;;  %3043 = vadd.xlane.f32.xlu1 %v3042_v63 }
0x2d99   :  { %v2987_v13 = vpop.permute.xlu0 %2986  ;;  %v2989_v49 = vpop.permute.xlu1 %2988 }
0x2d9a   :  { %v3048_v0 = vsel %vm290_vm2, %v2987_v13, 0.0  ;;  %v3051_v14 = vsel %vm290_vm2, %v2989_v49, 0.0 }
0x2d9b   :  { %3046 = vadd.xlane.f32.xlu0 %v3045_v6  ;;  %3049 = vadd.xlane.f32.xlu1 %v3048_v0 }
0x2d9f   :  { %3052 = vadd.xlane.f32.xlu0 %v3051_v14 }
0x2e08   :  { %v3011_v51 = vpop.xlane.xlu1 %3010  ;;  %v3008_v1 = vpop.xlane.xlu0 %3007 }
0x2e09   :  { %v3062_v2 = vadd.f32 %v3238_v61, %v3011_v51  ;;  %v3061_v4 = vadd.f32 %v3238_v61, %v3008_v1 }
0x2e0b   :  { %3079 = vst.msk [vmem:[%s4802_s13 + $0x8] sm:$0xff] %vm3077_vm9, %v3062_v2  ;;  %3078 = vst.msk [vmem:[%s4802_s13] sm:$0xff] %vm3077_vm9, %v3061_v4 }
0x2e0c   :  { %v3014_v52 = vpop.xlane.xlu0 %3013 }
0x2e0d   :  { %v3063_v17 = vadd.f32 %v3238_v61, %v3014_v52 }
0x2e0f   :  { %3080 = vst.msk [vmem:[%s4802_s13 + $0x10] sm:$0xff] %vm3077_vm9, %v3063_v17 }
0x2e10   :  { %v3020_v53 = vpop.xlane.xlu1 %3019  ;;  %v3017_v7 = vpop.xlane.xlu0 %3016 }
0x2e11   :  { %v3065_v9 = vadd.f32 %v3238_v61, %v3020_v53  ;;  %v3064_v46 = vadd.f32 %v3238_v61, %v3017_v7 }
0x2e13   :  { %3082 = vst.msk [vmem:[%s4802_s13 + $0x20] sm:$0xff] %vm3077_vm9, %v3065_v9  ;;  %3081 = vst.msk [vmem:[%s4802_s13 + $0x18] sm:$0xff] %vm3077_vm9, %v3064_v46 }
0x2e14   :  { %v3026_v28 = vpop.xlane.xlu1 %3025  ;;  %v3023_v20 = vpop.xlane.xlu0 %3022 }
0x2e15   :  { %v3067_v44 = vadd.f32 %v3238_v61, %v3026_v28  ;;  %v3066_v21 = vadd.f32 %v3238_v61, %v3023_v20 }
0x2e17   :  { %3084 = vst.msk [vmem:[%s4802_s13 + $0x30] sm:$0xff] %vm3077_vm9, %v3067_v44  ;;  %3083 = vst.msk [vmem:[%s4802_s13 + $0x28] sm:$0xff] %vm3077_vm9, %v3066_v21 }
0x2e18   :  { %v3032_v10 = vpop.xlane.xlu1 %3031  ;;  %v3029_v23 = vpop.xlane.xlu0 %3028 }
0x2e19   :  { %v3069_v24 = vadd.f32 %v3238_v61, %v3032_v10  ;;  %v3068_v41 = vadd.f32 %v3238_v61, %v3029_v23 }
0x2e1b   :  { %3086 = vst.msk [vmem:[%s4802_s13 + $0x40] sm:$0xff] %vm3077_vm9, %v3069_v24  ;;  %3085 = vst.msk [vmem:[%s4802_s13 + $0x38] sm:$0xff] %vm3077_vm9, %v3068_v41 }
0x2e1c   :  { %v3038_v36 = vpop.xlane.xlu1 %3037  ;;  %v3035_v12 = vpop.xlane.xlu0 %3034 }
0x2e1d   :  { %v3071_v29 = vadd.f32 %v3238_v61, %v3038_v36  ;;  %v3070_v26 = vadd.f32 %v3238_v61, %v3035_v12 }
0x2e1f   :  { %3088 = vst.msk [vmem:[%s4802_s13 + $0x50] sm:$0xff] %vm3077_vm9, %v3071_v29  ;;  %3087 = vst.msk [vmem:[%s4802_s13 + $0x48] sm:$0xff] %vm3077_vm9, %v3070_v26 }
0x2e20   :  { %v3044_v19 = vpop.xlane.xlu1 %3043  ;;  %v3041_v57 = vpop.xlane.xlu0 %3040 }
0x2e21   :  { %v3073_v59 = vadd.f32 %v3238_v61, %v3044_v19  ;;  %v3072_v11 = vadd.f32 %v3238_v61, %v3041_v57 }
0x2e23   :  { %3090 = vst.msk [vmem:[%s4802_s13 + $0x60] sm:$0xff] %vm3077_vm9, %v3073_v59  ;;  %3089 = vst.msk [vmem:[%s4802_s13 + $0x58] sm:$0xff] %vm3077_vm9, %v3072_v11 }
0x2e24   :  { %v3050_v15 = vpop.xlane.xlu1 %3049  ;;  %v3047_v25 = vpop.xlane.xlu0 %3046 }
0x2e25   :  { %v3075_v27 = vadd.f32 %v3238_v61, %v3050_v15  ;;  %v3074_v35 = vadd.f32 %v3238_v61, %v3047_v25 }
0x2e27   :  { %3092 = vst.msk [vmem:[%s4802_s13 + $0x70] sm:$0xff] %vm3077_vm9, %v3075_v27  ;;  %3091 = vst.msk [vmem:[%s4802_s13 + $0x68] sm:$0xff] %vm3077_vm9, %v3074_v35 }
0x2e28   :  { %v3053_v39 = vpop.xlane.xlu0 %3052 }
0x2e29   :  { %v3076_v30 = vadd.f32 %v3238_v61, %v3053_v39 }
0x2e2b   :  { %3093 = vst.msk [vmem:[%s4802_s13 + $0x78] sm:$0xff] %vm3077_vm9, %v3076_v30 }

</bundles_post_ra>
